<compile_context>
chip_gen: v5e
topology: v5e:2x2
jax: 0.10.0
libtpu: 0.0.40
codegen_flags: <defaults>
</compile_context>

<pallas_src>
import functools
import math

import jax
import jax.numpy as jnp
from jax.experimental import pallas as pl
from jax.experimental.pallas import tpu as pltpu

# ----------------------------- configuration -----------------------------

CFG = dict(
    batch=2,               # B independent structures (grid axis, "parallel")
    num_nodes=16,          # N residues per structure
    num_neighbours=4,      # K neighbours per residue (structure)
    angle_size=7,          # angle_features width
    out_size=8,            # sequence class count == decoder out_size
    size=32,               # transformer model width
    attention_size=16,     # total attention width
    heads=2,               # -> head_dim = 8
    hidden_size=32,
    mlp_depth=3,
    depth=2,
    distance_size=5,       # raw per-node distance feature width
    max_distance=20.0,
    distance_kernels=8,
    latent_size=256,       # hardcoded self.latent_size = 256
)
CFG["in_size"] = CFG["angle_size"] + CFG["out_size"] + 1
CFG["edge_size"] = CFG["distance_size"] - 1 + CFG["distance_kernels"]


# ------------------------------ fused kernel ------------------------------

def _generator_kernel(
    # batched per-structure data (leading block dim 1)
    angle_ref, seq_ref, mask_ref, dist_ref, sel_ref, lat_ref,
    # input embedding (row-split of the original (in_size, size) weight)
    w_in_a_ref, w_in_s_ref, w_in_m_ref, b_in_ref,
    # stacked transformer layers (L = 2*depth: encoder then decoder)
    wq_ref, bq_ref, wkv_x_ref, wkv_d_ref, wkv_r_ref, bkv_ref,
    wo_ref, bo_ref,
    w_mlp0_ref, b_mlp0_ref, w_mlp1_ref, b_mlp1_ref, w_mlp2_ref, b_mlp2_ref,
    # decoder latent conditioning (all layers fused) + output head
    wc_ref, bc_ref, w_out_ref, b_out_ref,
    # constants
    mu_ref, rhead_ref, ehead_ref,
    # output
    o_ref,
    *, cfg):
  N = cfg["num_nodes"]
  K = cfg["num_neighbours"]
  size = cfg["size"]
  att = cfg["attention_size"]
  heads = cfg["heads"]
  d_head = att // heads
  depth = cfg["depth"]
  L = 2 * depth
  Dr = cfg["distance_size"]
  kernels = cfg["distance_kernels"]

  f32 = jnp.float32
  dot = functools.partial(jnp.dot, preferred_element_type=f32)

  angle = angle_ref[0]                  # (N, angle_size)
  seq = seq_ref[0]                      # (N, out_size)
  mask = mask_ref[0]                    # (N, 1)
  dist = dist_ref[0]                    # (N, Dr)
  lat = lat_ref[0]                      # (1, latent_size)
  mu = mu_ref[...]                      # (1, kernels)
  rhead = rhead_ref[...]                # (att, heads)  per-head reduce matrix
  ehead = ehead_ref[...]                # (heads, att)  per-head expand matrix

  # ---- input embedding: features = cat(angle, sequence, mask[:,None]) ----
  # (concat folded into row-split weights; mask column is a broadcast mul)
  x = (dot(angle, w_in_a_ref[...]) + dot(seq, w_in_s_ref[...])
       + mask * w_in_m_ref[...] + b_in_ref[...])            # (N, size)

  # ---- layer-independent relative/edge features per neighbour slot ----
  # RelativeStructure(structure, rbf).message(distances, distances)
  sigma = cfg["max_distance"] / kernels
  inv2s2 = 1.0 / (2.0 * sigma * sigma)
  diff_trim = []
  rbf = []
  for k in range(K):
    sel_k = sel_ref[0, k]                                    # (N, N) one-hot
    nbr_d = dot(sel_k, dist)                                 # gather on MXU
    diff = nbr_d - dist                                      # (N, Dr)
    dd = jnp.sqrt(jnp.sum(diff * diff, axis=-1, keepdims=True) + 1e-8)
    rbf.append(jnp.exp(-((dd - mu) ** 2) * inv2s2))          # (N, kernels)
    diff_trim.append(diff[:, :Dr - 1])                       # (N, Dr-1)

  # ---- latent conditioning for ALL decoder layers in one matmul ----
  cond_all = dot(lat, wc_ref[...]) + bc_ref[...]             # (1, depth*2*size)

  scale_attn = 1.0 / math.sqrt(d_head)

  # ---- transformer layers (encoder: l < depth, decoder: l >= depth) ----
  for l in range(L):
    q = dot(x, wq_ref[l]) + bq_ref[l]                        # (N, att)

    vs, ss = [], []
    for k in range(K):
      x_nb = dot(sel_ref[0, k], x)                           # (N, size) gather
      kv = (dot(x_nb, wkv_x_ref[l]) + dot(diff_trim[k], wkv_d_ref[l])
            + dot(rbf[k], wkv_r_ref[l]) + bkv_ref[l])        # (N, 2*att)
      k_k = kv[:, :att]
      v_k = kv[:, att:]
      s_k = dot(q * k_k, rhead) * scale_attn                 # (N, heads)
      vs.append(v_k)
      ss.append(s_k)

    # softmax over the K neighbour slots (per node, per head)
    m = ss[0]
    for k in range(1, K):
      m = jnp.maximum(m, ss[k])
    es = [jnp.exp(s_k - m) for s_k in ss]
    den = es[0]
    for k in range(1, K):
      den = den + es[k]
    rden = pl.reciprocal(den, approx=True)                   # EUP slot
    attn = jnp.zeros((N, att), f32)
    for k in range(K):
      attn = attn + dot(es[k] * rden, ehead) * vs[k]         # (N, att)

    x = x + dot(attn, wo_ref[l]) + bo_ref[l]                 # residual attn

    # residual MLP (activation = relu_)
    h = jnp.maximum(dot(x, w_mlp0_ref[l]) + b_mlp0_ref[l], 0.0)
    h = jnp.maximum(dot(h, w_mlp1_ref[l]) + b_mlp1_ref[l], 0.0)
    h = dot(h, w_mlp2_ref[l]) + b_mlp2_ref[l]
    x = x + h

    if l >= depth:                                           # adaptive cond
      dl = l - depth
      c = cond_all[:, dl * 2 * size:(dl + 1) * 2 * size]     # (1, 2*size)
      x = x * (1.0 + c[:, :size]) + c[:, size:]

  # ---- output head + finalize: result[mask>0] = log(sequence)[mask>0] ----
  result = dot(x, w_out_ref[...]) + b_out_ref[...]           # (N, out_size)
  result = jnp.where(mask > 0.0, jnp.log(seq), result)
  o_ref[0] = result


# ------------------------------ wrapper -----------------------------------

def forward(params, latents, angle, sequence, mask, distances, nbr_idx):
  cfg = CFG
  B = angle.shape[0]
  N = cfg["num_nodes"]
  heads = cfg["heads"]
  att = cfg["attention_size"]
  d_head = att // heads

  # one-hot gather matrices per neighbour slot: sel[b,k,i,j]=1 iff nbr[b,i,k]==j
  sel = jnp.transpose(jax.nn.one_hot(nbr_idx, N, dtype=jnp.float32),
                      (0, 2, 1, 3))                          # (B, K, N, N)
  mask2d = mask[..., None].astype(jnp.float32)               # (B, N, 1)
  lat3 = latents.reshape(B, 1, cfg["latent_size"]).astype(jnp.float32)

  mu = jnp.linspace(0.0, cfg["max_distance"], cfg["distance_kernels"],
                    dtype=jnp.float32).reshape(1, -1)
  rhead = jnp.repeat(jnp.eye(heads, dtype=jnp.float32), d_head, axis=0)
  ehead = rhead.T

  batched = [angle.astype(jnp.float32), sequence.astype(jnp.float32),
             mask2d, distances.astype(jnp.float32), sel, lat3]
  weights = [params[n] for n in (
      "w_in_a", "w_in_s", "w_in_m", "b_in",
      "wq", "bq", "wkv_x", "wkv_d", "wkv_r", "bkv", "wo", "bo",
      "w_mlp0", "b_mlp0", "w_mlp1", "b_mlp1", "w_mlp2", "b_mlp2",
      "wc", "bc", "w_out", "b_out")] + [mu, rhead, ehead]

  def bspec(x):
    n = x.ndim - 1
    return pl.BlockSpec((1,) + x.shape[1:],
                        lambda b, n=n: (b,) + (0,) * n)

  def wspec(x):
    n = x.ndim
    return pl.BlockSpec(x.shape, lambda b, n=n: (0,) * n)

  in_specs = [bspec(x) for x in batched] + [wspec(w) for w in weights]
  out_spec = pl.BlockSpec((1, N, cfg["out_size"]), lambda b: (b, 0, 0))

  return pl.pallas_call(
      functools.partial(_generator_kernel, cfg=cfg),
      out_shape=jax.ShapeDtypeStruct((B, N, cfg["out_size"]), jnp.float32),
      grid=(B,),
      in_specs=in_specs,
      out_specs=out_spec,
      compiler_params=pltpu.CompilerParams(
          dimension_semantics=("parallel",)),
  )(*(batched + weights))


# --------------------------- pure-JAX reference ----------------------------

def reference_forward(params, latents, angle, sequence, mask, distances,
                      nbr_idx):
  cfg = CFG
  size, att, heads = cfg["size"], cfg["attention_size"], cfg["heads"]
  d_head = att // heads
  K = cfg["num_neighbours"]
  depth = cfg["depth"]

  def single(ang, seq, msk, dist, nbr, lat):
    feats = jnp.concatenate([ang, seq, msk[:, None]], axis=1)
    w_in = jnp.concatenate(
        [params["w_in_a"], params["w_in_s"], params["w_in_m"]], axis=0)
    x = feats @ w_in + params["b_in"]

    nbr_d = dist[nbr]
    diff = nbr_d - dist[:, None, :]
    dd = jnp.sqrt(jnp.sum(diff * diff, axis=-1) + 1e-8)
    mu = jnp.linspace(0.0, cfg["max_distance"], cfg["distance_kernels"])
    sigma = cfg["max_distance"] / cfg["distance_kernels"]
    rbf = jnp.exp(-((dd[..., None] - mu) ** 2) / (2.0 * sigma ** 2))
    edges = jnp.concatenate(
        [diff[..., :cfg["distance_size"] - 1], rbf], axis=-1)

    cond_all = lat[None, :] @ params["wc"] + params["bc"]

    for l in range(2 * depth):
      q = (x @ params["wq"][l] + params["bq"][l]).reshape(-1, heads, d_head)
      x_nb = x[nbr]
      wkv = jnp.concatenate(
          [params["wkv_x"][l], params["wkv_d"][l], params["wkv_r"][l]], axis=0)
      kv_in = jnp.concatenate([x_nb, edges], axis=-1)
      kv = kv_in @ wkv + params["bkv"][l]
      k = kv[..., :att].reshape(-1, K, heads, d_head)
      v = kv[..., att:].reshape(-1, K, heads, d_head)
      s = jnp.einsum("nhd,nkhd->nhk", q, k) / math.sqrt(d_head)
      p = jax.nn.softmax(s, axis=-1)
      a = jnp.einsum("nhk,nkhd->nhd", p, v).reshape(-1, att)
      x = x + a @ params["wo"][l] + params["bo"][l]
      h = jax.nn.relu(x @ params["w_mlp0"][l] + params["b_mlp0"][l])
      h = jax.nn.relu(h @ params["w_mlp1"][l] + params["b_mlp1"][l])
      h = h @ params["w_mlp2"][l] + params["b_mlp2"][l]
      x = x + h
      if l >= depth:
        dl = l - depth
        c = cond_all[:, dl * 2 * size:(dl + 1) * 2 * size]
        x = x * (1.0 + c[:, :size]) + c[:, size:]

    res = x @ params["w_out"] + params["b_out"]
    return jnp.where(msk[:, None] > 0, jnp.log(seq), res)

  return jax.vmap(single)(angle, sequence, mask, distances, nbr_idx, latents)


# ------------------------------ parameters --------------------------------

def _dense(key, fan_in, fan_out):
  kw, kb = jax.random.split(key)
  w = jax.random.normal(kw, (fan_in, fan_out), jnp.float32) / math.sqrt(fan_in)
  b = 0.01 * jax.random.normal(kb, (1, fan_out), jnp.float32)
  return w, b


def init_params(key, cfg):
  size, att, hidden = cfg["size"], cfg["attention_size"], cfg["hidden_size"]
  edge, Dr = cfg["edge_size"], cfg["distance_size"]
  depth = cfg["depth"]
  L = 2 * depth
  keys = iter(jax.random.split(key, 256))

  a, s = cfg["angle_size"], cfg["out_size"]
  w_in, b_in = _dense(next(keys), cfg["in_size"], size)
  p = dict(w_in_a=w_in[:a], w_in_s=w_in[a:a + s], w_in_m=w_in[a + s:],
           b_in=b_in)

  layers = []
  for _ in range(L):
    lp = {}
    lp["wq"], lp["bq"] = _dense(next(keys), size, att)
    wkv, bkv = _dense(next(keys), size + edge, 2 * att)   # merged K/V proj
    lp["wkv_x"] = wkv[:size]
    lp["wkv_d"] = wkv[size:size + Dr - 1]
    lp["wkv_r"] = wkv[size + Dr - 1:]
    lp["bkv"] = bkv
    lp["wo"], lp["bo"] = _dense(next(keys), att, size)
    dims = [size] + [hidden] * (cfg["mlp_depth"] - 1) + [size]
    for i in range(cfg["mlp_depth"]):
      lp[f"w_mlp{i}"], lp[f"b_mlp{i}"] = _dense(next(keys), dims[i],
                                                dims[i + 1])
    layers.append(lp)
  for name in layers[0]:
    p[name] = jnp.stack([lp[name] for lp in layers], axis=0)

  # decoder conditioning weights, concatenated for a single hoisted matmul
  wcs, bcs = [], []
  for _ in range(depth):
    wc, bc = _dense(next(keys), cfg["latent_size"], 2 * size)
    wcs.append(wc)
    bcs.append(bc)
  p["wc"] = jnp.concatenate(wcs, axis=1)
  p["bc"] = jnp.concatenate(bcs, axis=1)

  p["w_out"], p["b_out"] = _dense(next(keys), size, cfg["out_size"])
  return p


# --------------------------------- main ------------------------------------

if __name__ == "__main__":
  key = jax.random.PRNGKey(0)
  k_par, k_ang, k_seq, k_msk, k_dst, k_lat = jax.random.split(key, 6)
  B, N, K = CFG["batch"], CFG["num_nodes"], CFG["num_neighbours"]

  angle = jax.random.normal(k_ang, (B, N, CFG["angle_size"]), jnp.float32)
  sequence = jax.nn.softmax(
      jax.random.normal(k_seq, (B, N, CFG["out_size"]), jnp.float32), axis=-1)
  mask = (jax.random.uniform(k_msk, (B, N)) > 0.5).astype(jnp.float32)
  distances = (CFG["max_distance"] / math.sqrt(CFG["distance_size"])) * \
      jax.random.uniform(k_dst, (B, N, CFG["distance_size"]), jnp.float32)
  offsets = jnp.array([1, 2, -1, -2], dtype=jnp.int32)
  nbr_idx = (jnp.arange(N, dtype=jnp.int32)[None, :, None]
             + offsets[None, None, :]) % N
  nbr_idx = jnp.broadcast_to(nbr_idx, (B, N, K))
  latents = jax.random.normal(k_lat, (B, CFG["latent_size"]), jnp.float32)

  params = init_params(k_par, CFG)

  fwd = jax.jit(forward)
  out = fwd(params, latents, angle, sequence, mask, distances, nbr_idx)
  out = jax.block_until_ready(out)

  assert out.shape == (B, N, CFG["out_size"])
  assert bool(jnp.all(jnp.isfinite(out)))

  # verify fused kernel against a plain-JAX reference of the same math
  ref = jax.jit(reference_forward)(params, latents, angle, sequence, mask,
                                   distances, nbr_idx)
  ref = jax.block_until_ready(ref)
  assert bool(jnp.allclose(out, ref, rtol=1e-1, atol=1e-1))

  print("KERNEL_OK")
</pallas_src>

<mosaic_0001>
module attributes {stable_mosaic.version = 11 : i64} {
  func.func @_generator_kernel(%arg0: i32, %arg1: memref<1x16x7xf32, #tpu.memory_space<vmem>>, %arg2: memref<1x16x8xf32, #tpu.memory_space<vmem>>, %arg3: memref<1x16x1xf32, #tpu.memory_space<vmem>>, %arg4: memref<1x16x5xf32, #tpu.memory_space<vmem>>, %arg5: memref<1x4x16x16xf32, #tpu.memory_space<vmem>>, %arg6: memref<1x1x256xf32, #tpu.memory_space<vmem>>, %arg7: memref<7x32xf32, #tpu.memory_space<vmem>>, %arg8: memref<8x32xf32, #tpu.memory_space<vmem>>, %arg9: memref<1x32xf32, #tpu.memory_space<vmem>>, %arg10: memref<1x32xf32, #tpu.memory_space<vmem>>, %arg11: memref<4x32x16xf32, #tpu.memory_space<vmem>>, %arg12: memref<4x1x16xf32, #tpu.memory_space<vmem>>, %arg13: memref<4x32x32xf32, #tpu.memory_space<vmem>>, %arg14: memref<4x4x32xf32, #tpu.memory_space<vmem>>, %arg15: memref<4x8x32xf32, #tpu.memory_space<vmem>>, %arg16: memref<4x1x32xf32, #tpu.memory_space<vmem>>, %arg17: memref<4x16x32xf32, #tpu.memory_space<vmem>>, %arg18: memref<4x1x32xf32, #tpu.memory_space<vmem>>, %arg19: memref<4x32x32xf32, #tpu.memory_space<vmem>>, %arg20: memref<4x1x32xf32, #tpu.memory_space<vmem>>, %arg21: memref<4x32x32xf32, #tpu.memory_space<vmem>>, %arg22: memref<4x1x32xf32, #tpu.memory_space<vmem>>, %arg23: memref<4x32x32xf32, #tpu.memory_space<vmem>>, %arg24: memref<4x1x32xf32, #tpu.memory_space<vmem>>, %arg25: memref<256x128xf32, #tpu.memory_space<vmem>>, %arg26: memref<1x128xf32, #tpu.memory_space<vmem>>, %arg27: memref<32x8xf32, #tpu.memory_space<vmem>>, %arg28: memref<1x8xf32, #tpu.memory_space<vmem>>, %arg29: memref<1x8xf32, #tpu.memory_space<vmem>>, %arg30: memref<16x2xf32, #tpu.memory_space<vmem>>, %arg31: memref<2x16xf32, #tpu.memory_space<vmem>>, %arg32: memref<1x16x8xf32, #tpu.memory_space<vmem>>) attributes {dimension_semantics = [#tpu.dimension_semantics<parallel>], iteration_bounds = array<i64: 2>, scalar_prefetch = 0 : i64, scratch_operands = 0 : i64, tpu.core_type = #tpu.core_type<tc>, window_params = [{transform_indices = @transform_0, window_bounds = array<i64: 1, 16, 7>}, {transform_indices = @transform_1, window_bounds = array<i64: 1, 16, 8>}, {transform_indices = @transform_2, window_bounds = array<i64: 1, 16, 1>}, {transform_indices = @transform_3, window_bounds = array<i64: 1, 16, 5>}, {transform_indices = @transform_4, window_bounds = array<i64: 1, 4, 16, 16>}, {transform_indices = @transform_5, window_bounds = array<i64: 1, 1, 256>}, {pipeline_mode = #tpu.pipeline_mode<synchronous>, transform_indices = @transform_6, window_bounds = array<i64: 7, 32>}, {pipeline_mode = #tpu.pipeline_mode<synchronous>, transform_indices = @transform_7, window_bounds = array<i64: 8, 32>}, {pipeline_mode = #tpu.pipeline_mode<synchronous>, transform_indices = @transform_8, window_bounds = array<i64: 1, 32>}, {pipeline_mode = #tpu.pipeline_mode<synchronous>, transform_indices = @transform_9, window_bounds = array<i64: 1, 32>}, {pipeline_mode = #tpu.pipeline_mode<synchronous>, transform_indices = @transform_10, window_bounds = array<i64: 4, 32, 16>}, {pipeline_mode = #tpu.pipeline_mode<synchronous>, transform_indices = @transform_11, window_bounds = array<i64: 4, 1, 16>}, {pipeline_mode = #tpu.pipeline_mode<synchronous>, transform_indices = @transform_12, window_bounds = array<i64: 4, 32, 32>}, {pipeline_mode = #tpu.pipeline_mode<synchronous>, transform_indices = @transform_13, window_bounds = array<i64: 4, 4, 32>}, {pipeline_mode = #tpu.pipeline_mode<synchronous>, transform_indices = @transform_14, window_bounds = array<i64: 4, 8, 32>}, {pipeline_mode = #tpu.pipeline_mode<synchronous>, transform_indices = @transform_15, window_bounds = array<i64: 4, 1, 32>}, {pipeline_mode = #tpu.pipeline_mode<synchronous>, transform_indices = @transform_16, window_bounds = array<i64: 4, 16, 32>}, {pipeline_mode = #tpu.pipeline_mode<synchronous>, transform_indices = @transform_17, window_bounds = array<i64: 4, 1, 32>}, {pipeline_mode = #tpu.pipeline_mode<synchronous>, transform_indices = @transform_18, window_bounds = array<i64: 4, 32, 32>}, {pipeline_mode = #tpu.pipeline_mode<synchronous>, transform_indices = @transform_19, window_bounds = array<i64: 4, 1, 32>}, {pipeline_mode = #tpu.pipeline_mode<synchronous>, transform_indices = @transform_20, window_bounds = array<i64: 4, 32, 32>}, {pipeline_mode = #tpu.pipeline_mode<synchronous>, transform_indices = @transform_21, window_bounds = array<i64: 4, 1, 32>}, {pipeline_mode = #tpu.pipeline_mode<synchronous>, transform_indices = @transform_22, window_bounds = array<i64: 4, 32, 32>}, {pipeline_mode = #tpu.pipeline_mode<synchronous>, transform_indices = @transform_23, window_bounds = array<i64: 4, 1, 32>}, {pipeline_mode = #tpu.pipeline_mode<synchronous>, transform_indices = @transform_24, window_bounds = array<i64: 256, 128>}, {pipeline_mode = #tpu.pipeline_mode<synchronous>, transform_indices = @transform_25, window_bounds = array<i64: 1, 128>}, {pipeline_mode = #tpu.pipeline_mode<synchronous>, transform_indices = @transform_26, window_bounds = array<i64: 32, 8>}, {pipeline_mode = #tpu.pipeline_mode<synchronous>, transform_indices = @transform_27, window_bounds = array<i64: 1, 8>}, {pipeline_mode = #tpu.pipeline_mode<synchronous>, transform_indices = @transform_28, window_bounds = array<i64: 1, 8>}, {pipeline_mode = #tpu.pipeline_mode<synchronous>, transform_indices = @transform_29, window_bounds = array<i64: 16, 2>}, {pipeline_mode = #tpu.pipeline_mode<synchronous>, transform_indices = @transform_30, window_bounds = array<i64: 2, 16>}, {transform_indices = @transform_31, window_bounds = array<i64: 1, 16, 8>}]} {
    %c0 = arith.constant 0 : index
    %c0_0 = arith.constant 0 : index
    %c0_1 = arith.constant 0 : index
    %0 = vector.load %arg1[%c0, %c0_0, %c0_1] : memref<1x16x7xf32, #tpu.memory_space<vmem>>, vector<1x16x7xf32>
    %1 = vector.shape_cast %0 : vector<1x16x7xf32> to vector<16x7xf32>
    %c0_2 = arith.constant 0 : index
    %c0_3 = arith.constant 0 : index
    %c0_4 = arith.constant 0 : index
    %2 = vector.load %arg2[%c0_2, %c0_3, %c0_4] : memref<1x16x8xf32, #tpu.memory_space<vmem>>, vector<1x16x8xf32>
    %3 = vector.shape_cast %2 : vector<1x16x8xf32> to vector<16x8xf32>
    %c0_5 = arith.constant 0 : index
    %c0_6 = arith.constant 0 : index
    %c0_7 = arith.constant 0 : index
    %4 = vector.load %arg3[%c0_5, %c0_6, %c0_7] : memref<1x16x1xf32, #tpu.memory_space<vmem>>, vector<1x16x1xf32>
    %5 = vector.shape_cast %4 : vector<1x16x1xf32> to vector<16x1xf32>
    %c0_8 = arith.constant 0 : index
    %c0_9 = arith.constant 0 : index
    %c0_10 = arith.constant 0 : index
    %6 = vector.load %arg4[%c0_8, %c0_9, %c0_10] : memref<1x16x5xf32, #tpu.memory_space<vmem>>, vector<1x16x5xf32>
    %7 = vector.shape_cast %6 : vector<1x16x5xf32> to vector<16x5xf32>
    %c0_11 = arith.constant 0 : index
    %c0_12 = arith.constant 0 : index
    %c0_13 = arith.constant 0 : index
    %8 = vector.load %arg6[%c0_11, %c0_12, %c0_13] : memref<1x1x256xf32, #tpu.memory_space<vmem>>, vector<1x1x256xf32>
    %9 = vector.shape_cast %8 : vector<1x1x256xf32> to vector<1x256xf32>
    %c0_14 = arith.constant 0 : index
    %c0_15 = arith.constant 0 : index
    %10 = vector.load %arg29[%c0_14, %c0_15] : memref<1x8xf32, #tpu.memory_space<vmem>>, vector<1x8xf32>
    %c0_16 = arith.constant 0 : index
    %c0_17 = arith.constant 0 : index
    %11 = vector.load %arg30[%c0_16, %c0_17] : memref<16x2xf32, #tpu.memory_space<vmem>>, vector<16x2xf32>
    %c0_18 = arith.constant 0 : index
    %c0_19 = arith.constant 0 : index
    %12 = vector.load %arg31[%c0_18, %c0_19] : memref<2x16xf32, #tpu.memory_space<vmem>>, vector<2x16xf32>
    %c0_20 = arith.constant 0 : index
    %c0_21 = arith.constant 0 : index
    %13 = vector.load %arg7[%c0_20, %c0_21] : memref<7x32xf32, #tpu.memory_space<vmem>>, vector<7x32xf32>
    %cst = arith.constant dense<0.000000e+00> : vector<16x32xf32>
    %14 = tpu.matmul %1, %13, %cst {dimension_numbers = #tpu.dot_dimension_numbers<[1], [0], [0], [1], [0, 0, 1, 1], [], []>} : vector<16x7xf32>, vector<7x32xf32>, vector<16x32xf32> -> vector<16x32xf32>
    %c0_22 = arith.constant 0 : index
    %c0_23 = arith.constant 0 : index
    %15 = vector.load %arg8[%c0_22, %c0_23] : memref<8x32xf32, #tpu.memory_space<vmem>>, vector<8x32xf32>
    %cst_24 = arith.constant dense<0.000000e+00> : vector<16x32xf32>
    %16 = tpu.matmul %3, %15, %cst_24 {dimension_numbers = #tpu.dot_dimension_numbers<[1], [0], [0], [1], [0, 0, 1, 1], [], []>} : vector<16x8xf32>, vector<8x32xf32>, vector<16x32xf32> -> vector<16x32xf32>
    %17 = arith.addf %14, %16 : vector<16x32xf32>
    %c0_25 = arith.constant 0 : index
    %c0_26 = arith.constant 0 : index
    %18 = vector.load %arg9[%c0_25, %c0_26] : memref<1x32xf32, #tpu.memory_space<vmem>>, vector<1x32xf32>
    %19 = vector.broadcast %5 : vector<16x1xf32> to vector<16x32xf32>
    %20 = vector.broadcast %18 : vector<1x32xf32> to vector<16x32xf32>
    %21 = arith.mulf %19, %20 : vector<16x32xf32>
    %22 = arith.addf %17, %21 : vector<16x32xf32>
    %c0_27 = arith.constant 0 : index
    %c0_28 = arith.constant 0 : index
    %23 = vector.load %arg10[%c0_27, %c0_28] : memref<1x32xf32, #tpu.memory_space<vmem>>, vector<1x32xf32>
    %24 = vector.broadcast %23 : vector<1x32xf32> to vector<16x32xf32>
    %25 = arith.addf %22, %24 : vector<16x32xf32>
    %c0_29 = arith.constant 0 : index
    %c0_30 = arith.constant 0 : index
    %c0_31 = arith.constant 0 : index
    %c0_32 = arith.constant 0 : index
    %26 = vector.load %arg5[%c0_29, %c0_30, %c0_31, %c0_32] : memref<1x4x16x16xf32, #tpu.memory_space<vmem>>, vector<1x1x16x16xf32>
    %27 = vector.shape_cast %26 : vector<1x1x16x16xf32> to vector<16x16xf32>
    %cst_33 = arith.constant dense<0.000000e+00> : vector<16x5xf32>
    %28 = tpu.matmul %27, %7, %cst_33 {dimension_numbers = #tpu.dot_dimension_numbers<[1], [0], [0], [1], [0, 0, 1, 1], [], []>} : vector<16x16xf32>, vector<16x5xf32>, vector<16x5xf32> -> vector<16x5xf32>
    %29 = arith.subf %28, %7 : vector<16x5xf32>
    %30 = arith.mulf %29, %29 : vector<16x5xf32>
    %cst_34 = arith.constant dense<0.000000e+00> : vector<16xf32>
    %31 = vector.multi_reduction <add>, %30, %cst_34 [1] : vector<16x5xf32> to vector<16xf32>
    %32 = vector.shape_cast %31 : vector<16xf32> to vector<16x1xf32>
    %cst_35 = arith.constant 9.99999993E-9 : f32
    %33 = vector.broadcast %cst_35 : f32 to vector<16x1xf32>
    %34 = arith.addf %32, %33 : vector<16x1xf32>
    %35 = math.sqrt %34 : vector<16x1xf32>
    %36 = vector.broadcast %35 : vector<16x1xf32> to vector<16x8xf32>
    %37 = vector.broadcast %10 : vector<1x8xf32> to vector<16x8xf32>
    %38 = arith.subf %36, %37 : vector<16x8xf32>
    %39 = arith.mulf %38, %38 : vector<16x8xf32>
    %cst_36 = arith.constant 0.000000e+00 : f32
    %40 = vector.broadcast %cst_36 : f32 to vector<16x8xf32>
    %41 = arith.subf %40, %39 : vector<16x8xf32>
    %cst_37 = arith.constant 8.000000e-02 : f32
    %42 = vector.broadcast %cst_37 : f32 to vector<16x8xf32>
    %43 = arith.mulf %41, %42 : vector<16x8xf32>
    %44 = math.exp %43 : vector<16x8xf32>
    %45 = vector.extract_strided_slice %29 {offsets = [0, 0], sizes = [16, 4], strides = [1, 1]} : vector<16x5xf32> to vector<16x4xf32>
    %c0_38 = arith.constant 0 : index
    %c1 = arith.constant 1 : index
    %c0_39 = arith.constant 0 : index
    %c0_40 = arith.constant 0 : index
    %46 = vector.load %arg5[%c0_38, %c1, %c0_39, %c0_40] : memref<1x4x16x16xf32, #tpu.memory_space<vmem>>, vector<1x1x16x16xf32>
    %47 = vector.shape_cast %46 : vector<1x1x16x16xf32> to vector<16x16xf32>
    %cst_41 = arith.constant dense<0.000000e+00> : vector<16x5xf32>
    %48 = tpu.matmul %47, %7, %cst_41 {dimension_numbers = #tpu.dot_dimension_numbers<[1], [0], [0], [1], [0, 0, 1, 1], [], []>} : vector<16x16xf32>, vector<16x5xf32>, vector<16x5xf32> -> vector<16x5xf32>
    %49 = arith.subf %48, %7 : vector<16x5xf32>
    %50 = arith.mulf %49, %49 : vector<16x5xf32>
    %cst_42 = arith.constant dense<0.000000e+00> : vector<16xf32>
    %51 = vector.multi_reduction <add>, %50, %cst_42 [1] : vector<16x5xf32> to vector<16xf32>
    %52 = vector.shape_cast %51 : vector<16xf32> to vector<16x1xf32>
    %cst_43 = arith.constant 9.99999993E-9 : f32
    %53 = vector.broadcast %cst_43 : f32 to vector<16x1xf32>
    %54 = arith.addf %52, %53 : vector<16x1xf32>
    %55 = math.sqrt %54 : vector<16x1xf32>
    %56 = vector.broadcast %55 : vector<16x1xf32> to vector<16x8xf32>
    %57 = vector.broadcast %10 : vector<1x8xf32> to vector<16x8xf32>
    %58 = arith.subf %56, %57 : vector<16x8xf32>
    %59 = arith.mulf %58, %58 : vector<16x8xf32>
    %cst_44 = arith.constant 0.000000e+00 : f32
    %60 = vector.broadcast %cst_44 : f32 to vector<16x8xf32>
    %61 = arith.subf %60, %59 : vector<16x8xf32>
    %cst_45 = arith.constant 8.000000e-02 : f32
    %62 = vector.broadcast %cst_45 : f32 to vector<16x8xf32>
    %63 = arith.mulf %61, %62 : vector<16x8xf32>
    %64 = math.exp %63 : vector<16x8xf32>
    %65 = vector.extract_strided_slice %49 {offsets = [0, 0], sizes = [16, 4], strides = [1, 1]} : vector<16x5xf32> to vector<16x4xf32>
    %c0_46 = arith.constant 0 : index
    %c2 = arith.constant 2 : index
    %c0_47 = arith.constant 0 : index
    %c0_48 = arith.constant 0 : index
    %66 = vector.load %arg5[%c0_46, %c2, %c0_47, %c0_48] : memref<1x4x16x16xf32, #tpu.memory_space<vmem>>, vector<1x1x16x16xf32>
    %67 = vector.shape_cast %66 : vector<1x1x16x16xf32> to vector<16x16xf32>
    %cst_49 = arith.constant dense<0.000000e+00> : vector<16x5xf32>
    %68 = tpu.matmul %67, %7, %cst_49 {dimension_numbers = #tpu.dot_dimension_numbers<[1], [0], [0], [1], [0, 0, 1, 1], [], []>} : vector<16x16xf32>, vector<16x5xf32>, vector<16x5xf32> -> vector<16x5xf32>
    %69 = arith.subf %68, %7 : vector<16x5xf32>
    %70 = arith.mulf %69, %69 : vector<16x5xf32>
    %cst_50 = arith.constant dense<0.000000e+00> : vector<16xf32>
    %71 = vector.multi_reduction <add>, %70, %cst_50 [1] : vector<16x5xf32> to vector<16xf32>
    %72 = vector.shape_cast %71 : vector<16xf32> to vector<16x1xf32>
    %cst_51 = arith.constant 9.99999993E-9 : f32
    %73 = vector.broadcast %cst_51 : f32 to vector<16x1xf32>
    %74 = arith.addf %72, %73 : vector<16x1xf32>
    %75 = math.sqrt %74 : vector<16x1xf32>
    %76 = vector.broadcast %75 : vector<16x1xf32> to vector<16x8xf32>
    %77 = vector.broadcast %10 : vector<1x8xf32> to vector<16x8xf32>
    %78 = arith.subf %76, %77 : vector<16x8xf32>
    %79 = arith.mulf %78, %78 : vector<16x8xf32>
    %cst_52 = arith.constant 0.000000e+00 : f32
    %80 = vector.broadcast %cst_52 : f32 to vector<16x8xf32>
    %81 = arith.subf %80, %79 : vector<16x8xf32>
    %cst_53 = arith.constant 8.000000e-02 : f32
    %82 = vector.broadcast %cst_53 : f32 to vector<16x8xf32>
    %83 = arith.mulf %81, %82 : vector<16x8xf32>
    %84 = math.exp %83 : vector<16x8xf32>
    %85 = vector.extract_strided_slice %69 {offsets = [0, 0], sizes = [16, 4], strides = [1, 1]} : vector<16x5xf32> to vector<16x4xf32>
    %c0_54 = arith.constant 0 : index
    %c3 = arith.constant 3 : index
    %c0_55 = arith.constant 0 : index
    %c0_56 = arith.constant 0 : index
    %86 = vector.load %arg5[%c0_54, %c3, %c0_55, %c0_56] : memref<1x4x16x16xf32, #tpu.memory_space<vmem>>, vector<1x1x16x16xf32>
    %87 = vector.shape_cast %86 : vector<1x1x16x16xf32> to vector<16x16xf32>
    %cst_57 = arith.constant dense<0.000000e+00> : vector<16x5xf32>
    %88 = tpu.matmul %87, %7, %cst_57 {dimension_numbers = #tpu.dot_dimension_numbers<[1], [0], [0], [1], [0, 0, 1, 1], [], []>} : vector<16x16xf32>, vector<16x5xf32>, vector<16x5xf32> -> vector<16x5xf32>
    %89 = arith.subf %88, %7 : vector<16x5xf32>
    %90 = arith.mulf %89, %89 : vector<16x5xf32>
    %cst_58 = arith.constant dense<0.000000e+00> : vector<16xf32>
    %91 = vector.multi_reduction <add>, %90, %cst_58 [1] : vector<16x5xf32> to vector<16xf32>
    %92 = vector.shape_cast %91 : vector<16xf32> to vector<16x1xf32>
    %cst_59 = arith.constant 9.99999993E-9 : f32
    %93 = vector.broadcast %cst_59 : f32 to vector<16x1xf32>
    %94 = arith.addf %92, %93 : vector<16x1xf32>
    %95 = math.sqrt %94 : vector<16x1xf32>
    %96 = vector.broadcast %95 : vector<16x1xf32> to vector<16x8xf32>
    %97 = vector.broadcast %10 : vector<1x8xf32> to vector<16x8xf32>
    %98 = arith.subf %96, %97 : vector<16x8xf32>
    %99 = arith.mulf %98, %98 : vector<16x8xf32>
    %cst_60 = arith.constant 0.000000e+00 : f32
    %100 = vector.broadcast %cst_60 : f32 to vector<16x8xf32>
    %101 = arith.subf %100, %99 : vector<16x8xf32>
    %cst_61 = arith.constant 8.000000e-02 : f32
    %102 = vector.broadcast %cst_61 : f32 to vector<16x8xf32>
    %103 = arith.mulf %101, %102 : vector<16x8xf32>
    %104 = math.exp %103 : vector<16x8xf32>
    %105 = vector.extract_strided_slice %89 {offsets = [0, 0], sizes = [16, 4], strides = [1, 1]} : vector<16x5xf32> to vector<16x4xf32>
    %c0_62 = arith.constant 0 : index
    %c0_63 = arith.constant 0 : index
    %106 = vector.load %arg25[%c0_62, %c0_63] : memref<256x128xf32, #tpu.memory_space<vmem>>, vector<256x128xf32>
    %cst_64 = arith.constant dense<0.000000e+00> : vector<1x128xf32>
    %107 = tpu.matmul %9, %106, %cst_64 {dimension_numbers = #tpu.dot_dimension_numbers<[1], [0], [0], [1], [0, 0, 1, 1], [], []>} : vector<1x256xf32>, vector<256x128xf32>, vector<1x128xf32> -> vector<1x128xf32>
    %c0_65 = arith.constant 0 : index
    %c0_66 = arith.constant 0 : index
    %108 = vector.load %arg26[%c0_65, %c0_66] : memref<1x128xf32, #tpu.memory_space<vmem>>, vector<1x128xf32>
    %109 = arith.addf %107, %108 : vector<1x128xf32>
    %c0_67 = arith.constant 0 : index
    %c0_68 = arith.constant 0 : index
    %c0_69 = arith.constant 0 : index
    %110 = vector.load %arg11[%c0_67, %c0_68, %c0_69] : memref<4x32x16xf32, #tpu.memory_space<vmem>>, vector<1x32x16xf32>
    %111 = vector.shape_cast %110 : vector<1x32x16xf32> to vector<32x16xf32>
    %cst_70 = arith.constant dense<0.000000e+00> : vector<16x16xf32>
    %112 = tpu.matmul %25, %111, %cst_70 {dimension_numbers = #tpu.dot_dimension_numbers<[1], [0], [0], [1], [0, 0, 1, 1], [], []>} : vector<16x32xf32>, vector<32x16xf32>, vector<16x16xf32> -> vector<16x16xf32>
    %c0_71 = arith.constant 0 : index
    %c0_72 = arith.constant 0 : index
    %c0_73 = arith.constant 0 : index
    %113 = vector.load %arg12[%c0_71, %c0_72, %c0_73] : memref<4x1x16xf32, #tpu.memory_space<vmem>>, vector<1x1x16xf32>
    %114 = vector.shape_cast %113 : vector<1x1x16xf32> to vector<1x16xf32>
    %115 = vector.broadcast %114 : vector<1x16xf32> to vector<16x16xf32>
    %116 = arith.addf %112, %115 : vector<16x16xf32>
    %c0_74 = arith.constant 0 : index
    %c0_75 = arith.constant 0 : index
    %c0_76 = arith.constant 0 : index
    %c0_77 = arith.constant 0 : index
    %117 = vector.load %arg5[%c0_74, %c0_75, %c0_76, %c0_77] : memref<1x4x16x16xf32, #tpu.memory_space<vmem>>, vector<1x1x16x16xf32>
    %118 = vector.shape_cast %117 : vector<1x1x16x16xf32> to vector<16x16xf32>
    %cst_78 = arith.constant dense<0.000000e+00> : vector<16x32xf32>
    %119 = tpu.matmul %118, %25, %cst_78 {dimension_numbers = #tpu.dot_dimension_numbers<[1], [0], [0], [1], [0, 0, 1, 1], [], []>} : vector<16x16xf32>, vector<16x32xf32>, vector<16x32xf32> -> vector<16x32xf32>
    %c0_79 = arith.constant 0 : index
    %c0_80 = arith.constant 0 : index
    %c0_81 = arith.constant 0 : index
    %120 = vector.load %arg13[%c0_79, %c0_80, %c0_81] : memref<4x32x32xf32, #tpu.memory_space<vmem>>, vector<1x32x32xf32>
    %121 = vector.shape_cast %120 : vector<1x32x32xf32> to vector<32x32xf32>
    %cst_82 = arith.constant dense<0.000000e+00> : vector<16x32xf32>
    %122 = tpu.matmul %119, %121, %cst_82 {dimension_numbers = #tpu.dot_dimension_numbers<[1], [0], [0], [1], [0, 0, 1, 1], [], []>} : vector<16x32xf32>, vector<32x32xf32>, vector<16x32xf32> -> vector<16x32xf32>
    %c0_83 = arith.constant 0 : index
    %c0_84 = arith.constant 0 : index
    %c0_85 = arith.constant 0 : index
    %123 = vector.load %arg14[%c0_83, %c0_84, %c0_85] : memref<4x4x32xf32, #tpu.memory_space<vmem>>, vector<1x4x32xf32>
    %124 = vector.shape_cast %123 : vector<1x4x32xf32> to vector<4x32xf32>
    %cst_86 = arith.constant dense<0.000000e+00> : vector<16x32xf32>
    %125 = tpu.matmul %45, %124, %cst_86 {dimension_numbers = #tpu.dot_dimension_numbers<[1], [0], [0], [1], [0, 0, 1, 1], [], []>} : vector<16x4xf32>, vector<4x32xf32>, vector<16x32xf32> -> vector<16x32xf32>
    %126 = arith.addf %122, %125 : vector<16x32xf32>
    %c0_87 = arith.constant 0 : index
    %c0_88 = arith.constant 0 : index
    %c0_89 = arith.constant 0 : index
    %127 = vector.load %arg15[%c0_87, %c0_88, %c0_89] : memref<4x8x32xf32, #tpu.memory_space<vmem>>, vector<1x8x32xf32>
    %128 = vector.shape_cast %127 : vector<1x8x32xf32> to vector<8x32xf32>
    %cst_90 = arith.constant dense<0.000000e+00> : vector<16x32xf32>
    %129 = tpu.matmul %44, %128, %cst_90 {dimension_numbers = #tpu.dot_dimension_numbers<[1], [0], [0], [1], [0, 0, 1, 1], [], []>} : vector<16x8xf32>, vector<8x32xf32>, vector<16x32xf32> -> vector<16x32xf32>
    %130 = arith.addf %126, %129 : vector<16x32xf32>
    %c0_91 = arith.constant 0 : index
    %c0_92 = arith.constant 0 : index
    %c0_93 = arith.constant 0 : index
    %131 = vector.load %arg16[%c0_91, %c0_92, %c0_93] : memref<4x1x32xf32, #tpu.memory_space<vmem>>, vector<1x1x32xf32>
    %132 = vector.shape_cast %131 : vector<1x1x32xf32> to vector<1x32xf32>
    %133 = vector.broadcast %132 : vector<1x32xf32> to vector<16x32xf32>
    %134 = arith.addf %130, %133 : vector<16x32xf32>
    %135 = vector.extract_strided_slice %134 {offsets = [0, 0], sizes = [16, 16], strides = [1, 1]} : vector<16x32xf32> to vector<16x16xf32>
    %136 = vector.extract_strided_slice %134 {offsets = [0, 16], sizes = [16, 16], strides = [1, 1]} : vector<16x32xf32> to vector<16x16xf32>
    %137 = arith.mulf %116, %135 : vector<16x16xf32>
    %cst_94 = arith.constant dense<0.000000e+00> : vector<16x2xf32>
    %138 = tpu.matmul %137, %11, %cst_94 {dimension_numbers = #tpu.dot_dimension_numbers<[1], [0], [0], [1], [0, 0, 1, 1], [], []>} : vector<16x16xf32>, vector<16x2xf32>, vector<16x2xf32> -> vector<16x2xf32>
    %cst_95 = arith.constant 0.353553385 : f32
    %139 = vector.broadcast %cst_95 : f32 to vector<16x2xf32>
    %140 = arith.mulf %138, %139 : vector<16x2xf32>
    %c0_96 = arith.constant 0 : index
    %c1_97 = arith.constant 1 : index
    %c0_98 = arith.constant 0 : index
    %c0_99 = arith.constant 0 : index
    %141 = vector.load %arg5[%c0_96, %c1_97, %c0_98, %c0_99] : memref<1x4x16x16xf32, #tpu.memory_space<vmem>>, vector<1x1x16x16xf32>
    %142 = vector.shape_cast %141 : vector<1x1x16x16xf32> to vector<16x16xf32>
    %cst_100 = arith.constant dense<0.000000e+00> : vector<16x32xf32>
    %143 = tpu.matmul %142, %25, %cst_100 {dimension_numbers = #tpu.dot_dimension_numbers<[1], [0], [0], [1], [0, 0, 1, 1], [], []>} : vector<16x16xf32>, vector<16x32xf32>, vector<16x32xf32> -> vector<16x32xf32>
    %c0_101 = arith.constant 0 : index
    %c0_102 = arith.constant 0 : index
    %c0_103 = arith.constant 0 : index
    %144 = vector.load %arg13[%c0_101, %c0_102, %c0_103] : memref<4x32x32xf32, #tpu.memory_space<vmem>>, vector<1x32x32xf32>
    %145 = vector.shape_cast %144 : vector<1x32x32xf32> to vector<32x32xf32>
    %cst_104 = arith.constant dense<0.000000e+00> : vector<16x32xf32>
    %146 = tpu.matmul %143, %145, %cst_104 {dimension_numbers = #tpu.dot_dimension_numbers<[1], [0], [0], [1], [0, 0, 1, 1], [], []>} : vector<16x32xf32>, vector<32x32xf32>, vector<16x32xf32> -> vector<16x32xf32>
    %c0_105 = arith.constant 0 : index
    %c0_106 = arith.constant 0 : index
    %c0_107 = arith.constant 0 : index
    %147 = vector.load %arg14[%c0_105, %c0_106, %c0_107] : memref<4x4x32xf32, #tpu.memory_space<vmem>>, vector<1x4x32xf32>
    %148 = vector.shape_cast %147 : vector<1x4x32xf32> to vector<4x32xf32>
    %cst_108 = arith.constant dense<0.000000e+00> : vector<16x32xf32>
    %149 = tpu.matmul %65, %148, %cst_108 {dimension_numbers = #tpu.dot_dimension_numbers<[1], [0], [0], [1], [0, 0, 1, 1], [], []>} : vector<16x4xf32>, vector<4x32xf32>, vector<16x32xf32> -> vector<16x32xf32>
    %150 = arith.addf %146, %149 : vector<16x32xf32>
    %c0_109 = arith.constant 0 : index
    %c0_110 = arith.constant 0 : index
    %c0_111 = arith.constant 0 : index
    %151 = vector.load %arg15[%c0_109, %c0_110, %c0_111] : memref<4x8x32xf32, #tpu.memory_space<vmem>>, vector<1x8x32xf32>
    %152 = vector.shape_cast %151 : vector<1x8x32xf32> to vector<8x32xf32>
    %cst_112 = arith.constant dense<0.000000e+00> : vector<16x32xf32>
    %153 = tpu.matmul %64, %152, %cst_112 {dimension_numbers = #tpu.dot_dimension_numbers<[1], [0], [0], [1], [0, 0, 1, 1], [], []>} : vector<16x8xf32>, vector<8x32xf32>, vector<16x32xf32> -> vector<16x32xf32>
    %154 = arith.addf %150, %153 : vector<16x32xf32>
    %c0_113 = arith.constant 0 : index
    %c0_114 = arith.constant 0 : index
    %c0_115 = arith.constant 0 : index
    %155 = vector.load %arg16[%c0_113, %c0_114, %c0_115] : memref<4x1x32xf32, #tpu.memory_space<vmem>>, vector<1x1x32xf32>
    %156 = vector.shape_cast %155 : vector<1x1x32xf32> to vector<1x32xf32>
    %157 = vector.broadcast %156 : vector<1x32xf32> to vector<16x32xf32>
    %158 = arith.addf %154, %157 : vector<16x32xf32>
    %159 = vector.extract_strided_slice %158 {offsets = [0, 0], sizes = [16, 16], strides = [1, 1]} : vector<16x32xf32> to vector<16x16xf32>
    %160 = vector.extract_strided_slice %158 {offsets = [0, 16], sizes = [16, 16], strides = [1, 1]} : vector<16x32xf32> to vector<16x16xf32>
    %161 = arith.mulf %116, %159 : vector<16x16xf32>
    %cst_116 = arith.constant dense<0.000000e+00> : vector<16x2xf32>
    %162 = tpu.matmul %161, %11, %cst_116 {dimension_numbers = #tpu.dot_dimension_numbers<[1], [0], [0], [1], [0, 0, 1, 1], [], []>} : vector<16x16xf32>, vector<16x2xf32>, vector<16x2xf32> -> vector<16x2xf32>
    %cst_117 = arith.constant 0.353553385 : f32
    %163 = vector.broadcast %cst_117 : f32 to vector<16x2xf32>
    %164 = arith.mulf %162, %163 : vector<16x2xf32>
    %c0_118 = arith.constant 0 : index
    %c2_119 = arith.constant 2 : index
    %c0_120 = arith.constant 0 : index
    %c0_121 = arith.constant 0 : index
    %165 = vector.load %arg5[%c0_118, %c2_119, %c0_120, %c0_121] : memref<1x4x16x16xf32, #tpu.memory_space<vmem>>, vector<1x1x16x16xf32>
    %166 = vector.shape_cast %165 : vector<1x1x16x16xf32> to vector<16x16xf32>
    %cst_122 = arith.constant dense<0.000000e+00> : vector<16x32xf32>
    %167 = tpu.matmul %166, %25, %cst_122 {dimension_numbers = #tpu.dot_dimension_numbers<[1], [0], [0], [1], [0, 0, 1, 1], [], []>} : vector<16x16xf32>, vector<16x32xf32>, vector<16x32xf32> -> vector<16x32xf32>
    %c0_123 = arith.constant 0 : index
    %c0_124 = arith.constant 0 : index
    %c0_125 = arith.constant 0 : index
    %168 = vector.load %arg13[%c0_123, %c0_124, %c0_125] : memref<4x32x32xf32, #tpu.memory_space<vmem>>, vector<1x32x32xf32>
    %169 = vector.shape_cast %168 : vector<1x32x32xf32> to vector<32x32xf32>
    %cst_126 = arith.constant dense<0.000000e+00> : vector<16x32xf32>
    %170 = tpu.matmul %167, %169, %cst_126 {dimension_numbers = #tpu.dot_dimension_numbers<[1], [0], [0], [1], [0, 0, 1, 1], [], []>} : vector<16x32xf32>, vector<32x32xf32>, vector<16x32xf32> -> vector<16x32xf32>
    %c0_127 = arith.constant 0 : index
    %c0_128 = arith.constant 0 : index
    %c0_129 = arith.constant 0 : index
    %171 = vector.load %arg14[%c0_127, %c0_128, %c0_129] : memref<4x4x32xf32, #tpu.memory_space<vmem>>, vector<1x4x32xf32>
    %172 = vector.shape_cast %171 : vector<1x4x32xf32> to vector<4x32xf32>
    %cst_130 = arith.constant dense<0.000000e+00> : vector<16x32xf32>
    %173 = tpu.matmul %85, %172, %cst_130 {dimension_numbers = #tpu.dot_dimension_numbers<[1], [0], [0], [1], [0, 0, 1, 1], [], []>} : vector<16x4xf32>, vector<4x32xf32>, vector<16x32xf32> -> vector<16x32xf32>
    %174 = arith.addf %170, %173 : vector<16x32xf32>
    %c0_131 = arith.constant 0 : index
    %c0_132 = arith.constant 0 : index
    %c0_133 = arith.constant 0 : index
    %175 = vector.load %arg15[%c0_131, %c0_132, %c0_133] : memref<4x8x32xf32, #tpu.memory_space<vmem>>, vector<1x8x32xf32>
    %176 = vector.shape_cast %175 : vector<1x8x32xf32> to vector<8x32xf32>
    %cst_134 = arith.constant dense<0.000000e+00> : vector<16x32xf32>
    %177 = tpu.matmul %84, %176, %cst_134 {dimension_numbers = #tpu.dot_dimension_numbers<[1], [0], [0], [1], [0, 0, 1, 1], [], []>} : vector<16x8xf32>, vector<8x32xf32>, vector<16x32xf32> -> vector<16x32xf32>
    %178 = arith.addf %174, %177 : vector<16x32xf32>
    %c0_135 = arith.constant 0 : index
    %c0_136 = arith.constant 0 : index
    %c0_137 = arith.constant 0 : index
    %179 = vector.load %arg16[%c0_135, %c0_136, %c0_137] : memref<4x1x32xf32, #tpu.memory_space<vmem>>, vector<1x1x32xf32>
    %180 = vector.shape_cast %179 : vector<1x1x32xf32> to vector<1x32xf32>
    %181 = vector.broadcast %180 : vector<1x32xf32> to vector<16x32xf32>
    %182 = arith.addf %178, %181 : vector<16x32xf32>
    %183 = vector.extract_strided_slice %182 {offsets = [0, 0], sizes = [16, 16], strides = [1, 1]} : vector<16x32xf32> to vector<16x16xf32>
    %184 = vector.extract_strided_slice %182 {offsets = [0, 16], sizes = [16, 16], strides = [1, 1]} : vector<16x32xf32> to vector<16x16xf32>
    %185 = arith.mulf %116, %183 : vector<16x16xf32>
    %cst_138 = arith.constant dense<0.000000e+00> : vector<16x2xf32>
    %186 = tpu.matmul %185, %11, %cst_138 {dimension_numbers = #tpu.dot_dimension_numbers<[1], [0], [0], [1], [0, 0, 1, 1], [], []>} : vector<16x16xf32>, vector<16x2xf32>, vector<16x2xf32> -> vector<16x2xf32>
    %cst_139 = arith.constant 0.353553385 : f32
    %187 = vector.broadcast %cst_139 : f32 to vector<16x2xf32>
    %188 = arith.mulf %186, %187 : vector<16x2xf32>
    %c0_140 = arith.constant 0 : index
    %c3_141 = arith.constant 3 : index
    %c0_142 = arith.constant 0 : index
    %c0_143 = arith.constant 0 : index
    %189 = vector.load %arg5[%c0_140, %c3_141, %c0_142, %c0_143] : memref<1x4x16x16xf32, #tpu.memory_space<vmem>>, vector<1x1x16x16xf32>
    %190 = vector.shape_cast %189 : vector<1x1x16x16xf32> to vector<16x16xf32>
    %cst_144 = arith.constant dense<0.000000e+00> : vector<16x32xf32>
    %191 = tpu.matmul %190, %25, %cst_144 {dimension_numbers = #tpu.dot_dimension_numbers<[1], [0], [0], [1], [0, 0, 1, 1], [], []>} : vector<16x16xf32>, vector<16x32xf32>, vector<16x32xf32> -> vector<16x32xf32>
    %c0_145 = arith.constant 0 : index
    %c0_146 = arith.constant 0 : index
    %c0_147 = arith.constant 0 : index
    %192 = vector.load %arg13[%c0_145, %c0_146, %c0_147] : memref<4x32x32xf32, #tpu.memory_space<vmem>>, vector<1x32x32xf32>
    %193 = vector.shape_cast %192 : vector<1x32x32xf32> to vector<32x32xf32>
    %cst_148 = arith.constant dense<0.000000e+00> : vector<16x32xf32>
    %194 = tpu.matmul %191, %193, %cst_148 {dimension_numbers = #tpu.dot_dimension_numbers<[1], [0], [0], [1], [0, 0, 1, 1], [], []>} : vector<16x32xf32>, vector<32x32xf32>, vector<16x32xf32> -> vector<16x32xf32>
    %c0_149 = arith.constant 0 : index
    %c0_150 = arith.constant 0 : index
    %c0_151 = arith.constant 0 : index
    %195 = vector.load %arg14[%c0_149, %c0_150, %c0_151] : memref<4x4x32xf32, #tpu.memory_space<vmem>>, vector<1x4x32xf32>
    %196 = vector.shape_cast %195 : vector<1x4x32xf32> to vector<4x32xf32>
    %cst_152 = arith.constant dense<0.000000e+00> : vector<16x32xf32>
    %197 = tpu.matmul %105, %196, %cst_152 {dimension_numbers = #tpu.dot_dimension_numbers<[1], [0], [0], [1], [0, 0, 1, 1], [], []>} : vector<16x4xf32>, vector<4x32xf32>, vector<16x32xf32> -> vector<16x32xf32>
    %198 = arith.addf %194, %197 : vector<16x32xf32>
    %c0_153 = arith.constant 0 : index
    %c0_154 = arith.constant 0 : index
    %c0_155 = arith.constant 0 : index
    %199 = vector.load %arg15[%c0_153, %c0_154, %c0_155] : memref<4x8x32xf32, #tpu.memory_space<vmem>>, vector<1x8x32xf32>
    %200 = vector.shape_cast %199 : vector<1x8x32xf32> to vector<8x32xf32>
    %cst_156 = arith.constant dense<0.000000e+00> : vector<16x32xf32>
    %201 = tpu.matmul %104, %200, %cst_156 {dimension_numbers = #tpu.dot_dimension_numbers<[1], [0], [0], [1], [0, 0, 1, 1], [], []>} : vector<16x8xf32>, vector<8x32xf32>, vector<16x32xf32> -> vector<16x32xf32>
    %202 = arith.addf %198, %201 : vector<16x32xf32>
    %c0_157 = arith.constant 0 : index
    %c0_158 = arith.constant 0 : index
    %c0_159 = arith.constant 0 : index
    %203 = vector.load %arg16[%c0_157, %c0_158, %c0_159] : memref<4x1x32xf32, #tpu.memory_space<vmem>>, vector<1x1x32xf32>
    %204 = vector.shape_cast %203 : vector<1x1x32xf32> to vector<1x32xf32>
    %205 = vector.broadcast %204 : vector<1x32xf32> to vector<16x32xf32>
    %206 = arith.addf %202, %205 : vector<16x32xf32>
    %207 = vector.extract_strided_slice %206 {offsets = [0, 0], sizes = [16, 16], strides = [1, 1]} : vector<16x32xf32> to vector<16x16xf32>
    %208 = vector.extract_strided_slice %206 {offsets = [0, 16], sizes = [16, 16], strides = [1, 1]} : vector<16x32xf32> to vector<16x16xf32>
    %209 = arith.mulf %116, %207 : vector<16x16xf32>
    %cst_160 = arith.constant dense<0.000000e+00> : vector<16x2xf32>
    %210 = tpu.matmul %209, %11, %cst_160 {dimension_numbers = #tpu.dot_dimension_numbers<[1], [0], [0], [1], [0, 0, 1, 1], [], []>} : vector<16x16xf32>, vector<16x2xf32>, vector<16x2xf32> -> vector<16x2xf32>
    %cst_161 = arith.constant 0.353553385 : f32
    %211 = vector.broadcast %cst_161 : f32 to vector<16x2xf32>
    %212 = arith.mulf %210, %211 : vector<16x2xf32>
    %213 = arith.maximumf %140, %164 : vector<16x2xf32>
    %214 = arith.maximumf %213, %188 : vector<16x2xf32>
    %215 = arith.maximumf %214, %212 : vector<16x2xf32>
    %216 = arith.subf %140, %215 : vector<16x2xf32>
    %217 = math.exp %216 : vector<16x2xf32>
    %218 = arith.subf %164, %215 : vector<16x2xf32>
    %219 = math.exp %218 : vector<16x2xf32>
    %220 = arith.subf %188, %215 : vector<16x2xf32>
    %221 = math.exp %220 : vector<16x2xf32>
    %222 = arith.subf %212, %215 : vector<16x2xf32>
    %223 = math.exp %222 : vector<16x2xf32>
    %224 = arith.addf %217, %219 : vector<16x2xf32>
    %225 = arith.addf %224, %221 : vector<16x2xf32>
    %226 = arith.addf %225, %223 : vector<16x2xf32>
    %227 = tpu.reciprocal %226 {approx = true} : vector<16x2xf32> -> vector<16x2xf32>
    %cst_162 = arith.constant 0.000000e+00 : f32
    %228 = vector.broadcast %cst_162 : f32 to vector<16x16xf32>
    %229 = arith.mulf %217, %227 : vector<16x2xf32>
    %cst_163 = arith.constant dense<0.000000e+00> : vector<16x16xf32>
    %230 = tpu.matmul %229, %12, %cst_163 {dimension_numbers = #tpu.dot_dimension_numbers<[1], [0], [0], [1], [0, 0, 1, 1], [], []>} : vector<16x2xf32>, vector<2x16xf32>, vector<16x16xf32> -> vector<16x16xf32>
    %231 = arith.mulf %230, %136 : vector<16x16xf32>
    %232 = arith.addf %228, %231 : vector<16x16xf32>
    %233 = arith.mulf %219, %227 : vector<16x2xf32>
    %cst_164 = arith.constant dense<0.000000e+00> : vector<16x16xf32>
    %234 = tpu.matmul %233, %12, %cst_164 {dimension_numbers = #tpu.dot_dimension_numbers<[1], [0], [0], [1], [0, 0, 1, 1], [], []>} : vector<16x2xf32>, vector<2x16xf32>, vector<16x16xf32> -> vector<16x16xf32>
    %235 = arith.mulf %234, %160 : vector<16x16xf32>
    %236 = arith.addf %232, %235 : vector<16x16xf32>
    %237 = arith.mulf %221, %227 : vector<16x2xf32>
    %cst_165 = arith.constant dense<0.000000e+00> : vector<16x16xf32>
    %238 = tpu.matmul %237, %12, %cst_165 {dimension_numbers = #tpu.dot_dimension_numbers<[1], [0], [0], [1], [0, 0, 1, 1], [], []>} : vector<16x2xf32>, vector<2x16xf32>, vector<16x16xf32> -> vector<16x16xf32>
    %239 = arith.mulf %238, %184 : vector<16x16xf32>
    %240 = arith.addf %236, %239 : vector<16x16xf32>
    %241 = arith.mulf %223, %227 : vector<16x2xf32>
    %cst_166 = arith.constant dense<0.000000e+00> : vector<16x16xf32>
    %242 = tpu.matmul %241, %12, %cst_166 {dimension_numbers = #tpu.dot_dimension_numbers<[1], [0], [0], [1], [0, 0, 1, 1], [], []>} : vector<16x2xf32>, vector<2x16xf32>, vector<16x16xf32> -> vector<16x16xf32>
    %243 = arith.mulf %242, %208 : vector<16x16xf32>
    %244 = arith.addf %240, %243 : vector<16x16xf32>
    %c0_167 = arith.constant 0 : index
    %c0_168 = arith.constant 0 : index
    %c0_169 = arith.constant 0 : index
    %245 = vector.load %arg17[%c0_167, %c0_168, %c0_169] : memref<4x16x32xf32, #tpu.memory_space<vmem>>, vector<1x16x32xf32>
    %246 = vector.shape_cast %245 : vector<1x16x32xf32> to vector<16x32xf32>
    %cst_170 = arith.constant dense<0.000000e+00> : vector<16x32xf32>
    %247 = tpu.matmul %244, %246, %cst_170 {dimension_numbers = #tpu.dot_dimension_numbers<[1], [0], [0], [1], [0, 0, 1, 1], [], []>} : vector<16x16xf32>, vector<16x32xf32>, vector<16x32xf32> -> vector<16x32xf32>
    %248 = arith.addf %25, %247 : vector<16x32xf32>
    %c0_171 = arith.constant 0 : index
    %c0_172 = arith.constant 0 : index
    %c0_173 = arith.constant 0 : index
    %249 = vector.load %arg18[%c0_171, %c0_172, %c0_173] : memref<4x1x32xf32, #tpu.memory_space<vmem>>, vector<1x1x32xf32>
    %250 = vector.shape_cast %249 : vector<1x1x32xf32> to vector<1x32xf32>
    %251 = vector.broadcast %250 : vector<1x32xf32> to vector<16x32xf32>
    %252 = arith.addf %248, %251 : vector<16x32xf32>
    %c0_174 = arith.constant 0 : index
    %c0_175 = arith.constant 0 : index
    %c0_176 = arith.constant 0 : index
    %253 = vector.load %arg19[%c0_174, %c0_175, %c0_176] : memref<4x32x32xf32, #tpu.memory_space<vmem>>, vector<1x32x32xf32>
    %254 = vector.shape_cast %253 : vector<1x32x32xf32> to vector<32x32xf32>
    %cst_177 = arith.constant dense<0.000000e+00> : vector<16x32xf32>
    %255 = tpu.matmul %252, %254, %cst_177 {dimension_numbers = #tpu.dot_dimension_numbers<[1], [0], [0], [1], [0, 0, 1, 1], [], []>} : vector<16x32xf32>, vector<32x32xf32>, vector<16x32xf32> -> vector<16x32xf32>
    %c0_178 = arith.constant 0 : index
    %c0_179 = arith.constant 0 : index
    %c0_180 = arith.constant 0 : index
    %256 = vector.load %arg20[%c0_178, %c0_179, %c0_180] : memref<4x1x32xf32, #tpu.memory_space<vmem>>, vector<1x1x32xf32>
    %257 = vector.shape_cast %256 : vector<1x1x32xf32> to vector<1x32xf32>
    %258 = vector.broadcast %257 : vector<1x32xf32> to vector<16x32xf32>
    %259 = arith.addf %255, %258 : vector<16x32xf32>
    %cst_181 = arith.constant 0.000000e+00 : f32
    %260 = vector.broadcast %cst_181 : f32 to vector<16x32xf32>
    %261 = arith.maximumf %259, %260 : vector<16x32xf32>
    %c0_182 = arith.constant 0 : index
    %c0_183 = arith.constant 0 : index
    %c0_184 = arith.constant 0 : index
    %262 = vector.load %arg21[%c0_182, %c0_183, %c0_184] : memref<4x32x32xf32, #tpu.memory_space<vmem>>, vector<1x32x32xf32>
    %263 = vector.shape_cast %262 : vector<1x32x32xf32> to vector<32x32xf32>
    %cst_185 = arith.constant dense<0.000000e+00> : vector<16x32xf32>
    %264 = tpu.matmul %261, %263, %cst_185 {dimension_numbers = #tpu.dot_dimension_numbers<[1], [0], [0], [1], [0, 0, 1, 1], [], []>} : vector<16x32xf32>, vector<32x32xf32>, vector<16x32xf32> -> vector<16x32xf32>
    %c0_186 = arith.constant 0 : index
    %c0_187 = arith.constant 0 : index
    %c0_188 = arith.constant 0 : index
    %265 = vector.load %arg22[%c0_186, %c0_187, %c0_188] : memref<4x1x32xf32, #tpu.memory_space<vmem>>, vector<1x1x32xf32>
    %266 = vector.shape_cast %265 : vector<1x1x32xf32> to vector<1x32xf32>
    %267 = vector.broadcast %266 : vector<1x32xf32> to vector<16x32xf32>
    %268 = arith.addf %264, %267 : vector<16x32xf32>
    %cst_189 = arith.constant 0.000000e+00 : f32
    %269 = vector.broadcast %cst_189 : f32 to vector<16x32xf32>
    %270 = arith.maximumf %268, %269 : vector<16x32xf32>
    %c0_190 = arith.constant 0 : index
    %c0_191 = arith.constant 0 : index
    %c0_192 = arith.constant 0 : index
    %271 = vector.load %arg23[%c0_190, %c0_191, %c0_192] : memref<4x32x32xf32, #tpu.memory_space<vmem>>, vector<1x32x32xf32>
    %272 = vector.shape_cast %271 : vector<1x32x32xf32> to vector<32x32xf32>
    %cst_193 = arith.constant dense<0.000000e+00> : vector<16x32xf32>
    %273 = tpu.matmul %270, %272, %cst_193 {dimension_numbers = #tpu.dot_dimension_numbers<[1], [0], [0], [1], [0, 0, 1, 1], [], []>} : vector<16x32xf32>, vector<32x32xf32>, vector<16x32xf32> -> vector<16x32xf32>
    %c0_194 = arith.constant 0 : index
    %c0_195 = arith.constant 0 : index
    %c0_196 = arith.constant 0 : index
    %274 = vector.load %arg24[%c0_194, %c0_195, %c0_196] : memref<4x1x32xf32, #tpu.memory_space<vmem>>, vector<1x1x32xf32>
    %275 = vector.shape_cast %274 : vector<1x1x32xf32> to vector<1x32xf32>
    %276 = vector.broadcast %275 : vector<1x32xf32> to vector<16x32xf32>
    %277 = arith.addf %273, %276 : vector<16x32xf32>
    %278 = arith.addf %252, %277 : vector<16x32xf32>
    %c1_197 = arith.constant 1 : index
    %c0_198 = arith.constant 0 : index
    %c0_199 = arith.constant 0 : index
    %279 = vector.load %arg11[%c1_197, %c0_198, %c0_199] : memref<4x32x16xf32, #tpu.memory_space<vmem>>, vector<1x32x16xf32>
    %280 = vector.shape_cast %279 : vector<1x32x16xf32> to vector<32x16xf32>
    %cst_200 = arith.constant dense<0.000000e+00> : vector<16x16xf32>
    %281 = tpu.matmul %278, %280, %cst_200 {dimension_numbers = #tpu.dot_dimension_numbers<[1], [0], [0], [1], [0, 0, 1, 1], [], []>} : vector<16x32xf32>, vector<32x16xf32>, vector<16x16xf32> -> vector<16x16xf32>
    %c1_201 = arith.constant 1 : index
    %c0_202 = arith.constant 0 : index
    %c0_203 = arith.constant 0 : index
    %282 = vector.load %arg12[%c1_201, %c0_202, %c0_203] : memref<4x1x16xf32, #tpu.memory_space<vmem>>, vector<1x1x16xf32>
    %283 = vector.shape_cast %282 : vector<1x1x16xf32> to vector<1x16xf32>
    %284 = vector.broadcast %283 : vector<1x16xf32> to vector<16x16xf32>
    %285 = arith.addf %281, %284 : vector<16x16xf32>
    %c0_204 = arith.constant 0 : index
    %c0_205 = arith.constant 0 : index
    %c0_206 = arith.constant 0 : index
    %c0_207 = arith.constant 0 : index
    %286 = vector.load %arg5[%c0_204, %c0_205, %c0_206, %c0_207] : memref<1x4x16x16xf32, #tpu.memory_space<vmem>>, vector<1x1x16x16xf32>
    %287 = vector.shape_cast %286 : vector<1x1x16x16xf32> to vector<16x16xf32>
    %cst_208 = arith.constant dense<0.000000e+00> : vector<16x32xf32>
    %288 = tpu.matmul %287, %278, %cst_208 {dimension_numbers = #tpu.dot_dimension_numbers<[1], [0], [0], [1], [0, 0, 1, 1], [], []>} : vector<16x16xf32>, vector<16x32xf32>, vector<16x32xf32> -> vector<16x32xf32>
    %c1_209 = arith.constant 1 : index
    %c0_210 = arith.constant 0 : index
    %c0_211 = arith.constant 0 : index
    %289 = vector.load %arg13[%c1_209, %c0_210, %c0_211] : memref<4x32x32xf32, #tpu.memory_space<vmem>>, vector<1x32x32xf32>
    %290 = vector.shape_cast %289 : vector<1x32x32xf32> to vector<32x32xf32>
    %cst_212 = arith.constant dense<0.000000e+00> : vector<16x32xf32>
    %291 = tpu.matmul %288, %290, %cst_212 {dimension_numbers = #tpu.dot_dimension_numbers<[1], [0], [0], [1], [0, 0, 1, 1], [], []>} : vector<16x32xf32>, vector<32x32xf32>, vector<16x32xf32> -> vector<16x32xf32>
    %c1_213 = arith.constant 1 : index
    %c0_214 = arith.constant 0 : index
    %c0_215 = arith.constant 0 : index
    %292 = vector.load %arg14[%c1_213, %c0_214, %c0_215] : memref<4x4x32xf32, #tpu.memory_space<vmem>>, vector<1x4x32xf32>
    %293 = vector.shape_cast %292 : vector<1x4x32xf32> to vector<4x32xf32>
    %cst_216 = arith.constant dense<0.000000e+00> : vector<16x32xf32>
    %294 = tpu.matmul %45, %293, %cst_216 {dimension_numbers = #tpu.dot_dimension_numbers<[1], [0], [0], [1], [0, 0, 1, 1], [], []>} : vector<16x4xf32>, vector<4x32xf32>, vector<16x32xf32> -> vector<16x32xf32>
    %295 = arith.addf %291, %294 : vector<16x32xf32>
    %c1_217 = arith.constant 1 : index
    %c0_218 = arith.constant 0 : index
    %c0_219 = arith.constant 0 : index
    %296 = vector.load %arg15[%c1_217, %c0_218, %c0_219] : memref<4x8x32xf32, #tpu.memory_space<vmem>>, vector<1x8x32xf32>
    %297 = vector.shape_cast %296 : vector<1x8x32xf32> to vector<8x32xf32>
    %cst_220 = arith.constant dense<0.000000e+00> : vector<16x32xf32>
    %298 = tpu.matmul %44, %297, %cst_220 {dimension_numbers = #tpu.dot_dimension_numbers<[1], [0], [0], [1], [0, 0, 1, 1], [], []>} : vector<16x8xf32>, vector<8x32xf32>, vector<16x32xf32> -> vector<16x32xf32>
    %299 = arith.addf %295, %298 : vector<16x32xf32>
    %c1_221 = arith.constant 1 : index
    %c0_222 = arith.constant 0 : index
    %c0_223 = arith.constant 0 : index
    %300 = vector.load %arg16[%c1_221, %c0_222, %c0_223] : memref<4x1x32xf32, #tpu.memory_space<vmem>>, vector<1x1x32xf32>
    %301 = vector.shape_cast %300 : vector<1x1x32xf32> to vector<1x32xf32>
    %302 = vector.broadcast %301 : vector<1x32xf32> to vector<16x32xf32>
    %303 = arith.addf %299, %302 : vector<16x32xf32>
    %304 = vector.extract_strided_slice %303 {offsets = [0, 0], sizes = [16, 16], strides = [1, 1]} : vector<16x32xf32> to vector<16x16xf32>
    %305 = vector.extract_strided_slice %303 {offsets = [0, 16], sizes = [16, 16], strides = [1, 1]} : vector<16x32xf32> to vector<16x16xf32>
    %306 = arith.mulf %285, %304 : vector<16x16xf32>
    %cst_224 = arith.constant dense<0.000000e+00> : vector<16x2xf32>
    %307 = tpu.matmul %306, %11, %cst_224 {dimension_numbers = #tpu.dot_dimension_numbers<[1], [0], [0], [1], [0, 0, 1, 1], [], []>} : vector<16x16xf32>, vector<16x2xf32>, vector<16x2xf32> -> vector<16x2xf32>
    %cst_225 = arith.constant 0.353553385 : f32
    %308 = vector.broadcast %cst_225 : f32 to vector<16x2xf32>
    %309 = arith.mulf %307, %308 : vector<16x2xf32>
    %c0_226 = arith.constant 0 : index
    %c1_227 = arith.constant 1 : index
    %c0_228 = arith.constant 0 : index
    %c0_229 = arith.constant 0 : index
    %310 = vector.load %arg5[%c0_226, %c1_227, %c0_228, %c0_229] : memref<1x4x16x16xf32, #tpu.memory_space<vmem>>, vector<1x1x16x16xf32>
    %311 = vector.shape_cast %310 : vector<1x1x16x16xf32> to vector<16x16xf32>
    %cst_230 = arith.constant dense<0.000000e+00> : vector<16x32xf32>
    %312 = tpu.matmul %311, %278, %cst_230 {dimension_numbers = #tpu.dot_dimension_numbers<[1], [0], [0], [1], [0, 0, 1, 1], [], []>} : vector<16x16xf32>, vector<16x32xf32>, vector<16x32xf32> -> vector<16x32xf32>
    %c1_231 = arith.constant 1 : index
    %c0_232 = arith.constant 0 : index
    %c0_233 = arith.constant 0 : index
    %313 = vector.load %arg13[%c1_231, %c0_232, %c0_233] : memref<4x32x32xf32, #tpu.memory_space<vmem>>, vector<1x32x32xf32>
    %314 = vector.shape_cast %313 : vector<1x32x32xf32> to vector<32x32xf32>
    %cst_234 = arith.constant dense<0.000000e+00> : vector<16x32xf32>
    %315 = tpu.matmul %312, %314, %cst_234 {dimension_numbers = #tpu.dot_dimension_numbers<[1], [0], [0], [1], [0, 0, 1, 1], [], []>} : vector<16x32xf32>, vector<32x32xf32>, vector<16x32xf32> -> vector<16x32xf32>
    %c1_235 = arith.constant 1 : index
    %c0_236 = arith.constant 0 : index
    %c0_237 = arith.constant 0 : index
    %316 = vector.load %arg14[%c1_235, %c0_236, %c0_237] : memref<4x4x32xf32, #tpu.memory_space<vmem>>, vector<1x4x32xf32>
    %317 = vector.shape_cast %316 : vector<1x4x32xf32> to vector<4x32xf32>
    %cst_238 = arith.constant dense<0.000000e+00> : vector<16x32xf32>
    %318 = tpu.matmul %65, %317, %cst_238 {dimension_numbers = #tpu.dot_dimension_numbers<[1], [0], [0], [1], [0, 0, 1, 1], [], []>} : vector<16x4xf32>, vector<4x32xf32>, vector<16x32xf32> -> vector<16x32xf32>
    %319 = arith.addf %315, %318 : vector<16x32xf32>
    %c1_239 = arith.constant 1 : index
    %c0_240 = arith.constant 0 : index
    %c0_241 = arith.constant 0 : index
    %320 = vector.load %arg15[%c1_239, %c0_240, %c0_241] : memref<4x8x32xf32, #tpu.memory_space<vmem>>, vector<1x8x32xf32>
    %321 = vector.shape_cast %320 : vector<1x8x32xf32> to vector<8x32xf32>
    %cst_242 = arith.constant dense<0.000000e+00> : vector<16x32xf32>
    %322 = tpu.matmul %64, %321, %cst_242 {dimension_numbers = #tpu.dot_dimension_numbers<[1], [0], [0], [1], [0, 0, 1, 1], [], []>} : vector<16x8xf32>, vector<8x32xf32>, vector<16x32xf32> -> vector<16x32xf32>
    %323 = arith.addf %319, %322 : vector<16x32xf32>
    %c1_243 = arith.constant 1 : index
    %c0_244 = arith.constant 0 : index
    %c0_245 = arith.constant 0 : index
    %324 = vector.load %arg16[%c1_243, %c0_244, %c0_245] : memref<4x1x32xf32, #tpu.memory_space<vmem>>, vector<1x1x32xf32>
    %325 = vector.shape_cast %324 : vector<1x1x32xf32> to vector<1x32xf32>
    %326 = vector.broadcast %325 : vector<1x32xf32> to vector<16x32xf32>
    %327 = arith.addf %323, %326 : vector<16x32xf32>
    %328 = vector.extract_strided_slice %327 {offsets = [0, 0], sizes = [16, 16], strides = [1, 1]} : vector<16x32xf32> to vector<16x16xf32>
    %329 = vector.extract_strided_slice %327 {offsets = [0, 16], sizes = [16, 16], strides = [1, 1]} : vector<16x32xf32> to vector<16x16xf32>
    %330 = arith.mulf %285, %328 : vector<16x16xf32>
    %cst_246 = arith.constant dense<0.000000e+00> : vector<16x2xf32>
    %331 = tpu.matmul %330, %11, %cst_246 {dimension_numbers = #tpu.dot_dimension_numbers<[1], [0], [0], [1], [0, 0, 1, 1], [], []>} : vector<16x16xf32>, vector<16x2xf32>, vector<16x2xf32> -> vector<16x2xf32>
    %cst_247 = arith.constant 0.353553385 : f32
    %332 = vector.broadcast %cst_247 : f32 to vector<16x2xf32>
    %333 = arith.mulf %331, %332 : vector<16x2xf32>
    %c0_248 = arith.constant 0 : index
    %c2_249 = arith.constant 2 : index
    %c0_250 = arith.constant 0 : index
    %c0_251 = arith.constant 0 : index
    %334 = vector.load %arg5[%c0_248, %c2_249, %c0_250, %c0_251] : memref<1x4x16x16xf32, #tpu.memory_space<vmem>>, vector<1x1x16x16xf32>
    %335 = vector.shape_cast %334 : vector<1x1x16x16xf32> to vector<16x16xf32>
    %cst_252 = arith.constant dense<0.000000e+00> : vector<16x32xf32>
    %336 = tpu.matmul %335, %278, %cst_252 {dimension_numbers = #tpu.dot_dimension_numbers<[1], [0], [0], [1], [0, 0, 1, 1], [], []>} : vector<16x16xf32>, vector<16x32xf32>, vector<16x32xf32> -> vector<16x32xf32>
    %c1_253 = arith.constant 1 : index
    %c0_254 = arith.constant 0 : index
    %c0_255 = arith.constant 0 : index
    %337 = vector.load %arg13[%c1_253, %c0_254, %c0_255] : memref<4x32x32xf32, #tpu.memory_space<vmem>>, vector<1x32x32xf32>
    %338 = vector.shape_cast %337 : vector<1x32x32xf32> to vector<32x32xf32>
    %cst_256 = arith.constant dense<0.000000e+00> : vector<16x32xf32>
    %339 = tpu.matmul %336, %338, %cst_256 {dimension_numbers = #tpu.dot_dimension_numbers<[1], [0], [0], [1], [0, 0, 1, 1], [], []>} : vector<16x32xf32>, vector<32x32xf32>, vector<16x32xf32> -> vector<16x32xf32>
    %c1_257 = arith.constant 1 : index
    %c0_258 = arith.constant 0 : index
    %c0_259 = arith.constant 0 : index
    %340 = vector.load %arg14[%c1_257, %c0_258, %c0_259] : memref<4x4x32xf32, #tpu.memory_space<vmem>>, vector<1x4x32xf32>
    %341 = vector.shape_cast %340 : vector<1x4x32xf32> to vector<4x32xf32>
    %cst_260 = arith.constant dense<0.000000e+00> : vector<16x32xf32>
    %342 = tpu.matmul %85, %341, %cst_260 {dimension_numbers = #tpu.dot_dimension_numbers<[1], [0], [0], [1], [0, 0, 1, 1], [], []>} : vector<16x4xf32>, vector<4x32xf32>, vector<16x32xf32> -> vector<16x32xf32>
    %343 = arith.addf %339, %342 : vector<16x32xf32>
    %c1_261 = arith.constant 1 : index
    %c0_262 = arith.constant 0 : index
    %c0_263 = arith.constant 0 : index
    %344 = vector.load %arg15[%c1_261, %c0_262, %c0_263] : memref<4x8x32xf32, #tpu.memory_space<vmem>>, vector<1x8x32xf32>
    %345 = vector.shape_cast %344 : vector<1x8x32xf32> to vector<8x32xf32>
    %cst_264 = arith.constant dense<0.000000e+00> : vector<16x32xf32>
    %346 = tpu.matmul %84, %345, %cst_264 {dimension_numbers = #tpu.dot_dimension_numbers<[1], [0], [0], [1], [0, 0, 1, 1], [], []>} : vector<16x8xf32>, vector<8x32xf32>, vector<16x32xf32> -> vector<16x32xf32>
    %347 = arith.addf %343, %346 : vector<16x32xf32>
    %c1_265 = arith.constant 1 : index
    %c0_266 = arith.constant 0 : index
    %c0_267 = arith.constant 0 : index
    %348 = vector.load %arg16[%c1_265, %c0_266, %c0_267] : memref<4x1x32xf32, #tpu.memory_space<vmem>>, vector<1x1x32xf32>
    %349 = vector.shape_cast %348 : vector<1x1x32xf32> to vector<1x32xf32>
    %350 = vector.broadcast %349 : vector<1x32xf32> to vector<16x32xf32>
    %351 = arith.addf %347, %350 : vector<16x32xf32>
    %352 = vector.extract_strided_slice %351 {offsets = [0, 0], sizes = [16, 16], strides = [1, 1]} : vector<16x32xf32> to vector<16x16xf32>
    %353 = vector.extract_strided_slice %351 {offsets = [0, 16], sizes = [16, 16], strides = [1, 1]} : vector<16x32xf32> to vector<16x16xf32>
    %354 = arith.mulf %285, %352 : vector<16x16xf32>
    %cst_268 = arith.constant dense<0.000000e+00> : vector<16x2xf32>
    %355 = tpu.matmul %354, %11, %cst_268 {dimension_numbers = #tpu.dot_dimension_numbers<[1], [0], [0], [1], [0, 0, 1, 1], [], []>} : vector<16x16xf32>, vector<16x2xf32>, vector<16x2xf32> -> vector<16x2xf32>
    %cst_269 = arith.constant 0.353553385 : f32
    %356 = vector.broadcast %cst_269 : f32 to vector<16x2xf32>
    %357 = arith.mulf %355, %356 : vector<16x2xf32>
    %c0_270 = arith.constant 0 : index
    %c3_271 = arith.constant 3 : index
    %c0_272 = arith.constant 0 : index
    %c0_273 = arith.constant 0 : index
    %358 = vector.load %arg5[%c0_270, %c3_271, %c0_272, %c0_273] : memref<1x4x16x16xf32, #tpu.memory_space<vmem>>, vector<1x1x16x16xf32>
    %359 = vector.shape_cast %358 : vector<1x1x16x16xf32> to vector<16x16xf32>
    %cst_274 = arith.constant dense<0.000000e+00> : vector<16x32xf32>
    %360 = tpu.matmul %359, %278, %cst_274 {dimension_numbers = #tpu.dot_dimension_numbers<[1], [0], [0], [1], [0, 0, 1, 1], [], []>} : vector<16x16xf32>, vector<16x32xf32>, vector<16x32xf32> -> vector<16x32xf32>
    %c1_275 = arith.constant 1 : index
    %c0_276 = arith.constant 0 : index
    %c0_277 = arith.constant 0 : index
    %361 = vector.load %arg13[%c1_275, %c0_276, %c0_277] : memref<4x32x32xf32, #tpu.memory_space<vmem>>, vector<1x32x32xf32>
    %362 = vector.shape_cast %361 : vector<1x32x32xf32> to vector<32x32xf32>
    %cst_278 = arith.constant dense<0.000000e+00> : vector<16x32xf32>
    %363 = tpu.matmul %360, %362, %cst_278 {dimension_numbers = #tpu.dot_dimension_numbers<[1], [0], [0], [1], [0, 0, 1, 1], [], []>} : vector<16x32xf32>, vector<32x32xf32>, vector<16x32xf32> -> vector<16x32xf32>
    %c1_279 = arith.constant 1 : index
    %c0_280 = arith.constant 0 : index
    %c0_281 = arith.constant 0 : index
    %364 = vector.load %arg14[%c1_279, %c0_280, %c0_281] : memref<4x4x32xf32, #tpu.memory_space<vmem>>, vector<1x4x32xf32>
    %365 = vector.shape_cast %364 : vector<1x4x32xf32> to vector<4x32xf32>
    %cst_282 = arith.constant dense<0.000000e+00> : vector<16x32xf32>
    %366 = tpu.matmul %105, %365, %cst_282 {dimension_numbers = #tpu.dot_dimension_numbers<[1], [0], [0], [1], [0, 0, 1, 1], [], []>} : vector<16x4xf32>, vector<4x32xf32>, vector<16x32xf32> -> vector<16x32xf32>
    %367 = arith.addf %363, %366 : vector<16x32xf32>
    %c1_283 = arith.constant 1 : index
    %c0_284 = arith.constant 0 : index
    %c0_285 = arith.constant 0 : index
    %368 = vector.load %arg15[%c1_283, %c0_284, %c0_285] : memref<4x8x32xf32, #tpu.memory_space<vmem>>, vector<1x8x32xf32>
    %369 = vector.shape_cast %368 : vector<1x8x32xf32> to vector<8x32xf32>
    %cst_286 = arith.constant dense<0.000000e+00> : vector<16x32xf32>
    %370 = tpu.matmul %104, %369, %cst_286 {dimension_numbers = #tpu.dot_dimension_numbers<[1], [0], [0], [1], [0, 0, 1, 1], [], []>} : vector<16x8xf32>, vector<8x32xf32>, vector<16x32xf32> -> vector<16x32xf32>
    %371 = arith.addf %367, %370 : vector<16x32xf32>
    %c1_287 = arith.constant 1 : index
    %c0_288 = arith.constant 0 : index
    %c0_289 = arith.constant 0 : index
    %372 = vector.load %arg16[%c1_287, %c0_288, %c0_289] : memref<4x1x32xf32, #tpu.memory_space<vmem>>, vector<1x1x32xf32>
    %373 = vector.shape_cast %372 : vector<1x1x32xf32> to vector<1x32xf32>
    %374 = vector.broadcast %373 : vector<1x32xf32> to vector<16x32xf32>
    %375 = arith.addf %371, %374 : vector<16x32xf32>
    %376 = vector.extract_strided_slice %375 {offsets = [0, 0], sizes = [16, 16], strides = [1, 1]} : vector<16x32xf32> to vector<16x16xf32>
    %377 = vector.extract_strided_slice %375 {offsets = [0, 16], sizes = [16, 16], strides = [1, 1]} : vector<16x32xf32> to vector<16x16xf32>
    %378 = arith.mulf %285, %376 : vector<16x16xf32>
    %cst_290 = arith.constant dense<0.000000e+00> : vector<16x2xf32>
    %379 = tpu.matmul %378, %11, %cst_290 {dimension_numbers = #tpu.dot_dimension_numbers<[1], [0], [0], [1], [0, 0, 1, 1], [], []>} : vector<16x16xf32>, vector<16x2xf32>, vector<16x2xf32> -> vector<16x2xf32>
    %cst_291 = arith.constant 0.353553385 : f32
    %380 = vector.broadcast %cst_291 : f32 to vector<16x2xf32>
    %381 = arith.mulf %379, %380 : vector<16x2xf32>
    %382 = arith.maximumf %309, %333 : vector<16x2xf32>
    %383 = arith.maximumf %382, %357 : vector<16x2xf32>
    %384 = arith.maximumf %383, %381 : vector<16x2xf32>
    %385 = arith.subf %309, %384 : vector<16x2xf32>
    %386 = math.exp %385 : vector<16x2xf32>
    %387 = arith.subf %333, %384 : vector<16x2xf32>
    %388 = math.exp %387 : vector<16x2xf32>
    %389 = arith.subf %357, %384 : vector<16x2xf32>
    %390 = math.exp %389 : vector<16x2xf32>
    %391 = arith.subf %381, %384 : vector<16x2xf32>
    %392 = math.exp %391 : vector<16x2xf32>
    %393 = arith.addf %386, %388 : vector<16x2xf32>
    %394 = arith.addf %393, %390 : vector<16x2xf32>
    %395 = arith.addf %394, %392 : vector<16x2xf32>
    %396 = tpu.reciprocal %395 {approx = true} : vector<16x2xf32> -> vector<16x2xf32>
    %cst_292 = arith.constant 0.000000e+00 : f32
    %397 = vector.broadcast %cst_292 : f32 to vector<16x16xf32>
    %398 = arith.mulf %386, %396 : vector<16x2xf32>
    %cst_293 = arith.constant dense<0.000000e+00> : vector<16x16xf32>
    %399 = tpu.matmul %398, %12, %cst_293 {dimension_numbers = #tpu.dot_dimension_numbers<[1], [0], [0], [1], [0, 0, 1, 1], [], []>} : vector<16x2xf32>, vector<2x16xf32>, vector<16x16xf32> -> vector<16x16xf32>
    %400 = arith.mulf %399, %305 : vector<16x16xf32>
    %401 = arith.addf %397, %400 : vector<16x16xf32>
    %402 = arith.mulf %388, %396 : vector<16x2xf32>
    %cst_294 = arith.constant dense<0.000000e+00> : vector<16x16xf32>
    %403 = tpu.matmul %402, %12, %cst_294 {dimension_numbers = #tpu.dot_dimension_numbers<[1], [0], [0], [1], [0, 0, 1, 1], [], []>} : vector<16x2xf32>, vector<2x16xf32>, vector<16x16xf32> -> vector<16x16xf32>
    %404 = arith.mulf %403, %329 : vector<16x16xf32>
    %405 = arith.addf %401, %404 : vector<16x16xf32>
    %406 = arith.mulf %390, %396 : vector<16x2xf32>
    %cst_295 = arith.constant dense<0.000000e+00> : vector<16x16xf32>
    %407 = tpu.matmul %406, %12, %cst_295 {dimension_numbers = #tpu.dot_dimension_numbers<[1], [0], [0], [1], [0, 0, 1, 1], [], []>} : vector<16x2xf32>, vector<2x16xf32>, vector<16x16xf32> -> vector<16x16xf32>
    %408 = arith.mulf %407, %353 : vector<16x16xf32>
    %409 = arith.addf %405, %408 : vector<16x16xf32>
    %410 = arith.mulf %392, %396 : vector<16x2xf32>
    %cst_296 = arith.constant dense<0.000000e+00> : vector<16x16xf32>
    %411 = tpu.matmul %410, %12, %cst_296 {dimension_numbers = #tpu.dot_dimension_numbers<[1], [0], [0], [1], [0, 0, 1, 1], [], []>} : vector<16x2xf32>, vector<2x16xf32>, vector<16x16xf32> -> vector<16x16xf32>
    %412 = arith.mulf %411, %377 : vector<16x16xf32>
    %413 = arith.addf %409, %412 : vector<16x16xf32>
    %c1_297 = arith.constant 1 : index
    %c0_298 = arith.constant 0 : index
    %c0_299 = arith.constant 0 : index
    %414 = vector.load %arg17[%c1_297, %c0_298, %c0_299] : memref<4x16x32xf32, #tpu.memory_space<vmem>>, vector<1x16x32xf32>
    %415 = vector.shape_cast %414 : vector<1x16x32xf32> to vector<16x32xf32>
    %cst_300 = arith.constant dense<0.000000e+00> : vector<16x32xf32>
    %416 = tpu.matmul %413, %415, %cst_300 {dimension_numbers = #tpu.dot_dimension_numbers<[1], [0], [0], [1], [0, 0, 1, 1], [], []>} : vector<16x16xf32>, vector<16x32xf32>, vector<16x32xf32> -> vector<16x32xf32>
    %417 = arith.addf %278, %416 : vector<16x32xf32>
    %c1_301 = arith.constant 1 : index
    %c0_302 = arith.constant 0 : index
    %c0_303 = arith.constant 0 : index
    %418 = vector.load %arg18[%c1_301, %c0_302, %c0_303] : memref<4x1x32xf32, #tpu.memory_space<vmem>>, vector<1x1x32xf32>
    %419 = vector.shape_cast %418 : vector<1x1x32xf32> to vector<1x32xf32>
    %420 = vector.broadcast %419 : vector<1x32xf32> to vector<16x32xf32>
    %421 = arith.addf %417, %420 : vector<16x32xf32>
    %c1_304 = arith.constant 1 : index
    %c0_305 = arith.constant 0 : index
    %c0_306 = arith.constant 0 : index
    %422 = vector.load %arg19[%c1_304, %c0_305, %c0_306] : memref<4x32x32xf32, #tpu.memory_space<vmem>>, vector<1x32x32xf32>
    %423 = vector.shape_cast %422 : vector<1x32x32xf32> to vector<32x32xf32>
    %cst_307 = arith.constant dense<0.000000e+00> : vector<16x32xf32>
    %424 = tpu.matmul %421, %423, %cst_307 {dimension_numbers = #tpu.dot_dimension_numbers<[1], [0], [0], [1], [0, 0, 1, 1], [], []>} : vector<16x32xf32>, vector<32x32xf32>, vector<16x32xf32> -> vector<16x32xf32>
    %c1_308 = arith.constant 1 : index
    %c0_309 = arith.constant 0 : index
    %c0_310 = arith.constant 0 : index
    %425 = vector.load %arg20[%c1_308, %c0_309, %c0_310] : memref<4x1x32xf32, #tpu.memory_space<vmem>>, vector<1x1x32xf32>
    %426 = vector.shape_cast %425 : vector<1x1x32xf32> to vector<1x32xf32>
    %427 = vector.broadcast %426 : vector<1x32xf32> to vector<16x32xf32>
    %428 = arith.addf %424, %427 : vector<16x32xf32>
    %cst_311 = arith.constant 0.000000e+00 : f32
    %429 = vector.broadcast %cst_311 : f32 to vector<16x32xf32>
    %430 = arith.maximumf %428, %429 : vector<16x32xf32>
    %c1_312 = arith.constant 1 : index
    %c0_313 = arith.constant 0 : index
    %c0_314 = arith.constant 0 : index
    %431 = vector.load %arg21[%c1_312, %c0_313, %c0_314] : memref<4x32x32xf32, #tpu.memory_space<vmem>>, vector<1x32x32xf32>
    %432 = vector.shape_cast %431 : vector<1x32x32xf32> to vector<32x32xf32>
    %cst_315 = arith.constant dense<0.000000e+00> : vector<16x32xf32>
    %433 = tpu.matmul %430, %432, %cst_315 {dimension_numbers = #tpu.dot_dimension_numbers<[1], [0], [0], [1], [0, 0, 1, 1], [], []>} : vector<16x32xf32>, vector<32x32xf32>, vector<16x32xf32> -> vector<16x32xf32>
    %c1_316 = arith.constant 1 : index
    %c0_317 = arith.constant 0 : index
    %c0_318 = arith.constant 0 : index
    %434 = vector.load %arg22[%c1_316, %c0_317, %c0_318] : memref<4x1x32xf32, #tpu.memory_space<vmem>>, vector<1x1x32xf32>
    %435 = vector.shape_cast %434 : vector<1x1x32xf32> to vector<1x32xf32>
    %436 = vector.broadcast %435 : vector<1x32xf32> to vector<16x32xf32>
    %437 = arith.addf %433, %436 : vector<16x32xf32>
    %cst_319 = arith.constant 0.000000e+00 : f32
    %438 = vector.broadcast %cst_319 : f32 to vector<16x32xf32>
    %439 = arith.maximumf %437, %438 : vector<16x32xf32>
    %c1_320 = arith.constant 1 : index
    %c0_321 = arith.constant 0 : index
    %c0_322 = arith.constant 0 : index
    %440 = vector.load %arg23[%c1_320, %c0_321, %c0_322] : memref<4x32x32xf32, #tpu.memory_space<vmem>>, vector<1x32x32xf32>
    %441 = vector.shape_cast %440 : vector<1x32x32xf32> to vector<32x32xf32>
    %cst_323 = arith.constant dense<0.000000e+00> : vector<16x32xf32>
    %442 = tpu.matmul %439, %441, %cst_323 {dimension_numbers = #tpu.dot_dimension_numbers<[1], [0], [0], [1], [0, 0, 1, 1], [], []>} : vector<16x32xf32>, vector<32x32xf32>, vector<16x32xf32> -> vector<16x32xf32>
    %c1_324 = arith.constant 1 : index
    %c0_325 = arith.constant 0 : index
    %c0_326 = arith.constant 0 : index
    %443 = vector.load %arg24[%c1_324, %c0_325, %c0_326] : memref<4x1x32xf32, #tpu.memory_space<vmem>>, vector<1x1x32xf32>
    %444 = vector.shape_cast %443 : vector<1x1x32xf32> to vector<1x32xf32>
    %445 = vector.broadcast %444 : vector<1x32xf32> to vector<16x32xf32>
    %446 = arith.addf %442, %445 : vector<16x32xf32>
    %447 = arith.addf %421, %446 : vector<16x32xf32>
    %c2_327 = arith.constant 2 : index
    %c0_328 = arith.constant 0 : index
    %c0_329 = arith.constant 0 : index
    %448 = vector.load %arg11[%c2_327, %c0_328, %c0_329] : memref<4x32x16xf32, #tpu.memory_space<vmem>>, vector<1x32x16xf32>
    %449 = vector.shape_cast %448 : vector<1x32x16xf32> to vector<32x16xf32>
    %cst_330 = arith.constant dense<0.000000e+00> : vector<16x16xf32>
    %450 = tpu.matmul %447, %449, %cst_330 {dimension_numbers = #tpu.dot_dimension_numbers<[1], [0], [0], [1], [0, 0, 1, 1], [], []>} : vector<16x32xf32>, vector<32x16xf32>, vector<16x16xf32> -> vector<16x16xf32>
    %c2_331 = arith.constant 2 : index
    %c0_332 = arith.constant 0 : index
    %c0_333 = arith.constant 0 : index
    %451 = vector.load %arg12[%c2_331, %c0_332, %c0_333] : memref<4x1x16xf32, #tpu.memory_space<vmem>>, vector<1x1x16xf32>
    %452 = vector.shape_cast %451 : vector<1x1x16xf32> to vector<1x16xf32>
    %453 = vector.broadcast %452 : vector<1x16xf32> to vector<16x16xf32>
    %454 = arith.addf %450, %453 : vector<16x16xf32>
    %c0_334 = arith.constant 0 : index
    %c0_335 = arith.constant 0 : index
    %c0_336 = arith.constant 0 : index
    %c0_337 = arith.constant 0 : index
    %455 = vector.load %arg5[%c0_334, %c0_335, %c0_336, %c0_337] : memref<1x4x16x16xf32, #tpu.memory_space<vmem>>, vector<1x1x16x16xf32>
    %456 = vector.shape_cast %455 : vector<1x1x16x16xf32> to vector<16x16xf32>
    %cst_338 = arith.constant dense<0.000000e+00> : vector<16x32xf32>
    %457 = tpu.matmul %456, %447, %cst_338 {dimension_numbers = #tpu.dot_dimension_numbers<[1], [0], [0], [1], [0, 0, 1, 1], [], []>} : vector<16x16xf32>, vector<16x32xf32>, vector<16x32xf32> -> vector<16x32xf32>
    %c2_339 = arith.constant 2 : index
    %c0_340 = arith.constant 0 : index
    %c0_341 = arith.constant 0 : index
    %458 = vector.load %arg13[%c2_339, %c0_340, %c0_341] : memref<4x32x32xf32, #tpu.memory_space<vmem>>, vector<1x32x32xf32>
    %459 = vector.shape_cast %458 : vector<1x32x32xf32> to vector<32x32xf32>
    %cst_342 = arith.constant dense<0.000000e+00> : vector<16x32xf32>
    %460 = tpu.matmul %457, %459, %cst_342 {dimension_numbers = #tpu.dot_dimension_numbers<[1], [0], [0], [1], [0, 0, 1, 1], [], []>} : vector<16x32xf32>, vector<32x32xf32>, vector<16x32xf32> -> vector<16x32xf32>
    %c2_343 = arith.constant 2 : index
    %c0_344 = arith.constant 0 : index
    %c0_345 = arith.constant 0 : index
    %461 = vector.load %arg14[%c2_343, %c0_344, %c0_345] : memref<4x4x32xf32, #tpu.memory_space<vmem>>, vector<1x4x32xf32>
    %462 = vector.shape_cast %461 : vector<1x4x32xf32> to vector<4x32xf32>
    %cst_346 = arith.constant dense<0.000000e+00> : vector<16x32xf32>
    %463 = tpu.matmul %45, %462, %cst_346 {dimension_numbers = #tpu.dot_dimension_numbers<[1], [0], [0], [1], [0, 0, 1, 1], [], []>} : vector<16x4xf32>, vector<4x32xf32>, vector<16x32xf32> -> vector<16x32xf32>
    %464 = arith.addf %460, %463 : vector<16x32xf32>
    %c2_347 = arith.constant 2 : index
    %c0_348 = arith.constant 0 : index
    %c0_349 = arith.constant 0 : index
    %465 = vector.load %arg15[%c2_347, %c0_348, %c0_349] : memref<4x8x32xf32, #tpu.memory_space<vmem>>, vector<1x8x32xf32>
    %466 = vector.shape_cast %465 : vector<1x8x32xf32> to vector<8x32xf32>
    %cst_350 = arith.constant dense<0.000000e+00> : vector<16x32xf32>
    %467 = tpu.matmul %44, %466, %cst_350 {dimension_numbers = #tpu.dot_dimension_numbers<[1], [0], [0], [1], [0, 0, 1, 1], [], []>} : vector<16x8xf32>, vector<8x32xf32>, vector<16x32xf32> -> vector<16x32xf32>
    %468 = arith.addf %464, %467 : vector<16x32xf32>
    %c2_351 = arith.constant 2 : index
    %c0_352 = arith.constant 0 : index
    %c0_353 = arith.constant 0 : index
    %469 = vector.load %arg16[%c2_351, %c0_352, %c0_353] : memref<4x1x32xf32, #tpu.memory_space<vmem>>, vector<1x1x32xf32>
    %470 = vector.shape_cast %469 : vector<1x1x32xf32> to vector<1x32xf32>
    %471 = vector.broadcast %470 : vector<1x32xf32> to vector<16x32xf32>
    %472 = arith.addf %468, %471 : vector<16x32xf32>
    %473 = vector.extract_strided_slice %472 {offsets = [0, 0], sizes = [16, 16], strides = [1, 1]} : vector<16x32xf32> to vector<16x16xf32>
    %474 = vector.extract_strided_slice %472 {offsets = [0, 16], sizes = [16, 16], strides = [1, 1]} : vector<16x32xf32> to vector<16x16xf32>
    %475 = arith.mulf %454, %473 : vector<16x16xf32>
    %cst_354 = arith.constant dense<0.000000e+00> : vector<16x2xf32>
    %476 = tpu.matmul %475, %11, %cst_354 {dimension_numbers = #tpu.dot_dimension_numbers<[1], [0], [0], [1], [0, 0, 1, 1], [], []>} : vector<16x16xf32>, vector<16x2xf32>, vector<16x2xf32> -> vector<16x2xf32>
    %cst_355 = arith.constant 0.353553385 : f32
    %477 = vector.broadcast %cst_355 : f32 to vector<16x2xf32>
    %478 = arith.mulf %476, %477 : vector<16x2xf32>
    %c0_356 = arith.constant 0 : index
    %c1_357 = arith.constant 1 : index
    %c0_358 = arith.constant 0 : index
    %c0_359 = arith.constant 0 : index
    %479 = vector.load %arg5[%c0_356, %c1_357, %c0_358, %c0_359] : memref<1x4x16x16xf32, #tpu.memory_space<vmem>>, vector<1x1x16x16xf32>
    %480 = vector.shape_cast %479 : vector<1x1x16x16xf32> to vector<16x16xf32>
    %cst_360 = arith.constant dense<0.000000e+00> : vector<16x32xf32>
    %481 = tpu.matmul %480, %447, %cst_360 {dimension_numbers = #tpu.dot_dimension_numbers<[1], [0], [0], [1], [0, 0, 1, 1], [], []>} : vector<16x16xf32>, vector<16x32xf32>, vector<16x32xf32> -> vector<16x32xf32>
    %c2_361 = arith.constant 2 : index
    %c0_362 = arith.constant 0 : index
    %c0_363 = arith.constant 0 : index
    %482 = vector.load %arg13[%c2_361, %c0_362, %c0_363] : memref<4x32x32xf32, #tpu.memory_space<vmem>>, vector<1x32x32xf32>
    %483 = vector.shape_cast %482 : vector<1x32x32xf32> to vector<32x32xf32>
    %cst_364 = arith.constant dense<0.000000e+00> : vector<16x32xf32>
    %484 = tpu.matmul %481, %483, %cst_364 {dimension_numbers = #tpu.dot_dimension_numbers<[1], [0], [0], [1], [0, 0, 1, 1], [], []>} : vector<16x32xf32>, vector<32x32xf32>, vector<16x32xf32> -> vector<16x32xf32>
    %c2_365 = arith.constant 2 : index
    %c0_366 = arith.constant 0 : index
    %c0_367 = arith.constant 0 : index
    %485 = vector.load %arg14[%c2_365, %c0_366, %c0_367] : memref<4x4x32xf32, #tpu.memory_space<vmem>>, vector<1x4x32xf32>
    %486 = vector.shape_cast %485 : vector<1x4x32xf32> to vector<4x32xf32>
    %cst_368 = arith.constant dense<0.000000e+00> : vector<16x32xf32>
    %487 = tpu.matmul %65, %486, %cst_368 {dimension_numbers = #tpu.dot_dimension_numbers<[1], [0], [0], [1], [0, 0, 1, 1], [], []>} : vector<16x4xf32>, vector<4x32xf32>, vector<16x32xf32> -> vector<16x32xf32>
    %488 = arith.addf %484, %487 : vector<16x32xf32>
    %c2_369 = arith.constant 2 : index
    %c0_370 = arith.constant 0 : index
    %c0_371 = arith.constant 0 : index
    %489 = vector.load %arg15[%c2_369, %c0_370, %c0_371] : memref<4x8x32xf32, #tpu.memory_space<vmem>>, vector<1x8x32xf32>
    %490 = vector.shape_cast %489 : vector<1x8x32xf32> to vector<8x32xf32>
    %cst_372 = arith.constant dense<0.000000e+00> : vector<16x32xf32>
    %491 = tpu.matmul %64, %490, %cst_372 {dimension_numbers = #tpu.dot_dimension_numbers<[1], [0], [0], [1], [0, 0, 1, 1], [], []>} : vector<16x8xf32>, vector<8x32xf32>, vector<16x32xf32> -> vector<16x32xf32>
    %492 = arith.addf %488, %491 : vector<16x32xf32>
    %c2_373 = arith.constant 2 : index
    %c0_374 = arith.constant 0 : index
    %c0_375 = arith.constant 0 : index
    %493 = vector.load %arg16[%c2_373, %c0_374, %c0_375] : memref<4x1x32xf32, #tpu.memory_space<vmem>>, vector<1x1x32xf32>
    %494 = vector.shape_cast %493 : vector<1x1x32xf32> to vector<1x32xf32>
    %495 = vector.broadcast %494 : vector<1x32xf32> to vector<16x32xf32>
    %496 = arith.addf %492, %495 : vector<16x32xf32>
    %497 = vector.extract_strided_slice %496 {offsets = [0, 0], sizes = [16, 16], strides = [1, 1]} : vector<16x32xf32> to vector<16x16xf32>
    %498 = vector.extract_strided_slice %496 {offsets = [0, 16], sizes = [16, 16], strides = [1, 1]} : vector<16x32xf32> to vector<16x16xf32>
    %499 = arith.mulf %454, %497 : vector<16x16xf32>
    %cst_376 = arith.constant dense<0.000000e+00> : vector<16x2xf32>
    %500 = tpu.matmul %499, %11, %cst_376 {dimension_numbers = #tpu.dot_dimension_numbers<[1], [0], [0], [1], [0, 0, 1, 1], [], []>} : vector<16x16xf32>, vector<16x2xf32>, vector<16x2xf32> -> vector<16x2xf32>
    %cst_377 = arith.constant 0.353553385 : f32
    %501 = vector.broadcast %cst_377 : f32 to vector<16x2xf32>
    %502 = arith.mulf %500, %501 : vector<16x2xf32>
    %c0_378 = arith.constant 0 : index
    %c2_379 = arith.constant 2 : index
    %c0_380 = arith.constant 0 : index
    %c0_381 = arith.constant 0 : index
    %503 = vector.load %arg5[%c0_378, %c2_379, %c0_380, %c0_381] : memref<1x4x16x16xf32, #tpu.memory_space<vmem>>, vector<1x1x16x16xf32>
    %504 = vector.shape_cast %503 : vector<1x1x16x16xf32> to vector<16x16xf32>
    %cst_382 = arith.constant dense<0.000000e+00> : vector<16x32xf32>
    %505 = tpu.matmul %504, %447, %cst_382 {dimension_numbers = #tpu.dot_dimension_numbers<[1], [0], [0], [1], [0, 0, 1, 1], [], []>} : vector<16x16xf32>, vector<16x32xf32>, vector<16x32xf32> -> vector<16x32xf32>
    %c2_383 = arith.constant 2 : index
    %c0_384 = arith.constant 0 : index
    %c0_385 = arith.constant 0 : index
    %506 = vector.load %arg13[%c2_383, %c0_384, %c0_385] : memref<4x32x32xf32, #tpu.memory_space<vmem>>, vector<1x32x32xf32>
    %507 = vector.shape_cast %506 : vector<1x32x32xf32> to vector<32x32xf32>
    %cst_386 = arith.constant dense<0.000000e+00> : vector<16x32xf32>
    %508 = tpu.matmul %505, %507, %cst_386 {dimension_numbers = #tpu.dot_dimension_numbers<[1], [0], [0], [1], [0, 0, 1, 1], [], []>} : vector<16x32xf32>, vector<32x32xf32>, vector<16x32xf32> -> vector<16x32xf32>
    %c2_387 = arith.constant 2 : index
    %c0_388 = arith.constant 0 : index
    %c0_389 = arith.constant 0 : index
    %509 = vector.load %arg14[%c2_387, %c0_388, %c0_389] : memref<4x4x32xf32, #tpu.memory_space<vmem>>, vector<1x4x32xf32>
    %510 = vector.shape_cast %509 : vector<1x4x32xf32> to vector<4x32xf32>
    %cst_390 = arith.constant dense<0.000000e+00> : vector<16x32xf32>
    %511 = tpu.matmul %85, %510, %cst_390 {dimension_numbers = #tpu.dot_dimension_numbers<[1], [0], [0], [1], [0, 0, 1, 1], [], []>} : vector<16x4xf32>, vector<4x32xf32>, vector<16x32xf32> -> vector<16x32xf32>
    %512 = arith.addf %508, %511 : vector<16x32xf32>
    %c2_391 = arith.constant 2 : index
    %c0_392 = arith.constant 0 : index
    %c0_393 = arith.constant 0 : index
    %513 = vector.load %arg15[%c2_391, %c0_392, %c0_393] : memref<4x8x32xf32, #tpu.memory_space<vmem>>, vector<1x8x32xf32>
    %514 = vector.shape_cast %513 : vector<1x8x32xf32> to vector<8x32xf32>
    %cst_394 = arith.constant dense<0.000000e+00> : vector<16x32xf32>
    %515 = tpu.matmul %84, %514, %cst_394 {dimension_numbers = #tpu.dot_dimension_numbers<[1], [0], [0], [1], [0, 0, 1, 1], [], []>} : vector<16x8xf32>, vector<8x32xf32>, vector<16x32xf32> -> vector<16x32xf32>
    %516 = arith.addf %512, %515 : vector<16x32xf32>
    %c2_395 = arith.constant 2 : index
    %c0_396 = arith.constant 0 : index
    %c0_397 = arith.constant 0 : index
    %517 = vector.load %arg16[%c2_395, %c0_396, %c0_397] : memref<4x1x32xf32, #tpu.memory_space<vmem>>, vector<1x1x32xf32>
    %518 = vector.shape_cast %517 : vector<1x1x32xf32> to vector<1x32xf32>
    %519 = vector.broadcast %518 : vector<1x32xf32> to vector<16x32xf32>
    %520 = arith.addf %516, %519 : vector<16x32xf32>
    %521 = vector.extract_strided_slice %520 {offsets = [0, 0], sizes = [16, 16], strides = [1, 1]} : vector<16x32xf32> to vector<16x16xf32>
    %522 = vector.extract_strided_slice %520 {offsets = [0, 16], sizes = [16, 16], strides = [1, 1]} : vector<16x32xf32> to vector<16x16xf32>
    %523 = arith.mulf %454, %521 : vector<16x16xf32>
    %cst_398 = arith.constant dense<0.000000e+00> : vector<16x2xf32>
    %524 = tpu.matmul %523, %11, %cst_398 {dimension_numbers = #tpu.dot_dimension_numbers<[1], [0], [0], [1], [0, 0, 1, 1], [], []>} : vector<16x16xf32>, vector<16x2xf32>, vector<16x2xf32> -> vector<16x2xf32>
    %cst_399 = arith.constant 0.353553385 : f32
    %525 = vector.broadcast %cst_399 : f32 to vector<16x2xf32>
    %526 = arith.mulf %524, %525 : vector<16x2xf32>
    %c0_400 = arith.constant 0 : index
    %c3_401 = arith.constant 3 : index
    %c0_402 = arith.constant 0 : index
    %c0_403 = arith.constant 0 : index
    %527 = vector.load %arg5[%c0_400, %c3_401, %c0_402, %c0_403] : memref<1x4x16x16xf32, #tpu.memory_space<vmem>>, vector<1x1x16x16xf32>
    %528 = vector.shape_cast %527 : vector<1x1x16x16xf32> to vector<16x16xf32>
    %cst_404 = arith.constant dense<0.000000e+00> : vector<16x32xf32>
    %529 = tpu.matmul %528, %447, %cst_404 {dimension_numbers = #tpu.dot_dimension_numbers<[1], [0], [0], [1], [0, 0, 1, 1], [], []>} : vector<16x16xf32>, vector<16x32xf32>, vector<16x32xf32> -> vector<16x32xf32>
    %c2_405 = arith.constant 2 : index
    %c0_406 = arith.constant 0 : index
    %c0_407 = arith.constant 0 : index
    %530 = vector.load %arg13[%c2_405, %c0_406, %c0_407] : memref<4x32x32xf32, #tpu.memory_space<vmem>>, vector<1x32x32xf32>
    %531 = vector.shape_cast %530 : vector<1x32x32xf32> to vector<32x32xf32>
    %cst_408 = arith.constant dense<0.000000e+00> : vector<16x32xf32>
    %532 = tpu.matmul %529, %531, %cst_408 {dimension_numbers = #tpu.dot_dimension_numbers<[1], [0], [0], [1], [0, 0, 1, 1], [], []>} : vector<16x32xf32>, vector<32x32xf32>, vector<16x32xf32> -> vector<16x32xf32>
    %c2_409 = arith.constant 2 : index
    %c0_410 = arith.constant 0 : index
    %c0_411 = arith.constant 0 : index
    %533 = vector.load %arg14[%c2_409, %c0_410, %c0_411] : memref<4x4x32xf32, #tpu.memory_space<vmem>>, vector<1x4x32xf32>
    %534 = vector.shape_cast %533 : vector<1x4x32xf32> to vector<4x32xf32>
    %cst_412 = arith.constant dense<0.000000e+00> : vector<16x32xf32>
    %535 = tpu.matmul %105, %534, %cst_412 {dimension_numbers = #tpu.dot_dimension_numbers<[1], [0], [0], [1], [0, 0, 1, 1], [], []>} : vector<16x4xf32>, vector<4x32xf32>, vector<16x32xf32> -> vector<16x32xf32>
    %536 = arith.addf %532, %535 : vector<16x32xf32>
    %c2_413 = arith.constant 2 : index
    %c0_414 = arith.constant 0 : index
    %c0_415 = arith.constant 0 : index
    %537 = vector.load %arg15[%c2_413, %c0_414, %c0_415] : memref<4x8x32xf32, #tpu.memory_space<vmem>>, vector<1x8x32xf32>
    %538 = vector.shape_cast %537 : vector<1x8x32xf32> to vector<8x32xf32>
    %cst_416 = arith.constant dense<0.000000e+00> : vector<16x32xf32>
    %539 = tpu.matmul %104, %538, %cst_416 {dimension_numbers = #tpu.dot_dimension_numbers<[1], [0], [0], [1], [0, 0, 1, 1], [], []>} : vector<16x8xf32>, vector<8x32xf32>, vector<16x32xf32> -> vector<16x32xf32>
    %540 = arith.addf %536, %539 : vector<16x32xf32>
    %c2_417 = arith.constant 2 : index
    %c0_418 = arith.constant 0 : index
    %c0_419 = arith.constant 0 : index
    %541 = vector.load %arg16[%c2_417, %c0_418, %c0_419] : memref<4x1x32xf32, #tpu.memory_space<vmem>>, vector<1x1x32xf32>
    %542 = vector.shape_cast %541 : vector<1x1x32xf32> to vector<1x32xf32>
    %543 = vector.broadcast %542 : vector<1x32xf32> to vector<16x32xf32>
    %544 = arith.addf %540, %543 : vector<16x32xf32>
    %545 = vector.extract_strided_slice %544 {offsets = [0, 0], sizes = [16, 16], strides = [1, 1]} : vector<16x32xf32> to vector<16x16xf32>
    %546 = vector.extract_strided_slice %544 {offsets = [0, 16], sizes = [16, 16], strides = [1, 1]} : vector<16x32xf32> to vector<16x16xf32>
    %547 = arith.mulf %454, %545 : vector<16x16xf32>
    %cst_420 = arith.constant dense<0.000000e+00> : vector<16x2xf32>
    %548 = tpu.matmul %547, %11, %cst_420 {dimension_numbers = #tpu.dot_dimension_numbers<[1], [0], [0], [1], [0, 0, 1, 1], [], []>} : vector<16x16xf32>, vector<16x2xf32>, vector<16x2xf32> -> vector<16x2xf32>
    %cst_421 = arith.constant 0.353553385 : f32
    %549 = vector.broadcast %cst_421 : f32 to vector<16x2xf32>
    %550 = arith.mulf %548, %549 : vector<16x2xf32>
    %551 = arith.maximumf %478, %502 : vector<16x2xf32>
    %552 = arith.maximumf %551, %526 : vector<16x2xf32>
    %553 = arith.maximumf %552, %550 : vector<16x2xf32>
    %554 = arith.subf %478, %553 : vector<16x2xf32>
    %555 = math.exp %554 : vector<16x2xf32>
    %556 = arith.subf %502, %553 : vector<16x2xf32>
    %557 = math.exp %556 : vector<16x2xf32>
    %558 = arith.subf %526, %553 : vector<16x2xf32>
    %559 = math.exp %558 : vector<16x2xf32>
    %560 = arith.subf %550, %553 : vector<16x2xf32>
    %561 = math.exp %560 : vector<16x2xf32>
    %562 = arith.addf %555, %557 : vector<16x2xf32>
    %563 = arith.addf %562, %559 : vector<16x2xf32>
    %564 = arith.addf %563, %561 : vector<16x2xf32>
    %565 = tpu.reciprocal %564 {approx = true} : vector<16x2xf32> -> vector<16x2xf32>
    %cst_422 = arith.constant 0.000000e+00 : f32
    %566 = vector.broadcast %cst_422 : f32 to vector<16x16xf32>
    %567 = arith.mulf %555, %565 : vector<16x2xf32>
    %cst_423 = arith.constant dense<0.000000e+00> : vector<16x16xf32>
    %568 = tpu.matmul %567, %12, %cst_423 {dimension_numbers = #tpu.dot_dimension_numbers<[1], [0], [0], [1], [0, 0, 1, 1], [], []>} : vector<16x2xf32>, vector<2x16xf32>, vector<16x16xf32> -> vector<16x16xf32>
    %569 = arith.mulf %568, %474 : vector<16x16xf32>
    %570 = arith.addf %566, %569 : vector<16x16xf32>
    %571 = arith.mulf %557, %565 : vector<16x2xf32>
    %cst_424 = arith.constant dense<0.000000e+00> : vector<16x16xf32>
    %572 = tpu.matmul %571, %12, %cst_424 {dimension_numbers = #tpu.dot_dimension_numbers<[1], [0], [0], [1], [0, 0, 1, 1], [], []>} : vector<16x2xf32>, vector<2x16xf32>, vector<16x16xf32> -> vector<16x16xf32>
    %573 = arith.mulf %572, %498 : vector<16x16xf32>
    %574 = arith.addf %570, %573 : vector<16x16xf32>
    %575 = arith.mulf %559, %565 : vector<16x2xf32>
    %cst_425 = arith.constant dense<0.000000e+00> : vector<16x16xf32>
    %576 = tpu.matmul %575, %12, %cst_425 {dimension_numbers = #tpu.dot_dimension_numbers<[1], [0], [0], [1], [0, 0, 1, 1], [], []>} : vector<16x2xf32>, vector<2x16xf32>, vector<16x16xf32> -> vector<16x16xf32>
    %577 = arith.mulf %576, %522 : vector<16x16xf32>
    %578 = arith.addf %574, %577 : vector<16x16xf32>
    %579 = arith.mulf %561, %565 : vector<16x2xf32>
    %cst_426 = arith.constant dense<0.000000e+00> : vector<16x16xf32>
    %580 = tpu.matmul %579, %12, %cst_426 {dimension_numbers = #tpu.dot_dimension_numbers<[1], [0], [0], [1], [0, 0, 1, 1], [], []>} : vector<16x2xf32>, vector<2x16xf32>, vector<16x16xf32> -> vector<16x16xf32>
    %581 = arith.mulf %580, %546 : vector<16x16xf32>
    %582 = arith.addf %578, %581 : vector<16x16xf32>
    %c2_427 = arith.constant 2 : index
    %c0_428 = arith.constant 0 : index
    %c0_429 = arith.constant 0 : index
    %583 = vector.load %arg17[%c2_427, %c0_428, %c0_429] : memref<4x16x32xf32, #tpu.memory_space<vmem>>, vector<1x16x32xf32>
    %584 = vector.shape_cast %583 : vector<1x16x32xf32> to vector<16x32xf32>
    %cst_430 = arith.constant dense<0.000000e+00> : vector<16x32xf32>
    %585 = tpu.matmul %582, %584, %cst_430 {dimension_numbers = #tpu.dot_dimension_numbers<[1], [0], [0], [1], [0, 0, 1, 1], [], []>} : vector<16x16xf32>, vector<16x32xf32>, vector<16x32xf32> -> vector<16x32xf32>
    %586 = arith.addf %447, %585 : vector<16x32xf32>
    %c2_431 = arith.constant 2 : index
    %c0_432 = arith.constant 0 : index
    %c0_433 = arith.constant 0 : index
    %587 = vector.load %arg18[%c2_431, %c0_432, %c0_433] : memref<4x1x32xf32, #tpu.memory_space<vmem>>, vector<1x1x32xf32>
    %588 = vector.shape_cast %587 : vector<1x1x32xf32> to vector<1x32xf32>
    %589 = vector.broadcast %588 : vector<1x32xf32> to vector<16x32xf32>
    %590 = arith.addf %586, %589 : vector<16x32xf32>
    %c2_434 = arith.constant 2 : index
    %c0_435 = arith.constant 0 : index
    %c0_436 = arith.constant 0 : index
    %591 = vector.load %arg19[%c2_434, %c0_435, %c0_436] : memref<4x32x32xf32, #tpu.memory_space<vmem>>, vector<1x32x32xf32>
    %592 = vector.shape_cast %591 : vector<1x32x32xf32> to vector<32x32xf32>
    %cst_437 = arith.constant dense<0.000000e+00> : vector<16x32xf32>
    %593 = tpu.matmul %590, %592, %cst_437 {dimension_numbers = #tpu.dot_dimension_numbers<[1], [0], [0], [1], [0, 0, 1, 1], [], []>} : vector<16x32xf32>, vector<32x32xf32>, vector<16x32xf32> -> vector<16x32xf32>
    %c2_438 = arith.constant 2 : index
    %c0_439 = arith.constant 0 : index
    %c0_440 = arith.constant 0 : index
    %594 = vector.load %arg20[%c2_438, %c0_439, %c0_440] : memref<4x1x32xf32, #tpu.memory_space<vmem>>, vector<1x1x32xf32>
    %595 = vector.shape_cast %594 : vector<1x1x32xf32> to vector<1x32xf32>
    %596 = vector.broadcast %595 : vector<1x32xf32> to vector<16x32xf32>
    %597 = arith.addf %593, %596 : vector<16x32xf32>
    %cst_441 = arith.constant 0.000000e+00 : f32
    %598 = vector.broadcast %cst_441 : f32 to vector<16x32xf32>
    %599 = arith.maximumf %597, %598 : vector<16x32xf32>
    %c2_442 = arith.constant 2 : index
    %c0_443 = arith.constant 0 : index
    %c0_444 = arith.constant 0 : index
    %600 = vector.load %arg21[%c2_442, %c0_443, %c0_444] : memref<4x32x32xf32, #tpu.memory_space<vmem>>, vector<1x32x32xf32>
    %601 = vector.shape_cast %600 : vector<1x32x32xf32> to vector<32x32xf32>
    %cst_445 = arith.constant dense<0.000000e+00> : vector<16x32xf32>
    %602 = tpu.matmul %599, %601, %cst_445 {dimension_numbers = #tpu.dot_dimension_numbers<[1], [0], [0], [1], [0, 0, 1, 1], [], []>} : vector<16x32xf32>, vector<32x32xf32>, vector<16x32xf32> -> vector<16x32xf32>
    %c2_446 = arith.constant 2 : index
    %c0_447 = arith.constant 0 : index
    %c0_448 = arith.constant 0 : index
    %603 = vector.load %arg22[%c2_446, %c0_447, %c0_448] : memref<4x1x32xf32, #tpu.memory_space<vmem>>, vector<1x1x32xf32>
    %604 = vector.shape_cast %603 : vector<1x1x32xf32> to vector<1x32xf32>
    %605 = vector.broadcast %604 : vector<1x32xf32> to vector<16x32xf32>
    %606 = arith.addf %602, %605 : vector<16x32xf32>
    %cst_449 = arith.constant 0.000000e+00 : f32
    %607 = vector.broadcast %cst_449 : f32 to vector<16x32xf32>
    %608 = arith.maximumf %606, %607 : vector<16x32xf32>
    %c2_450 = arith.constant 2 : index
    %c0_451 = arith.constant 0 : index
    %c0_452 = arith.constant 0 : index
    %609 = vector.load %arg23[%c2_450, %c0_451, %c0_452] : memref<4x32x32xf32, #tpu.memory_space<vmem>>, vector<1x32x32xf32>
    %610 = vector.shape_cast %609 : vector<1x32x32xf32> to vector<32x32xf32>
    %cst_453 = arith.constant dense<0.000000e+00> : vector<16x32xf32>
    %611 = tpu.matmul %608, %610, %cst_453 {dimension_numbers = #tpu.dot_dimension_numbers<[1], [0], [0], [1], [0, 0, 1, 1], [], []>} : vector<16x32xf32>, vector<32x32xf32>, vector<16x32xf32> -> vector<16x32xf32>
    %c2_454 = arith.constant 2 : index
    %c0_455 = arith.constant 0 : index
    %c0_456 = arith.constant 0 : index
    %612 = vector.load %arg24[%c2_454, %c0_455, %c0_456] : memref<4x1x32xf32, #tpu.memory_space<vmem>>, vector<1x1x32xf32>
    %613 = vector.shape_cast %612 : vector<1x1x32xf32> to vector<1x32xf32>
    %614 = vector.broadcast %613 : vector<1x32xf32> to vector<16x32xf32>
    %615 = arith.addf %611, %614 : vector<16x32xf32>
    %616 = arith.addf %590, %615 : vector<16x32xf32>
    %617 = vector.extract_strided_slice %109 {offsets = [0, 0], sizes = [1, 64], strides = [1, 1]} : vector<1x128xf32> to vector<1x64xf32>
    %618 = vector.extract_strided_slice %617 {offsets = [0, 0], sizes = [1, 32], strides = [1, 1]} : vector<1x64xf32> to vector<1x32xf32>
    %cst_457 = arith.constant 1.000000e+00 : f32
    %619 = vector.broadcast %cst_457 : f32 to vector<1x32xf32>
    %620 = arith.addf %619, %618 : vector<1x32xf32>
    %621 = vector.broadcast %620 : vector<1x32xf32> to vector<16x32xf32>
    %622 = arith.mulf %616, %621 : vector<16x32xf32>
    %623 = vector.extract_strided_slice %617 {offsets = [0, 32], sizes = [1, 32], strides = [1, 1]} : vector<1x64xf32> to vector<1x32xf32>
    %624 = vector.broadcast %623 : vector<1x32xf32> to vector<16x32xf32>
    %625 = arith.addf %622, %624 : vector<16x32xf32>
    %c3_458 = arith.constant 3 : index
    %c0_459 = arith.constant 0 : index
    %c0_460 = arith.constant 0 : index
    %626 = vector.load %arg11[%c3_458, %c0_459, %c0_460] : memref<4x32x16xf32, #tpu.memory_space<vmem>>, vector<1x32x16xf32>
    %627 = vector.shape_cast %626 : vector<1x32x16xf32> to vector<32x16xf32>
    %cst_461 = arith.constant dense<0.000000e+00> : vector<16x16xf32>
    %628 = tpu.matmul %625, %627, %cst_461 {dimension_numbers = #tpu.dot_dimension_numbers<[1], [0], [0], [1], [0, 0, 1, 1], [], []>} : vector<16x32xf32>, vector<32x16xf32>, vector<16x16xf32> -> vector<16x16xf32>
    %c3_462 = arith.constant 3 : index
    %c0_463 = arith.constant 0 : index
    %c0_464 = arith.constant 0 : index
    %629 = vector.load %arg12[%c3_462, %c0_463, %c0_464] : memref<4x1x16xf32, #tpu.memory_space<vmem>>, vector<1x1x16xf32>
    %630 = vector.shape_cast %629 : vector<1x1x16xf32> to vector<1x16xf32>
    %631 = vector.broadcast %630 : vector<1x16xf32> to vector<16x16xf32>
    %632 = arith.addf %628, %631 : vector<16x16xf32>
    %c0_465 = arith.constant 0 : index
    %c0_466 = arith.constant 0 : index
    %c0_467 = arith.constant 0 : index
    %c0_468 = arith.constant 0 : index
    %633 = vector.load %arg5[%c0_465, %c0_466, %c0_467, %c0_468] : memref<1x4x16x16xf32, #tpu.memory_space<vmem>>, vector<1x1x16x16xf32>
    %634 = vector.shape_cast %633 : vector<1x1x16x16xf32> to vector<16x16xf32>
    %cst_469 = arith.constant dense<0.000000e+00> : vector<16x32xf32>
    %635 = tpu.matmul %634, %625, %cst_469 {dimension_numbers = #tpu.dot_dimension_numbers<[1], [0], [0], [1], [0, 0, 1, 1], [], []>} : vector<16x16xf32>, vector<16x32xf32>, vector<16x32xf32> -> vector<16x32xf32>
    %c3_470 = arith.constant 3 : index
    %c0_471 = arith.constant 0 : index
    %c0_472 = arith.constant 0 : index
    %636 = vector.load %arg13[%c3_470, %c0_471, %c0_472] : memref<4x32x32xf32, #tpu.memory_space<vmem>>, vector<1x32x32xf32>
    %637 = vector.shape_cast %636 : vector<1x32x32xf32> to vector<32x32xf32>
    %cst_473 = arith.constant dense<0.000000e+00> : vector<16x32xf32>
    %638 = tpu.matmul %635, %637, %cst_473 {dimension_numbers = #tpu.dot_dimension_numbers<[1], [0], [0], [1], [0, 0, 1, 1], [], []>} : vector<16x32xf32>, vector<32x32xf32>, vector<16x32xf32> -> vector<16x32xf32>
    %c3_474 = arith.constant 3 : index
    %c0_475 = arith.constant 0 : index
    %c0_476 = arith.constant 0 : index
    %639 = vector.load %arg14[%c3_474, %c0_475, %c0_476] : memref<4x4x32xf32, #tpu.memory_space<vmem>>, vector<1x4x32xf32>
    %640 = vector.shape_cast %639 : vector<1x4x32xf32> to vector<4x32xf32>
    %cst_477 = arith.constant dense<0.000000e+00> : vector<16x32xf32>
    %641 = tpu.matmul %45, %640, %cst_477 {dimension_numbers = #tpu.dot_dimension_numbers<[1], [0], [0], [1], [0, 0, 1, 1], [], []>} : vector<16x4xf32>, vector<4x32xf32>, vector<16x32xf32> -> vector<16x32xf32>
    %642 = arith.addf %638, %641 : vector<16x32xf32>
    %c3_478 = arith.constant 3 : index
    %c0_479 = arith.constant 0 : index
    %c0_480 = arith.constant 0 : index
    %643 = vector.load %arg15[%c3_478, %c0_479, %c0_480] : memref<4x8x32xf32, #tpu.memory_space<vmem>>, vector<1x8x32xf32>
    %644 = vector.shape_cast %643 : vector<1x8x32xf32> to vector<8x32xf32>
    %cst_481 = arith.constant dense<0.000000e+00> : vector<16x32xf32>
    %645 = tpu.matmul %44, %644, %cst_481 {dimension_numbers = #tpu.dot_dimension_numbers<[1], [0], [0], [1], [0, 0, 1, 1], [], []>} : vector<16x8xf32>, vector<8x32xf32>, vector<16x32xf32> -> vector<16x32xf32>
    %646 = arith.addf %642, %645 : vector<16x32xf32>
    %c3_482 = arith.constant 3 : index
    %c0_483 = arith.constant 0 : index
    %c0_484 = arith.constant 0 : index
    %647 = vector.load %arg16[%c3_482, %c0_483, %c0_484] : memref<4x1x32xf32, #tpu.memory_space<vmem>>, vector<1x1x32xf32>
    %648 = vector.shape_cast %647 : vector<1x1x32xf32> to vector<1x32xf32>
    %649 = vector.broadcast %648 : vector<1x32xf32> to vector<16x32xf32>
    %650 = arith.addf %646, %649 : vector<16x32xf32>
    %651 = vector.extract_strided_slice %650 {offsets = [0, 0], sizes = [16, 16], strides = [1, 1]} : vector<16x32xf32> to vector<16x16xf32>
    %652 = vector.extract_strided_slice %650 {offsets = [0, 16], sizes = [16, 16], strides = [1, 1]} : vector<16x32xf32> to vector<16x16xf32>
    %653 = arith.mulf %632, %651 : vector<16x16xf32>
    %cst_485 = arith.constant dense<0.000000e+00> : vector<16x2xf32>
    %654 = tpu.matmul %653, %11, %cst_485 {dimension_numbers = #tpu.dot_dimension_numbers<[1], [0], [0], [1], [0, 0, 1, 1], [], []>} : vector<16x16xf32>, vector<16x2xf32>, vector<16x2xf32> -> vector<16x2xf32>
    %cst_486 = arith.constant 0.353553385 : f32
    %655 = vector.broadcast %cst_486 : f32 to vector<16x2xf32>
    %656 = arith.mulf %654, %655 : vector<16x2xf32>
    %c0_487 = arith.constant 0 : index
    %c1_488 = arith.constant 1 : index
    %c0_489 = arith.constant 0 : index
    %c0_490 = arith.constant 0 : index
    %657 = vector.load %arg5[%c0_487, %c1_488, %c0_489, %c0_490] : memref<1x4x16x16xf32, #tpu.memory_space<vmem>>, vector<1x1x16x16xf32>
    %658 = vector.shape_cast %657 : vector<1x1x16x16xf32> to vector<16x16xf32>
    %cst_491 = arith.constant dense<0.000000e+00> : vector<16x32xf32>
    %659 = tpu.matmul %658, %625, %cst_491 {dimension_numbers = #tpu.dot_dimension_numbers<[1], [0], [0], [1], [0, 0, 1, 1], [], []>} : vector<16x16xf32>, vector<16x32xf32>, vector<16x32xf32> -> vector<16x32xf32>
    %c3_492 = arith.constant 3 : index
    %c0_493 = arith.constant 0 : index
    %c0_494 = arith.constant 0 : index
    %660 = vector.load %arg13[%c3_492, %c0_493, %c0_494] : memref<4x32x32xf32, #tpu.memory_space<vmem>>, vector<1x32x32xf32>
    %661 = vector.shape_cast %660 : vector<1x32x32xf32> to vector<32x32xf32>
    %cst_495 = arith.constant dense<0.000000e+00> : vector<16x32xf32>
    %662 = tpu.matmul %659, %661, %cst_495 {dimension_numbers = #tpu.dot_dimension_numbers<[1], [0], [0], [1], [0, 0, 1, 1], [], []>} : vector<16x32xf32>, vector<32x32xf32>, vector<16x32xf32> -> vector<16x32xf32>
    %c3_496 = arith.constant 3 : index
    %c0_497 = arith.constant 0 : index
    %c0_498 = arith.constant 0 : index
    %663 = vector.load %arg14[%c3_496, %c0_497, %c0_498] : memref<4x4x32xf32, #tpu.memory_space<vmem>>, vector<1x4x32xf32>
    %664 = vector.shape_cast %663 : vector<1x4x32xf32> to vector<4x32xf32>
    %cst_499 = arith.constant dense<0.000000e+00> : vector<16x32xf32>
    %665 = tpu.matmul %65, %664, %cst_499 {dimension_numbers = #tpu.dot_dimension_numbers<[1], [0], [0], [1], [0, 0, 1, 1], [], []>} : vector<16x4xf32>, vector<4x32xf32>, vector<16x32xf32> -> vector<16x32xf32>
    %666 = arith.addf %662, %665 : vector<16x32xf32>
    %c3_500 = arith.constant 3 : index
    %c0_501 = arith.constant 0 : index
    %c0_502 = arith.constant 0 : index
    %667 = vector.load %arg15[%c3_500, %c0_501, %c0_502] : memref<4x8x32xf32, #tpu.memory_space<vmem>>, vector<1x8x32xf32>
    %668 = vector.shape_cast %667 : vector<1x8x32xf32> to vector<8x32xf32>
    %cst_503 = arith.constant dense<0.000000e+00> : vector<16x32xf32>
    %669 = tpu.matmul %64, %668, %cst_503 {dimension_numbers = #tpu.dot_dimension_numbers<[1], [0], [0], [1], [0, 0, 1, 1], [], []>} : vector<16x8xf32>, vector<8x32xf32>, vector<16x32xf32> -> vector<16x32xf32>
    %670 = arith.addf %666, %669 : vector<16x32xf32>
    %c3_504 = arith.constant 3 : index
    %c0_505 = arith.constant 0 : index
    %c0_506 = arith.constant 0 : index
    %671 = vector.load %arg16[%c3_504, %c0_505, %c0_506] : memref<4x1x32xf32, #tpu.memory_space<vmem>>, vector<1x1x32xf32>
    %672 = vector.shape_cast %671 : vector<1x1x32xf32> to vector<1x32xf32>
    %673 = vector.broadcast %672 : vector<1x32xf32> to vector<16x32xf32>
    %674 = arith.addf %670, %673 : vector<16x32xf32>
    %675 = vector.extract_strided_slice %674 {offsets = [0, 0], sizes = [16, 16], strides = [1, 1]} : vector<16x32xf32> to vector<16x16xf32>
    %676 = vector.extract_strided_slice %674 {offsets = [0, 16], sizes = [16, 16], strides = [1, 1]} : vector<16x32xf32> to vector<16x16xf32>
    %677 = arith.mulf %632, %675 : vector<16x16xf32>
    %cst_507 = arith.constant dense<0.000000e+00> : vector<16x2xf32>
    %678 = tpu.matmul %677, %11, %cst_507 {dimension_numbers = #tpu.dot_dimension_numbers<[1], [0], [0], [1], [0, 0, 1, 1], [], []>} : vector<16x16xf32>, vector<16x2xf32>, vector<16x2xf32> -> vector<16x2xf32>
    %cst_508 = arith.constant 0.353553385 : f32
    %679 = vector.broadcast %cst_508 : f32 to vector<16x2xf32>
    %680 = arith.mulf %678, %679 : vector<16x2xf32>
    %c0_509 = arith.constant 0 : index
    %c2_510 = arith.constant 2 : index
    %c0_511 = arith.constant 0 : index
    %c0_512 = arith.constant 0 : index
    %681 = vector.load %arg5[%c0_509, %c2_510, %c0_511, %c0_512] : memref<1x4x16x16xf32, #tpu.memory_space<vmem>>, vector<1x1x16x16xf32>
    %682 = vector.shape_cast %681 : vector<1x1x16x16xf32> to vector<16x16xf32>
    %cst_513 = arith.constant dense<0.000000e+00> : vector<16x32xf32>
    %683 = tpu.matmul %682, %625, %cst_513 {dimension_numbers = #tpu.dot_dimension_numbers<[1], [0], [0], [1], [0, 0, 1, 1], [], []>} : vector<16x16xf32>, vector<16x32xf32>, vector<16x32xf32> -> vector<16x32xf32>
    %c3_514 = arith.constant 3 : index
    %c0_515 = arith.constant 0 : index
    %c0_516 = arith.constant 0 : index
    %684 = vector.load %arg13[%c3_514, %c0_515, %c0_516] : memref<4x32x32xf32, #tpu.memory_space<vmem>>, vector<1x32x32xf32>
    %685 = vector.shape_cast %684 : vector<1x32x32xf32> to vector<32x32xf32>
    %cst_517 = arith.constant dense<0.000000e+00> : vector<16x32xf32>
    %686 = tpu.matmul %683, %685, %cst_517 {dimension_numbers = #tpu.dot_dimension_numbers<[1], [0], [0], [1], [0, 0, 1, 1], [], []>} : vector<16x32xf32>, vector<32x32xf32>, vector<16x32xf32> -> vector<16x32xf32>
    %c3_518 = arith.constant 3 : index
    %c0_519 = arith.constant 0 : index
    %c0_520 = arith.constant 0 : index
    %687 = vector.load %arg14[%c3_518, %c0_519, %c0_520] : memref<4x4x32xf32, #tpu.memory_space<vmem>>, vector<1x4x32xf32>
    %688 = vector.shape_cast %687 : vector<1x4x32xf32> to vector<4x32xf32>
    %cst_521 = arith.constant dense<0.000000e+00> : vector<16x32xf32>
    %689 = tpu.matmul %85, %688, %cst_521 {dimension_numbers = #tpu.dot_dimension_numbers<[1], [0], [0], [1], [0, 0, 1, 1], [], []>} : vector<16x4xf32>, vector<4x32xf32>, vector<16x32xf32> -> vector<16x32xf32>
    %690 = arith.addf %686, %689 : vector<16x32xf32>
    %c3_522 = arith.constant 3 : index
    %c0_523 = arith.constant 0 : index
    %c0_524 = arith.constant 0 : index
    %691 = vector.load %arg15[%c3_522, %c0_523, %c0_524] : memref<4x8x32xf32, #tpu.memory_space<vmem>>, vector<1x8x32xf32>
    %692 = vector.shape_cast %691 : vector<1x8x32xf32> to vector<8x32xf32>
    %cst_525 = arith.constant dense<0.000000e+00> : vector<16x32xf32>
    %693 = tpu.matmul %84, %692, %cst_525 {dimension_numbers = #tpu.dot_dimension_numbers<[1], [0], [0], [1], [0, 0, 1, 1], [], []>} : vector<16x8xf32>, vector<8x32xf32>, vector<16x32xf32> -> vector<16x32xf32>
    %694 = arith.addf %690, %693 : vector<16x32xf32>
    %c3_526 = arith.constant 3 : index
    %c0_527 = arith.constant 0 : index
    %c0_528 = arith.constant 0 : index
    %695 = vector.load %arg16[%c3_526, %c0_527, %c0_528] : memref<4x1x32xf32, #tpu.memory_space<vmem>>, vector<1x1x32xf32>
    %696 = vector.shape_cast %695 : vector<1x1x32xf32> to vector<1x32xf32>
    %697 = vector.broadcast %696 : vector<1x32xf32> to vector<16x32xf32>
    %698 = arith.addf %694, %697 : vector<16x32xf32>
    %699 = vector.extract_strided_slice %698 {offsets = [0, 0], sizes = [16, 16], strides = [1, 1]} : vector<16x32xf32> to vector<16x16xf32>
    %700 = vector.extract_strided_slice %698 {offsets = [0, 16], sizes = [16, 16], strides = [1, 1]} : vector<16x32xf32> to vector<16x16xf32>
    %701 = arith.mulf %632, %699 : vector<16x16xf32>
    %cst_529 = arith.constant dense<0.000000e+00> : vector<16x2xf32>
    %702 = tpu.matmul %701, %11, %cst_529 {dimension_numbers = #tpu.dot_dimension_numbers<[1], [0], [0], [1], [0, 0, 1, 1], [], []>} : vector<16x16xf32>, vector<16x2xf32>, vector<16x2xf32> -> vector<16x2xf32>
    %cst_530 = arith.constant 0.353553385 : f32
    %703 = vector.broadcast %cst_530 : f32 to vector<16x2xf32>
    %704 = arith.mulf %702, %703 : vector<16x2xf32>
    %c0_531 = arith.constant 0 : index
    %c3_532 = arith.constant 3 : index
    %c0_533 = arith.constant 0 : index
    %c0_534 = arith.constant 0 : index
    %705 = vector.load %arg5[%c0_531, %c3_532, %c0_533, %c0_534] : memref<1x4x16x16xf32, #tpu.memory_space<vmem>>, vector<1x1x16x16xf32>
    %706 = vector.shape_cast %705 : vector<1x1x16x16xf32> to vector<16x16xf32>
    %cst_535 = arith.constant dense<0.000000e+00> : vector<16x32xf32>
    %707 = tpu.matmul %706, %625, %cst_535 {dimension_numbers = #tpu.dot_dimension_numbers<[1], [0], [0], [1], [0, 0, 1, 1], [], []>} : vector<16x16xf32>, vector<16x32xf32>, vector<16x32xf32> -> vector<16x32xf32>
    %c3_536 = arith.constant 3 : index
    %c0_537 = arith.constant 0 : index
    %c0_538 = arith.constant 0 : index
    %708 = vector.load %arg13[%c3_536, %c0_537, %c0_538] : memref<4x32x32xf32, #tpu.memory_space<vmem>>, vector<1x32x32xf32>
    %709 = vector.shape_cast %708 : vector<1x32x32xf32> to vector<32x32xf32>
    %cst_539 = arith.constant dense<0.000000e+00> : vector<16x32xf32>
    %710 = tpu.matmul %707, %709, %cst_539 {dimension_numbers = #tpu.dot_dimension_numbers<[1], [0], [0], [1], [0, 0, 1, 1], [], []>} : vector<16x32xf32>, vector<32x32xf32>, vector<16x32xf32> -> vector<16x32xf32>
    %c3_540 = arith.constant 3 : index
    %c0_541 = arith.constant 0 : index
    %c0_542 = arith.constant 0 : index
    %711 = vector.load %arg14[%c3_540, %c0_541, %c0_542] : memref<4x4x32xf32, #tpu.memory_space<vmem>>, vector<1x4x32xf32>
    %712 = vector.shape_cast %711 : vector<1x4x32xf32> to vector<4x32xf32>
    %cst_543 = arith.constant dense<0.000000e+00> : vector<16x32xf32>
    %713 = tpu.matmul %105, %712, %cst_543 {dimension_numbers = #tpu.dot_dimension_numbers<[1], [0], [0], [1], [0, 0, 1, 1], [], []>} : vector<16x4xf32>, vector<4x32xf32>, vector<16x32xf32> -> vector<16x32xf32>
    %714 = arith.addf %710, %713 : vector<16x32xf32>
    %c3_544 = arith.constant 3 : index
    %c0_545 = arith.constant 0 : index
    %c0_546 = arith.constant 0 : index
    %715 = vector.load %arg15[%c3_544, %c0_545, %c0_546] : memref<4x8x32xf32, #tpu.memory_space<vmem>>, vector<1x8x32xf32>
    %716 = vector.shape_cast %715 : vector<1x8x32xf32> to vector<8x32xf32>
    %cst_547 = arith.constant dense<0.000000e+00> : vector<16x32xf32>
    %717 = tpu.matmul %104, %716, %cst_547 {dimension_numbers = #tpu.dot_dimension_numbers<[1], [0], [0], [1], [0, 0, 1, 1], [], []>} : vector<16x8xf32>, vector<8x32xf32>, vector<16x32xf32> -> vector<16x32xf32>
    %718 = arith.addf %714, %717 : vector<16x32xf32>
    %c3_548 = arith.constant 3 : index
    %c0_549 = arith.constant 0 : index
    %c0_550 = arith.constant 0 : index
    %719 = vector.load %arg16[%c3_548, %c0_549, %c0_550] : memref<4x1x32xf32, #tpu.memory_space<vmem>>, vector<1x1x32xf32>
    %720 = vector.shape_cast %719 : vector<1x1x32xf32> to vector<1x32xf32>
    %721 = vector.broadcast %720 : vector<1x32xf32> to vector<16x32xf32>
    %722 = arith.addf %718, %721 : vector<16x32xf32>
    %723 = vector.extract_strided_slice %722 {offsets = [0, 0], sizes = [16, 16], strides = [1, 1]} : vector<16x32xf32> to vector<16x16xf32>
    %724 = vector.extract_strided_slice %722 {offsets = [0, 16], sizes = [16, 16], strides = [1, 1]} : vector<16x32xf32> to vector<16x16xf32>
    %725 = arith.mulf %632, %723 : vector<16x16xf32>
    %cst_551 = arith.constant dense<0.000000e+00> : vector<16x2xf32>
    %726 = tpu.matmul %725, %11, %cst_551 {dimension_numbers = #tpu.dot_dimension_numbers<[1], [0], [0], [1], [0, 0, 1, 1], [], []>} : vector<16x16xf32>, vector<16x2xf32>, vector<16x2xf32> -> vector<16x2xf32>
    %cst_552 = arith.constant 0.353553385 : f32
    %727 = vector.broadcast %cst_552 : f32 to vector<16x2xf32>
    %728 = arith.mulf %726, %727 : vector<16x2xf32>
    %729 = arith.maximumf %656, %680 : vector<16x2xf32>
    %730 = arith.maximumf %729, %704 : vector<16x2xf32>
    %731 = arith.maximumf %730, %728 : vector<16x2xf32>
    %732 = arith.subf %656, %731 : vector<16x2xf32>
    %733 = math.exp %732 : vector<16x2xf32>
    %734 = arith.subf %680, %731 : vector<16x2xf32>
    %735 = math.exp %734 : vector<16x2xf32>
    %736 = arith.subf %704, %731 : vector<16x2xf32>
    %737 = math.exp %736 : vector<16x2xf32>
    %738 = arith.subf %728, %731 : vector<16x2xf32>
    %739 = math.exp %738 : vector<16x2xf32>
    %740 = arith.addf %733, %735 : vector<16x2xf32>
    %741 = arith.addf %740, %737 : vector<16x2xf32>
    %742 = arith.addf %741, %739 : vector<16x2xf32>
    %743 = tpu.reciprocal %742 {approx = true} : vector<16x2xf32> -> vector<16x2xf32>
    %cst_553 = arith.constant 0.000000e+00 : f32
    %744 = vector.broadcast %cst_553 : f32 to vector<16x16xf32>
    %745 = arith.mulf %733, %743 : vector<16x2xf32>
    %cst_554 = arith.constant dense<0.000000e+00> : vector<16x16xf32>
    %746 = tpu.matmul %745, %12, %cst_554 {dimension_numbers = #tpu.dot_dimension_numbers<[1], [0], [0], [1], [0, 0, 1, 1], [], []>} : vector<16x2xf32>, vector<2x16xf32>, vector<16x16xf32> -> vector<16x16xf32>
    %747 = arith.mulf %746, %652 : vector<16x16xf32>
    %748 = arith.addf %744, %747 : vector<16x16xf32>
    %749 = arith.mulf %735, %743 : vector<16x2xf32>
    %cst_555 = arith.constant dense<0.000000e+00> : vector<16x16xf32>
    %750 = tpu.matmul %749, %12, %cst_555 {dimension_numbers = #tpu.dot_dimension_numbers<[1], [0], [0], [1], [0, 0, 1, 1], [], []>} : vector<16x2xf32>, vector<2x16xf32>, vector<16x16xf32> -> vector<16x16xf32>
    %751 = arith.mulf %750, %676 : vector<16x16xf32>
    %752 = arith.addf %748, %751 : vector<16x16xf32>
    %753 = arith.mulf %737, %743 : vector<16x2xf32>
    %cst_556 = arith.constant dense<0.000000e+00> : vector<16x16xf32>
    %754 = tpu.matmul %753, %12, %cst_556 {dimension_numbers = #tpu.dot_dimension_numbers<[1], [0], [0], [1], [0, 0, 1, 1], [], []>} : vector<16x2xf32>, vector<2x16xf32>, vector<16x16xf32> -> vector<16x16xf32>
    %755 = arith.mulf %754, %700 : vector<16x16xf32>
    %756 = arith.addf %752, %755 : vector<16x16xf32>
    %757 = arith.mulf %739, %743 : vector<16x2xf32>
    %cst_557 = arith.constant dense<0.000000e+00> : vector<16x16xf32>
    %758 = tpu.matmul %757, %12, %cst_557 {dimension_numbers = #tpu.dot_dimension_numbers<[1], [0], [0], [1], [0, 0, 1, 1], [], []>} : vector<16x2xf32>, vector<2x16xf32>, vector<16x16xf32> -> vector<16x16xf32>
    %759 = arith.mulf %758, %724 : vector<16x16xf32>
    %760 = arith.addf %756, %759 : vector<16x16xf32>
    %c3_558 = arith.constant 3 : index
    %c0_559 = arith.constant 0 : index
    %c0_560 = arith.constant 0 : index
    %761 = vector.load %arg17[%c3_558, %c0_559, %c0_560] : memref<4x16x32xf32, #tpu.memory_space<vmem>>, vector<1x16x32xf32>
    %762 = vector.shape_cast %761 : vector<1x16x32xf32> to vector<16x32xf32>
    %cst_561 = arith.constant dense<0.000000e+00> : vector<16x32xf32>
    %763 = tpu.matmul %760, %762, %cst_561 {dimension_numbers = #tpu.dot_dimension_numbers<[1], [0], [0], [1], [0, 0, 1, 1], [], []>} : vector<16x16xf32>, vector<16x32xf32>, vector<16x32xf32> -> vector<16x32xf32>
    %764 = arith.addf %625, %763 : vector<16x32xf32>
    %c3_562 = arith.constant 3 : index
    %c0_563 = arith.constant 0 : index
    %c0_564 = arith.constant 0 : index
    %765 = vector.load %arg18[%c3_562, %c0_563, %c0_564] : memref<4x1x32xf32, #tpu.memory_space<vmem>>, vector<1x1x32xf32>
    %766 = vector.shape_cast %765 : vector<1x1x32xf32> to vector<1x32xf32>
    %767 = vector.broadcast %766 : vector<1x32xf32> to vector<16x32xf32>
    %768 = arith.addf %764, %767 : vector<16x32xf32>
    %c3_565 = arith.constant 3 : index
    %c0_566 = arith.constant 0 : index
    %c0_567 = arith.constant 0 : index
    %769 = vector.load %arg19[%c3_565, %c0_566, %c0_567] : memref<4x32x32xf32, #tpu.memory_space<vmem>>, vector<1x32x32xf32>
    %770 = vector.shape_cast %769 : vector<1x32x32xf32> to vector<32x32xf32>
    %cst_568 = arith.constant dense<0.000000e+00> : vector<16x32xf32>
    %771 = tpu.matmul %768, %770, %cst_568 {dimension_numbers = #tpu.dot_dimension_numbers<[1], [0], [0], [1], [0, 0, 1, 1], [], []>} : vector<16x32xf32>, vector<32x32xf32>, vector<16x32xf32> -> vector<16x32xf32>
    %c3_569 = arith.constant 3 : index
    %c0_570 = arith.constant 0 : index
    %c0_571 = arith.constant 0 : index
    %772 = vector.load %arg20[%c3_569, %c0_570, %c0_571] : memref<4x1x32xf32, #tpu.memory_space<vmem>>, vector<1x1x32xf32>
    %773 = vector.shape_cast %772 : vector<1x1x32xf32> to vector<1x32xf32>
    %774 = vector.broadcast %773 : vector<1x32xf32> to vector<16x32xf32>
    %775 = arith.addf %771, %774 : vector<16x32xf32>
    %cst_572 = arith.constant 0.000000e+00 : f32
    %776 = vector.broadcast %cst_572 : f32 to vector<16x32xf32>
    %777 = arith.maximumf %775, %776 : vector<16x32xf32>
    %c3_573 = arith.constant 3 : index
    %c0_574 = arith.constant 0 : index
    %c0_575 = arith.constant 0 : index
    %778 = vector.load %arg21[%c3_573, %c0_574, %c0_575] : memref<4x32x32xf32, #tpu.memory_space<vmem>>, vector<1x32x32xf32>
    %779 = vector.shape_cast %778 : vector<1x32x32xf32> to vector<32x32xf32>
    %cst_576 = arith.constant dense<0.000000e+00> : vector<16x32xf32>
    %780 = tpu.matmul %777, %779, %cst_576 {dimension_numbers = #tpu.dot_dimension_numbers<[1], [0], [0], [1], [0, 0, 1, 1], [], []>} : vector<16x32xf32>, vector<32x32xf32>, vector<16x32xf32> -> vector<16x32xf32>
    %c3_577 = arith.constant 3 : index
    %c0_578 = arith.constant 0 : index
    %c0_579 = arith.constant 0 : index
    %781 = vector.load %arg22[%c3_577, %c0_578, %c0_579] : memref<4x1x32xf32, #tpu.memory_space<vmem>>, vector<1x1x32xf32>
    %782 = vector.shape_cast %781 : vector<1x1x32xf32> to vector<1x32xf32>
    %783 = vector.broadcast %782 : vector<1x32xf32> to vector<16x32xf32>
    %784 = arith.addf %780, %783 : vector<16x32xf32>
    %cst_580 = arith.constant 0.000000e+00 : f32
    %785 = vector.broadcast %cst_580 : f32 to vector<16x32xf32>
    %786 = arith.maximumf %784, %785 : vector<16x32xf32>
    %c3_581 = arith.constant 3 : index
    %c0_582 = arith.constant 0 : index
    %c0_583 = arith.constant 0 : index
    %787 = vector.load %arg23[%c3_581, %c0_582, %c0_583] : memref<4x32x32xf32, #tpu.memory_space<vmem>>, vector<1x32x32xf32>
    %788 = vector.shape_cast %787 : vector<1x32x32xf32> to vector<32x32xf32>
    %cst_584 = arith.constant dense<0.000000e+00> : vector<16x32xf32>
    %789 = tpu.matmul %786, %788, %cst_584 {dimension_numbers = #tpu.dot_dimension_numbers<[1], [0], [0], [1], [0, 0, 1, 1], [], []>} : vector<16x32xf32>, vector<32x32xf32>, vector<16x32xf32> -> vector<16x32xf32>
    %c3_585 = arith.constant 3 : index
    %c0_586 = arith.constant 0 : index
    %c0_587 = arith.constant 0 : index
    %790 = vector.load %arg24[%c3_585, %c0_586, %c0_587] : memref<4x1x32xf32, #tpu.memory_space<vmem>>, vector<1x1x32xf32>
    %791 = vector.shape_cast %790 : vector<1x1x32xf32> to vector<1x32xf32>
    %792 = vector.broadcast %791 : vector<1x32xf32> to vector<16x32xf32>
    %793 = arith.addf %789, %792 : vector<16x32xf32>
    %794 = arith.addf %768, %793 : vector<16x32xf32>
    %795 = vector.extract_strided_slice %109 {offsets = [0, 64], sizes = [1, 64], strides = [1, 1]} : vector<1x128xf32> to vector<1x64xf32>
    %796 = vector.extract_strided_slice %795 {offsets = [0, 0], sizes = [1, 32], strides = [1, 1]} : vector<1x64xf32> to vector<1x32xf32>
    %cst_588 = arith.constant 1.000000e+00 : f32
    %797 = vector.broadcast %cst_588 : f32 to vector<1x32xf32>
    %798 = arith.addf %797, %796 : vector<1x32xf32>
    %799 = vector.broadcast %798 : vector<1x32xf32> to vector<16x32xf32>
    %800 = arith.mulf %794, %799 : vector<16x32xf32>
    %801 = vector.extract_strided_slice %795 {offsets = [0, 32], sizes = [1, 32], strides = [1, 1]} : vector<1x64xf32> to vector<1x32xf32>
    %802 = vector.broadcast %801 : vector<1x32xf32> to vector<16x32xf32>
    %803 = arith.addf %800, %802 : vector<16x32xf32>
    %c0_589 = arith.constant 0 : index
    %c0_590 = arith.constant 0 : index
    %804 = vector.load %arg27[%c0_589, %c0_590] : memref<32x8xf32, #tpu.memory_space<vmem>>, vector<32x8xf32>
    %cst_591 = arith.constant dense<0.000000e+00> : vector<16x8xf32>
    %805 = tpu.matmul %803, %804, %cst_591 {dimension_numbers = #tpu.dot_dimension_numbers<[1], [0], [0], [1], [0, 0, 1, 1], [], []>} : vector<16x32xf32>, vector<32x8xf32>, vector<16x8xf32> -> vector<16x8xf32>
    %c0_592 = arith.constant 0 : index
    %c0_593 = arith.constant 0 : index
    %806 = vector.load %arg28[%c0_592, %c0_593] : memref<1x8xf32, #tpu.memory_space<vmem>>, vector<1x8xf32>
    %807 = vector.broadcast %806 : vector<1x8xf32> to vector<16x8xf32>
    %808 = arith.addf %805, %807 : vector<16x8xf32>
    %cst_594 = arith.constant 0.000000e+00 : f32
    %809 = vector.broadcast %cst_594 : f32 to vector<16x1xf32>
    %810 = arith.cmpf ogt, %5, %809 : vector<16x1xf32>
    %811 = math.log %3 : vector<16x8xf32>
    %812 = vector.shape_cast %810 : vector<16x1xi1> to vector<16x1xi1>
    %813 = vector.broadcast %812 : vector<16x1xi1> to vector<16x8xi1>
    %814 = arith.select %813, %811, %808 : vector<16x8xi1>, vector<16x8xf32>
    %c0_595 = arith.constant 0 : index
    %c0_596 = arith.constant 0 : index
    %c0_597 = arith.constant 0 : index
    %815 = vector.load %arg32[%c0_595, %c0_596, %c0_597] : memref<1x16x8xf32, #tpu.memory_space<vmem>>, vector<1x16x8xf32>
    %816 = vector.shape_cast %815 : vector<1x16x8xf32> to vector<16x8xf32>
    %817 = vector.shape_cast %814 : vector<16x8xf32> to vector<1x16x8xf32>
    tpu.vector_store %arg32[%c0_595, %c0_596, %c0_597], %817 {strides = array<i32>} : memref<1x16x8xf32, #tpu.memory_space<vmem>>, vector<1x16x8xf32>,
    return
  }
  func.func @transform_0(%arg0: i32) -> (i32, i32, i32) {
    %c0_i32 = arith.constant 0 : i32
    %c0_i32_0 = arith.constant 0 : i32
    %c0_i32_1 = arith.constant 0 : i32
    return %arg0, %c0_i32, %c0_i32_0 : i32, i32, i32
  }
  func.func @transform_1(%arg0: i32) -> (i32, i32, i32) {
    %c0_i32 = arith.constant 0 : i32
    %c0_i32_0 = arith.constant 0 : i32
    %c0_i32_1 = arith.constant 0 : i32
    return %arg0, %c0_i32, %c0_i32_0 : i32, i32, i32
  }
  func.func @transform_2(%arg0: i32) -> (i32, i32, i32) {
    %c0_i32 = arith.constant 0 : i32
    %c0_i32_0 = arith.constant 0 : i32
    %c0_i32_1 = arith.constant 0 : i32
    return %arg0, %c0_i32, %c0_i32_0 : i32, i32, i32
  }
  func.func @transform_3(%arg0: i32) -> (i32, i32, i32) {
    %c0_i32 = arith.constant 0 : i32
    %c0_i32_0 = arith.constant 0 : i32
    %c0_i32_1 = arith.constant 0 : i32
    return %arg0, %c0_i32, %c0_i32_0 : i32, i32, i32
  }
  func.func @transform_4(%arg0: i32) -> (i32, i32, i32, i32) {
    %c0_i32 = arith.constant 0 : i32
    %c0_i32_0 = arith.constant 0 : i32
    %c0_i32_1 = arith.constant 0 : i32
    %c0_i32_2 = arith.constant 0 : i32
    return %arg0, %c0_i32, %c0_i32_0, %c0_i32_1 : i32, i32, i32, i32
  }
  func.func @transform_5(%arg0: i32) -> (i32, i32, i32) {
    %c0_i32 = arith.constant 0 : i32
    %c0_i32_0 = arith.constant 0 : i32
    %c0_i32_1 = arith.constant 0 : i32
    return %arg0, %c0_i32, %c0_i32_0 : i32, i32, i32
  }
  func.func @transform_6(%arg0: i32) -> (i32, i32) {
    %c0_i32 = arith.constant 0 : i32
    %c0_i32_0 = arith.constant 0 : i32
    %c0_i32_1 = arith.constant 0 : i32
    return %c0_i32, %c0_i32_0 : i32, i32
  }
  func.func @transform_7(%arg0: i32) -> (i32, i32) {
    %c0_i32 = arith.constant 0 : i32
    %c0_i32_0 = arith.constant 0 : i32
    %c0_i32_1 = arith.constant 0 : i32
    return %c0_i32, %c0_i32_0 : i32, i32
  }
  func.func @transform_8(%arg0: i32) -> (i32, i32) {
    %c0_i32 = arith.constant 0 : i32
    %c0_i32_0 = arith.constant 0 : i32
    %c0_i32_1 = arith.constant 0 : i32
    return %c0_i32, %c0_i32_0 : i32, i32
  }
  func.func @transform_9(%arg0: i32) -> (i32, i32) {
    %c0_i32 = arith.constant 0 : i32
    %c0_i32_0 = arith.constant 0 : i32
    %c0_i32_1 = arith.constant 0 : i32
    return %c0_i32, %c0_i32_0 : i32, i32
  }
  func.func @transform_10(%arg0: i32) -> (i32, i32, i32) {
    %c0_i32 = arith.constant 0 : i32
    %c0_i32_0 = arith.constant 0 : i32
    %c0_i32_1 = arith.constant 0 : i32
    %c0_i32_2 = arith.constant 0 : i32
    return %c0_i32, %c0_i32_0, %c0_i32_1 : i32, i32, i32
  }
  func.func @transform_11(%arg0: i32) -> (i32, i32, i32) {
    %c0_i32 = arith.constant 0 : i32
    %c0_i32_0 = arith.constant 0 : i32
    %c0_i32_1 = arith.constant 0 : i32
    %c0_i32_2 = arith.constant 0 : i32
    return %c0_i32, %c0_i32_0, %c0_i32_1 : i32, i32, i32
  }
  func.func @transform_12(%arg0: i32) -> (i32, i32, i32) {
    %c0_i32 = arith.constant 0 : i32
    %c0_i32_0 = arith.constant 0 : i32
    %c0_i32_1 = arith.constant 0 : i32
    %c0_i32_2 = arith.constant 0 : i32
    return %c0_i32, %c0_i32_0, %c0_i32_1 : i32, i32, i32
  }
  func.func @transform_13(%arg0: i32) -> (i32, i32, i32) {
    %c0_i32 = arith.constant 0 : i32
    %c0_i32_0 = arith.constant 0 : i32
    %c0_i32_1 = arith.constant 0 : i32
    %c0_i32_2 = arith.constant 0 : i32
    return %c0_i32, %c0_i32_0, %c0_i32_1 : i32, i32, i32
  }
  func.func @transform_14(%arg0: i32) -> (i32, i32, i32) {
    %c0_i32 = arith.constant 0 : i32
    %c0_i32_0 = arith.constant 0 : i32
    %c0_i32_1 = arith.constant 0 : i32
    %c0_i32_2 = arith.constant 0 : i32
    return %c0_i32, %c0_i32_0, %c0_i32_1 : i32, i32, i32
  }
  func.func @transform_15(%arg0: i32) -> (i32, i32, i32) {
    %c0_i32 = arith.constant 0 : i32
    %c0_i32_0 = arith.constant 0 : i32
    %c0_i32_1 = arith.constant 0 : i32
    %c0_i32_2 = arith.constant 0 : i32
    return %c0_i32, %c0_i32_0, %c0_i32_1 : i32, i32, i32
  }
  func.func @transform_16(%arg0: i32) -> (i32, i32, i32) {
    %c0_i32 = arith.constant 0 : i32
    %c0_i32_0 = arith.constant 0 : i32
    %c0_i32_1 = arith.constant 0 : i32
    %c0_i32_2 = arith.constant 0 : i32
    return %c0_i32, %c0_i32_0, %c0_i32_1 : i32, i32, i32
  }
  func.func @transform_17(%arg0: i32) -> (i32, i32, i32) {
    %c0_i32 = arith.constant 0 : i32
    %c0_i32_0 = arith.constant 0 : i32
    %c0_i32_1 = arith.constant 0 : i32
    %c0_i32_2 = arith.constant 0 : i32
    return %c0_i32, %c0_i32_0, %c0_i32_1 : i32, i32, i32
  }
  func.func @transform_18(%arg0: i32) -> (i32, i32, i32) {
    %c0_i32 = arith.constant 0 : i32
    %c0_i32_0 = arith.constant 0 : i32
    %c0_i32_1 = arith.constant 0 : i32
    %c0_i32_2 = arith.constant 0 : i32
    return %c0_i32, %c0_i32_0, %c0_i32_1 : i32, i32, i32
  }
  func.func @transform_19(%arg0: i32) -> (i32, i32, i32) {
    %c0_i32 = arith.constant 0 : i32
    %c0_i32_0 = arith.constant 0 : i32
    %c0_i32_1 = arith.constant 0 : i32
    %c0_i32_2 = arith.constant 0 : i32
    return %c0_i32, %c0_i32_0, %c0_i32_1 : i32, i32, i32
  }
  func.func @transform_20(%arg0: i32) -> (i32, i32, i32) {
    %c0_i32 = arith.constant 0 : i32
    %c0_i32_0 = arith.constant 0 : i32
    %c0_i32_1 = arith.constant 0 : i32
    %c0_i32_2 = arith.constant 0 : i32
    return %c0_i32, %c0_i32_0, %c0_i32_1 : i32, i32, i32
  }
  func.func @transform_21(%arg0: i32) -> (i32, i32, i32) {
    %c0_i32 = arith.constant 0 : i32
    %c0_i32_0 = arith.constant 0 : i32
    %c0_i32_1 = arith.constant 0 : i32
    %c0_i32_2 = arith.constant 0 : i32
    return %c0_i32, %c0_i32_0, %c0_i32_1 : i32, i32, i32
  }
  func.func @transform_22(%arg0: i32) -> (i32, i32, i32) {
    %c0_i32 = arith.constant 0 : i32
    %c0_i32_0 = arith.constant 0 : i32
    %c0_i32_1 = arith.constant 0 : i32
    %c0_i32_2 = arith.constant 0 : i32
    return %c0_i32, %c0_i32_0, %c0_i32_1 : i32, i32, i32
  }
  func.func @transform_23(%arg0: i32) -> (i32, i32, i32) {
    %c0_i32 = arith.constant 0 : i32
    %c0_i32_0 = arith.constant 0 : i32
    %c0_i32_1 = arith.constant 0 : i32
    %c0_i32_2 = arith.constant 0 : i32
    return %c0_i32, %c0_i32_0, %c0_i32_1 : i32, i32, i32
  }
  func.func @transform_24(%arg0: i32) -> (i32, i32) {
    %c0_i32 = arith.constant 0 : i32
    %c0_i32_0 = arith.constant 0 : i32
    %c0_i32_1 = arith.constant 0 : i32
    return %c0_i32, %c0_i32_0 : i32, i32
  }
  func.func @transform_25(%arg0: i32) -> (i32, i32) {
    %c0_i32 = arith.constant 0 : i32
    %c0_i32_0 = arith.constant 0 : i32
    %c0_i32_1 = arith.constant 0 : i32
    return %c0_i32, %c0_i32_0 : i32, i32
  }
  func.func @transform_26(%arg0: i32) -> (i32, i32) {
    %c0_i32 = arith.constant 0 : i32
    %c0_i32_0 = arith.constant 0 : i32
    %c0_i32_1 = arith.constant 0 : i32
    return %c0_i32, %c0_i32_0 : i32, i32
  }
  func.func @transform_27(%arg0: i32) -> (i32, i32) {
    %c0_i32 = arith.constant 0 : i32
    %c0_i32_0 = arith.constant 0 : i32
    %c0_i32_1 = arith.constant 0 : i32
    return %c0_i32, %c0_i32_0 : i32, i32
  }
  func.func @transform_28(%arg0: i32) -> (i32, i32) {
    %c0_i32 = arith.constant 0 : i32
    %c0_i32_0 = arith.constant 0 : i32
    %c0_i32_1 = arith.constant 0 : i32
    return %c0_i32, %c0_i32_0 : i32, i32
  }
  func.func @transform_29(%arg0: i32) -> (i32, i32) {
    %c0_i32 = arith.constant 0 : i32
    %c0_i32_0 = arith.constant 0 : i32
    %c0_i32_1 = arith.constant 0 : i32
    return %c0_i32, %c0_i32_0 : i32, i32
  }
  func.func @transform_30(%arg0: i32) -> (i32, i32) {
    %c0_i32 = arith.constant 0 : i32
    %c0_i32_0 = arith.constant 0 : i32
    %c0_i32_1 = arith.constant 0 : i32
    return %c0_i32, %c0_i32_0 : i32, i32
  }
  func.func @transform_31(%arg0: i32) -> (i32, i32, i32) {
    %c0_i32 = arith.constant 0 : i32
    %c0_i32_0 = arith.constant 0 : i32
    %c0_i32_1 = arith.constant 0 : i32
    return %arg0, %c0_i32, %c0_i32_0 : i32, i32, i32
  }
}

</mosaic_0001>

<bundles_post_ra>
// kernel: forward.1
= control target key start
LH: loop header
LB: loop body
LE: loop exit
PB: predicated region body
PF: predicated region fallthrough
CT: control target
= control target key end

     0   :  { %s6575_s6 = smov 1   ;;  %s6576_s10 = smov 2   ;;  %s8006_s0 = inlined_call_operand.smem [shape: u32[32], index: -1, kind: input, shape index: {}] }
   0x1   :  { %s6625_s5 = sld [smem:[%s8006_s0]]   ;;  %s6577_s14 = smov 3  }
   0x2   :  { %s6630_s9 = sld [smem:[%s8006_s0 + %s6575_s6]]   ;;  %s6578_s18 = smov 4  }
   0x3   :  { %s6635_s13 = sld [smem:[%s8006_s0 + %s6576_s10]]   ;;  %s6579_s22 = smov 5  }
   0x4   :  { %s6640_s17 = sld [smem:[%s8006_s0 + %s6577_s14]]   ;;  %s6580_s26 = smov 6  }
   0x5   :  { %s6645_s21 = sld [smem:[%s8006_s0 + %s6578_s18]]   ;;  %s6581_s30 = smov 7  }
   0x6   :  { %s6650_s25 = sld [smem:[%s8006_s0 + %s6579_s22]]   ;;  %s6582_s4 = smov 8  }
   0x7   :  { %s6655_s29 = sld [smem:[%s8006_s0 + %s6580_s26]]   ;;  %s6583_s10 = smov 9  }
   0x8   :  { %s6660_s3 = sld [smem:[%s8006_s0 + %s6581_s30]]   ;;  %s6584_s15 = smov 10  }
   0x9   :  { %s6665_s8 = sld [smem:[%s8006_s0 + %s6582_s4]]   ;;  %s6585_s20 = smov 11  }
   0xa   :  { %s6670_s14 = sld [smem:[%s8006_s0 + %s6583_s10]]   ;;  %s6586_s26 = smov 12  }
   0xb   :  { %s6675_s19 = sld [smem:[%s8006_s0 + %s6584_s15]]   ;;  %s6587_s1 = smov 13  }
   0xc   :  { %s6680_s24 = sld [smem:[%s8006_s0 + %s6585_s20]]   ;;  %s6588_s7 = smov 14  }
   0xd   :  { %s6685_s30 = sld [smem:[%s8006_s0 + %s6586_s26]]   ;;  %s6589_s15 = smov 15  }
   0xe   :  { %8020 = sst [smem:[#allocation12_spill]] %s6660_s3  ;;  %s6590_s22 = smov 16  }
   0xf   :  { %8021 = sst [smem:[#allocation13_spill]] %s6665_s8  ;;  %s6591_s28 = smov 17  }
  0x10   :  { %8022 = sst [smem:[#allocation14_spill]] %s6670_s14 }
  0x11   :  { %s6690_s6 = sld [smem:[%s8006_s0 + %s6587_s1]]  }
  0x12   :  { %8023 = sst [smem:[#allocation15_spill]] %s6680_s24 }
  0x13   :  { %8024 = sst [smem:[#allocation16_spill]] %s6685_s30 }
  0x14   :  { %s6695_s12 = sld [smem:[%s8006_s0 + %s6588_s7]]   ;;  %s6592_s7 = smov 18  }
  0x15   :  { %s6700_s20 = sld [smem:[%s8006_s0 + %s6589_s15]]   ;;  %s6593_s15 = smov 19  }
  0x16   :  { %s6705_s27 = sld [smem:[%s8006_s0 + %s6590_s22]]   ;;  %s6594_s22 = smov 20  }
  0x17   :  { %8025 = sst [smem:[#allocation17_spill]] %s6690_s6 }
  0x18   :  { %s6710_s4 = sld [smem:[%s8006_s0 + %s6591_s28]]   ;;  %s6595_s28 = smov 21  }
  0x19   :  { %s6715_s24 = sld [smem:[%s8006_s0 + %s6592_s7]]   ;;  %s6596_s7 = smov 22  }
  0x1a   :  { %8026 = sst [smem:[#allocation18_spill]] %s6695_s12 }
  0x1b   :  { %8027 = sst [smem:[#allocation19_spill]] %s6700_s20 }
  0x1c   :  { %8028 = sst [smem:[#allocation20_spill]] %s6705_s27 }
  0x1d   :  { %s6720_s20 = sld [smem:[%s8006_s0 + %s6593_s15]]   ;;  %s6597_s15 = smov 23  }
  0x1e   :  { %8029 = sst [smem:[#allocation21_spill]] %s6710_s4 }
  0x1f   :  { %8030 = sst [smem:[#allocation22_spill]] %s6715_s24 }
  0x20   :  { %s6725_s27 = sld [smem:[%s8006_s0 + %s6594_s22]]   ;;  %s6598_s22 = smov 24  }
  0x21   :  { %s6730_s4 = sld [smem:[%s8006_s0 + %s6595_s28]]   ;;  %s6599_s28 = smov 25  }
  0x22   :  { %s6735_s12 = sld [smem:[%s8006_s0 + %s6596_s7]]   ;;  %s6600_s7 = smov 26  }
  0x23   :  { %8031 = sst [smem:[#allocation23_spill]] %s6720_s20 }
  0x24   :  { %s6740_s20 = sld [smem:[%s8006_s0 + %s6597_s15]]   ;;  %s6601_s15 = smov 27  }
  0x25   :  { %s6745_s14 = sld [smem:[%s8006_s0 + %s6598_s22]]   ;;  %s6602_s22 = smov 28  }
  0x26   :  { %s6755_s8 = sld [smem:[%s8006_s0 + %s6600_s7]]   ;;  %s6604_s7 = smov 30  }
  0x27   :  { %8032 = sst [smem:[#allocation24_spill]] %s6730_s4 }
  0x28   :  { %s6750_s4 = sld [smem:[%s8006_s0 + %s6599_s28]]   ;;  %s6603_s28 = smov 29  }
  0x29   :  { %s6765_s6 = sld [smem:[%s8006_s0 + %s6602_s22]]  }
  0x2a   :  { %8033 = sst [smem:[#allocation25_spill]] %s6740_s20 }
  0x2b   :  { %s6760_s20 = sld [smem:[%s8006_s0 + %s6601_s15]]   ;;  %s6605_s15 = smov 31  }
  0x2c   :  { %8035 = sst [smem:[#allocation27_spill]] %s6755_s8 }
  0x2d   :  { %s6775_s8 = sld [smem:[%s8006_s0 + %s6604_s7]]  }
  0x2e   :  { %8034 = sst [smem:[#allocation26_spill]] %s6750_s4 }
  0x2f   :  { %s6770_s4 = sld [smem:[%s8006_s0 + %s6603_s28]]  }
  0x31   :  { %8036 = sst [smem:[#allocation28_spill]] %s6760_s20 }
  0x32   :  { %s6780_s20 = sld [smem:[%s8006_s0 + %s6605_s15]]  }
  0x33   :  { %68 = vsyncpa [#allocation3], 0 }
  0x34   :  { %69 = vsyncpa [#allocation5], 0 }
  0x35   :  { %70 = vsyncpa [#allocation8], 0  ;;  %s6782_s22 = smov 0  }
  0x36 LB: > { %s8037_s30 = sld [smem:[#allocation16_spill]]  ;;  %s6788_s23 = sadd.s32 4294967295, %s6573_s22   ;;  %s6573_s22 = sphi %s6782_s22, %s76_s22  }
  0x37   : > { %s8038_s24 = sld [smem:[#allocation22_spill]]  ;;  %p5818_p0 = scmp.ge.s32.totalorder %s6573_s22, 1 }
  0x38   : > { %p788_p1 = scmp.lt.s32.totalorder %s6573_s22, 3  ;;  %p6207_p2 = scmp.eq.s32.totalorder %s6788_s23, 0 }
  0x39   : > { %s6606_s1 = smov [#allocation4]   ;;  %s6607_s10 = smov [#allocation2]  }
  0x3a   : > { %p6794_p3 = pnand %p5818_p0, %p788_p1  ;;  %s848_s2 = sshll.u32 %s6606_s1, 4  ;;  %s849_s2 = int_to_ptr.vmem [resolvable:$true] %s848_s2 }
  0x3b   : > { %s6811_s11 = sshll.u32 %s6607_s10, 4 }
  0x3c   : > { %s817_s28 = sshll.u32 %s8037_s30, 4  ;;  %p6194_p4 = pneg %p6794_p3  ;;  %s6803_s28 = int_to_ptr.hbm [resolvable:$true] %s817_s28 }
  0x3d   : > { %s846_s0 = sshll.u32 %s8038_s24, 4  ;;  %8041 = sst [smem:[#allocation29_spill]] %s6811_s11  ;;  %s6798_s0 = int_to_ptr.hbm [resolvable:$true] %s846_s0 }
  0x3e   : > { %p6807_p5 = pnand %p6207_p2, %p6194_p4  ;;  %s6435_s16 = sshra.s32 %s6798_s0, 4  ;;  %s6436_s16 = int_to_ptr.hbm [resolvable:$true] %s6435_s16 }
  0x3f   : > { %s6437_s18 = scalar_lea.hbm %s6436_s16, 128  ;;  %s6442_s1 = scalar_lea.hbm %s8038_s24, 128 }
  0x40   : > { %p6438_p6 = scmp.ne.s32.totalorder %s6436_s16, %s6437_s18  ;;  %p6439_p7 = pneg %p6807_p5 }
  0x41   : > { %p6443_p10 = scmp.lt.s32.totalorder %s6436_s16, %s8038_s24  ;;  %p6444_p11 = scmp.lt.s32.totalorder %s6442_s1, %s6437_s18 }
  0x42   : > { %p6440_p8 = pnand %p6439_p7, %p6438_p6 }
  0x43   : > { %p6445_p12 = por %p6444_p11, %p6443_p10 }
  0x44   : > { %p6441_p9 = pneg %p6440_p8 }
  0x46   : > { %p6446_p13 = pnand %p6445_p12, %p6441_p9 }
  0x48   : > { %6449 = shalt.err (!%p6446_p13)
}
  0x49   : > { %s6608_s10 = smov 128   ;;  %s6609_s15 = smov 8  }
  0x4a   : > { %6200 = dma.hbm_to_vmem [thread:$0]  (!%p6807_p5), %s6798_s0, 2048, %s849_s2, [#allocation5], %s6608_s10, %s6608_s10, %s6609_s15  }
  0x4b   : > { %s6465_s11 = sshra.s32 %s6803_s28, 4  ;;  %s6472_s18 = scalar_lea.hbm %s8037_s30, 128  ;;  %s6466_s11 = int_to_ptr.hbm [resolvable:$true] %s6465_s11 }
  0x4c   : > { %s6467_s16 = scalar_lea.hbm %s6466_s11, 128  ;;  %p6473_p6 = scmp.lt.s32.totalorder %s6466_s11, %s8037_s30 }
  0x4d   : > { %p6468_p0 = scmp.ne.s32.totalorder %s6466_s11, %s6467_s16  ;;  %p6474_p8 = scmp.lt.s32.totalorder %s6472_s18, %s6467_s16 }
  0x4f   : > { %p6470_p1 = pnand %p6468_p0, %p6439_p7  ;;  %p6475_p9 = por %p6474_p8, %p6473_p6 }
  0x51   : > { %p6471_p4 = pneg %p6470_p1 }
  0x53   : > { %p6476_p10 = pnand %p6475_p9, %p6471_p4 }
  0x55   : > { %6479 = shalt.err (!%p6476_p10)
}
  0x56   : > { %s8042_s0 = sld [smem:[#allocation29_spill]]  ;;  %s8044_s1 = sshll.u32 %s6725_s27, 4  ;;  %s864_s1 = int_to_ptr.hbm [resolvable:$true] %s8044_s1 }
  0x57   : > { %s6610_s11 = smov [#allocation6]   ;;  %s880_s18 = sshll.u32 %s6735_s12, 4  ;;  %s881_s18 = int_to_ptr.hbm [resolvable:$true] %s880_s18 }
  0x58   : > { %s865_s16 = sshll.u32 %s6610_s11, 4  ;;  %s6495_s24 = sshra.s32 %s864_s1, 4  ;;  %s866_s16 = int_to_ptr.vmem [resolvable:$true] %s865_s16  ;;  %s6496_s24 = int_to_ptr.hbm [resolvable:$true] %s6495_s24 }
  0x59   : > { %s6497_s30 = scalar_lea.hbm %s6496_s24, 128  ;;  %p6503_p0 = scmp.lt.s32.totalorder %s6496_s24, %s6725_s27 }
  0x5a   : > { %p6498_p11 = scmp.ne.s32.totalorder %s6496_s24, %s6497_s30 }
  0x5c   : > { %s8043_s2 = int_to_ptr.vmem [resolvable:$true] %s8042_s0  ;;  %p6500_p12 = pnand %p6498_p11, %p6439_p7 }
  0x5d   : > { %6197 = dma.hbm_to_vmem [thread:$0]  (!%p6807_p5), %s6803_s28, 2048, %s8043_s2, [#allocation3], %s6608_s10, %s6608_s10, %s6609_s15  }
  0x5e   : > { %p6501_p13 = pneg %p6500_p12  ;;  %s6502_s0 = scalar_lea.hbm %s6725_s27, 128 }
  0x5f   : > { %p6504_p1 = scmp.lt.s32.totalorder %s6502_s0, %s6497_s30 }
  0x61   : > { %p6505_p4 = por %p6504_p1, %p6503_p0 }
  0x63   : > { %p6506_p6 = pnand %p6505_p4, %p6501_p13 }
  0x65   : > { %6509 = shalt.err (!%p6506_p6)
}
  0x66   : > { %6203 = dma.hbm_to_vmem [thread:$0]  (!%p6807_p5), %s864_s1, 2048, %s866_s16, [#allocation5], %s6608_s10, %s6608_s10, %s6609_s15  }
  0x67   : > { %s6611_s28 = smov [#allocation7]   ;;  %s6525_s11 = sshra.s32 %s881_s18, 4  ;;  %s6526_s11 = int_to_ptr.hbm [resolvable:$true] %s6525_s11 }
  0x68   : > { %s882_s2 = sshll.u32 %s6611_s28, 4  ;;  %s6527_s24 = scalar_lea.hbm %s6526_s11, 128  ;;  %s883_s2 = int_to_ptr.vmem [resolvable:$true] %s882_s2 }
  0x69   : > { %p6528_p8 = scmp.ne.s32.totalorder %s6526_s11, %s6527_s24  ;;  %s6532_s30 = scalar_lea.hbm %s6735_s12, 128 }
  0x6a   : > { %p6533_p11 = scmp.lt.s32.totalorder %s6526_s11, %s6735_s12  ;;  %p6534_p12 = scmp.lt.s32.totalorder %s6532_s30, %s6527_s24 }
  0x6b   : > { %p6530_p9 = pnand %p6528_p8, %p6439_p7 }
  0x6c   : > { %p6535_p13 = por %p6534_p12, %p6533_p11 }
  0x6d   : > { %p6531_p10 = pneg %p6530_p9 }
  0x6f   : > { %p6536_p0 = pnand %p6535_p13, %p6531_p10 }
  0x71   : > { %6539 = shalt.err (!%p6536_p0)
}
  0x72   : > { %6206 = dma.hbm_to_vmem [thread:$0]  (!%p6807_p5), %s881_s18, 2048, %s883_s2, [#allocation8], %s6608_s10, %s6608_s10, %s6609_s15  }
  0x73   : > { %969 = sbr.rel (%p6794_p3) target bundleno = 6678 (0x1a16), region = 144 }
  0x78   : > { %6560 = dma.done.wait (%p6207_p2), [#allocation3], 2048  }
  0x79   : > { %6562 = vsyncadd (%p6207_p2), [#allocation3], 4294965248 }
  0x7a   : > { %6564 = dma.done.wait (%p6207_p2), [#allocation5], 4096  }
  0x7b   : > { %6566 = vsyncadd (%p6207_p2), [#allocation5], 4294963200 }
  0x7c   : > { %6568 = dma.done.wait (%p6207_p2), [#allocation8], 2048  }
  0x7d   : > { %6570 = vsyncadd (%p6207_p2), [#allocation8], 4294965248  ;;  %s8045_s3 = sld [smem:[#allocation12_spill]]  ;;  %p1089_p3 = scmp.lt.s32.totalorder %s6788_s23, 1  ;;  %v6612_v0 = vmov 0   ;;  %vm1138_vm0 = vcmask 64512  }
  0x7e   : > { %6265 = vset.pattern.permute.xlu0 %v6612_v0  ;;  %6267 = vset.pattern.permute.xlu1 %v6612_v0  ;;  %vm1175_vm1 = vcmask 1046528   ;;  %vm1228_vm2 = vcmask 130048   ;;  %v1136_v6 = vld [vmem:[%s6655_s29] sm:$0x7f]  ;;  %v1565_v9 = vld [vmem:[%s6745_s14 + $0x78] sm:$0xff]  ;;  %v1564_v10 = vld [vmem:[%s6745_s14 + $0x70] sm:$0xff] }
  0x7f   : > { %s8061_s23 = smov (!%p1089_p3, %s6788_s23), 1  ;;  %6266 = vset.pattern.permute.xlu2 %v6612_v0  ;;  %v1563_v11 = vld [vmem:[%s6745_s14 + $0x68] sm:$0xff]  ;;  %vm1168_vm3 = vcmask 56320   ;;  %v1562_v14 = vld [vmem:[%s6745_s14 + $0x60] sm:$0xff]  ;;  %v1561_v18 = vld [vmem:[%s6745_s14 + $0x58] sm:$0xff]  ;;  %s8046_s28 = sld [smem:[#allocation17_spill]] }
  0x80   : > { %s6888_s26 = sshll.u32 %s8061_s23, 4  ;;  %s6175_s7 = sshll.u32 %s8061_s23, 6  ;;  %v1560_v19 = vld [vmem:[%s6745_s14 + $0x50] sm:$0xff]  ;;  %v1559_v20 = vld [vmem:[%s6745_s14 + $0x48] sm:$0xff]  ;;  %v1558_v23 = vld [vmem:[%s6745_s14 + $0x40] sm:$0xff]  ;;  %vm1701_vm4 = vcmask 1043456  }
  0x81   : > { %s1108_s15 = scalar_lea.vmem %s6640_s17, %s6888_s26  ;;  %s6895_s10 = scalar_lea.vmem %s6630_s9, %s6888_s26  ;;  %v1557_v24 = vld [vmem:[%s6745_s14 + $0x38] sm:$0xff]  ;;  %v1556_v25 = vld [vmem:[%s6745_s14 + $0x30] sm:$0xff]  ;;  %v1555_v26 = vld [vmem:[%s6745_s14 + $0x28] sm:$0xff]  ;;  %vm1694_vm5 = vcmask 31744   ;;  %vm1262_vm6 = vcmask 39936   ;;  %vm1636_vm7 = vcmask 261120  }
  0x82   : > { %s6898_s1 = scalar_lea.vmem %s6645_s21, %s6175_s7  ;;  %v6901_v2 = vld [vmem:[%s1108_s15 + $0x8] sm:$0xff]  ;;  %s6906_s16 = scalar_lea.vmem %s6635_s13, %s6888_s26  ;;  %v6909_v4 = vld [vmem:[%s1108_s15] sm:$0xff]  ;;  %v1553_v28 = vld [vmem:[%s6745_s14 + $0x18] sm:$0xff] }
  0x83   : > { %v1137_v1 = vld [vmem:[%s8045_s3] sm:$0xff]  ;;  %v1126_v3 = vld [vmem:[%s6895_s10 + $0x8] sm:$0xff]  ;;  %1249 = vmatpush.msra.mxu2 %v6901_v2  ;;  %s1093_s18 = scalar_lea.vmem %s6625_s5, %s6888_s26  ;;  %1333 = vmatpush.msra.mxu3 %v6901_v2  ;;  %v6929_v12 = vld [vmem:[%s6898_s1 + $0x10] sm:$0xff]  ;;  %s5839_s0 = sshll.u32 %s8061_s23, 1 }
  0x84   : > { %6177 = vmatpush.msra.mxu1 %v1137_v1  ;;  %v6912_v5 = vld [vmem:[%s6898_s1] sm:$0xff]  ;;  %1160 = vmatpush.msra.mxu0 %v1137_v1  ;;  %v1128_v8 = vld [vmem:[%s6906_s16 + $0x8] sm:$0xff]  ;;  %v6953_v21 = vld [vmem:[%s6898_s1 + $0x18] sm:$0xff]  ;;  %s1117_s2 = scalar_lea.vmem %s6650_s25, %s5839_s0  ;;  %s8047_s23 = sld [smem:[#allocation13_spill]] }
  0x85   : > { %5843 = vmatmul.msk.f32.vlgmr.msra.gmra.mxu1 %vm1138_vm0, %v1126_v3  ;;  %v1125_v7 = vld [vmem:[%s6895_s10] sm:$0xff]  ;;  %1250 = vmatpush.msra.mxu2 %v6909_v4  ;;  %v6937_v15 = vld [vmem:[%s6898_s1 + $0x8] sm:$0xff]  ;;  %v1552_v29 = vld [vmem:[%s6745_s14 + $0x10] sm:$0xff]  ;;  %s8048_s11 = sld [smem:[#allocation14_spill]]  ;;  %s6613_s15 = smov 112  }
  0x86   : > { %5844 = vmatpush.msk.msrb.mxu1 %vm1175_vm1, %v1136_v6  ;;  %5847 = vmatmul.msk.f32.vlgmr.msra.gmra.mxu2 %vm1228_vm2, %v6912_v5  ;;  %v1123_v13 = vld [vmem:[%s1093_s18] sm:$0xff]  ;;  %v1124_v22 = vld [vmem:[%s1093_s18 + $0x8] sm:$0xff]  ;;  %v6974_v32 = vld [vmem:[%s6898_s1 + $0x30] sm:$0xff]  ;;  %s8049_s24 = sld [smem:[#allocation18_spill]] }
  0x87   : > { %5842 = vmatmul.msk.f32.vlgmr.msra.gmra.mxu0 %vm1138_vm0, %v1125_v7  ;;  %1210 = vperm.xlu0 %6265, %v1128_v8   ;;  %v1127_v16 = vld [vmem:[%s6906_s16] sm:$0xff]  ;;  %v1551_v30 = vld [vmem:[%s6745_s14 + $0x8] sm:$0xff]  ;;  %v1631_v36 = vld [vmem:[%s6675_s19 + $0x18] sm:$0xff]  ;;  %s8050_s30 = sld [smem:[#allocation19_spill]] }
  0x88   : > { %1588 = vmatpush.msrb.mxu2 %v1565_v9  ;;  %1413 = vmatpush.msrb.mxu0 %v6901_v2  ;;  %v6943_v17 = vld [vmem:[%s6898_s1 + $0x20] sm:$0xff]  ;;  %v6971_v31 = vld [vmem:[%s6898_s1 + $0x28] sm:$0xff]  ;;  %v6986_v37 = vld [vmem:[%s6898_s1 + $0x38] sm:$0xff]  ;;  %s8051_s7 = sld [smem:[#allocation15_spill]] }
  0x89   : > { %1493 = vmatpush.msra.mxu1 %v6901_v2  ;;  %1334 = vmatpush.msra.mxu3 %v6909_v4  ;;  %v1554_v27 = vld [vmem:[%s6745_s14 + $0x20] sm:$0xff]  ;;  %v1630_v38 = vld [vmem:[%s6675_s19 + $0x10] sm:$0xff]  ;;  %v1629_v40 = vld [vmem:[%s6675_s19 + $0x8] sm:$0xff]  ;;  %s8052_s18 = sld [smem:[#allocation20_spill]] }
  0x8a   : > { %1589 = vmatpush.msrb.mxu2 %v1564_v10  ;;  %1414 = vmatpush.msrb.mxu0 %v6909_v4  ;;  %v1550_v33 = vld [vmem:[%s6745_s14] sm:$0xff]  ;;  %v1581_v45 = vld [vmem:[%s6745_s14 + $0xf8] sm:$0xff]  ;;  %v1580_v46 = vld [vmem:[%s6745_s14 + $0xf0] sm:$0xff]  ;;  %s8053_s0 = sld [smem:[#allocation21_spill]] }
  0x8b   : > { %5851 = vmatmul.msk.f32.vlgmr.msra.gmra.mxu3 %vm1228_vm2, %v6929_v12  ;;  %1494 = vmatpush.msra.mxu1 %v6909_v4  ;;  %v6981_v34 = vld [vmem:[%s1117_s2] sm:$0x3]  ;;  %v1579_v48 = vld [vmem:[%s6745_s14 + $0xe8] sm:$0xff]  ;;  %v1577_v57 = vld [vmem:[%s6745_s14 + $0xd8] sm:$0xff]  ;;  %s8054_s2 = sld [smem:[#allocation23_spill]] }
  0x8c   : > { %1590 = vmatpush.msrb.mxu2 %v1563_v11  ;;  %v1584_v35 = vperm.slane %v6981_v34, 0  ;;  %1655 = vmatpush.msra.mxu0 %v1631_v36  ;;  %v6992_v39 = vld [vmem:[%s8046_s28] sm:$0xf]  ;;  %v1576_v60 = vld [vmem:[%s6745_s14 + $0xd0] sm:$0xff]  ;;  %v1575_v1 = vld [vmem:[%s6745_s14 + $0xc8] sm:$0xff]  ;;  %s8057_s3 = sld [smem:[#allocation26_spill]] }
  0x8d   : > { %5845 = vmatmul.msk.f32.vlgmr.msrb.gmra.mxu1 %vm1168_vm3, %v1123_v13  ;;  %v1628_v41 = vld [vmem:[%s6675_s19] sm:$0xff]  ;;  %1608 = vmatpush.msrb.mxu3 %v1581_v45  ;;  %v1571_v36 = vld [vmem:[%s6745_s14 + $0xa8] sm:$0xff] }
  0x8e   : > { %1591 = vmatpush.msrb.mxu2 %v1562_v14  ;;  %1656 = vmatpush.msra.mxu0 %v1630_v38  ;;  %v6268_v44 = vld [vmem:[%s8047_s23] ss:$0 sm:$0xff]  ;;  %s8055_s23 = sld [smem:[#allocation24_spill]] }
  0x8f   : > { %5848 = vmatmul.msk.f32.gmra.mxu2 %vm1228_vm2, %v6937_v15  ;;  %5855 = vmatmul.msk.f32.vlgmr.msrb.gmra.mxu0 %vm1228_vm2, %v6943_v17  ;;  %v1578_v51 = vld [vmem:[%s6745_s14 + $0xe0] sm:$0xff] }
  0x90   : > { %1205 = vperm.xlu0 %6265, %v1127_v16   ;;  %1592 = vmatpush.msrb.mxu2 %v1561_v18  ;;  %v6269_v56 = vld [vmem:[%s8048_s11] ss:$0 sm:$0xff]  ;;  %s8056_s11 = sld [smem:[#allocation25_spill]] }
  0x91   : > { %1657 = vmatpush.msra.mxu0 %v1629_v40  ;;  %1609 = vmatpush.msrb.mxu3 %v1580_v46  ;;  %v1570_v40 = vld [vmem:[%s6745_s14 + $0xa0] sm:$0xff]  ;;  %v1567_v46 = vld [vmem:[%s6745_s14 + $0x88] sm:$0xff] }
  0x92   : > { %1593 = vmatpush.msrb.mxu2 %v1560_v19 }
  0x93   : > { %5852 = vmatmul.msk.f32.gmra.mxu3 %vm1228_vm2, %v6953_v21  ;;  %1658 = vmatpush.msra.mxu0 %v1628_v41 }
  0x94   : > { %1594 = vmatpush.msrb.mxu2 %v1559_v20  ;;  %1610 = vmatpush.msrb.mxu3 %v1579_v48  ;;  %v1585_v48 = vperm.slane %v6981_v34, 1 }
  0x95   : > { %5846 = vmatmul.msk.f32.gmra.mxu1 %vm1168_vm3, %v1124_v22 }
  0x96   : > { %1595 = vmatpush.msrb.mxu2 %v1558_v23  ;;  %1611 = vmatpush.msrb.mxu3 %v1578_v51  ;;  %v7094_v51 = vld [vmem:[#allocation2] sm:$0xff] }
  0x97   : > { %5856 = vmatmul.msk.f32.gmra.mxu0 %vm1228_vm2, %v6971_v31 }
  0x98   : > { %1596 = vmatpush.msrb.mxu2 %v1557_v24  ;;  %1612 = vmatpush.msrb.mxu3 %v1577_v57 }
  0x9a   : > { %1597 = vmatpush.msrb.mxu2 %v1556_v25  ;;  %1613 = vmatpush.msrb.mxu3 %v1576_v60  ;;  %v1574_v25 = vld [vmem:[%s6745_s14 + $0xc0] sm:$0xff] }
  0x9c   : > { %1598 = vmatpush.msrb.mxu2 %v1555_v26  ;;  %1614 = vmatpush.msrb.mxu3 %v1575_v1  ;;  %v1573_v26 = vld [vmem:[%s6745_s14 + $0xb8] sm:$0xff] }
  0x9d   : > { %5859 = vmatmul.msk.f32.vlgmr.msra.gmra.mxu1 %vm1228_vm2, %v6974_v32 }
  0x9e   : > { %1599 = vmatpush.msrb.mxu2 %v1554_v27  ;;  %1615 = vmatpush.msrb.mxu3 %v1574_v25 }
  0xa0   : > { %1600 = vmatpush.msrb.mxu2 %v1553_v28  ;;  %1616 = vmatpush.msrb.mxu3 %v1573_v26 }
  0xa2   : > { %1601 = vmatpush.msrb.mxu2 %v1552_v29 }
  0xa4   : > { %1602 = vmatpush.msrb.mxu2 %v1551_v30  ;;  %v1572_v30 = vld [vmem:[%s6745_s14 + $0xb0] sm:$0xff] }
  0xa5   : > { %5860 = vmatmul.msk.f32.gmra.mxu1 %vm1228_vm2, %v6986_v37  ;;  %1617 = vmatpush.msrb.mxu3 %v1572_v30 }
  0xa6   : > { %1603 = vmatpush.msrb.mxu2 %v1550_v33 }
  0xa7   : > { %1604 = vmatmul.f32.vlgmr.msrb.gmra.mxu2 %v1584_v35  ;;  %1618 = vmatpush.msrb.mxu3 %v1571_v36 }
  0xa8   : > { %5865 = vmatpush.msk.msra.mxu2 %vm1701_vm4, %v6992_v39 }
  0xa9   : > { %1619 = vmatpush.msrb.mxu3 %v1570_v40 }
  0xf9   : > { %v1211_v42 = vpop.permute.xlu0 %1210 }
  0xfa   : > { %v1217_v6 = vmul.f32 %v6268_v44, %v1211_v42  ;;  %v1569_v42 = vld [vmem:[%s6745_s14 + $0x98] sm:$0xff] }
  0xfb   : > { %1620 = vmatpush.msrb.mxu3 %v1569_v42 }
 0x102   : > { %v1165_v43 = vpop.f32.mrf.mxu1  ;;  %v1206_v47 = vpop.permute.xlu0 %1205 }
 0x103   : > { %v1216_v50 = vmul.f32 %v6268_v44, %v1206_v47  ;;  %v1568_v44 = vld [vmem:[%s6745_s14 + $0x90] sm:$0xff]  ;;  %v1566_v47 = vld [vmem:[%s6745_s14 + $0x80] sm:$0xff] }
 0x104   : > { %v1162_v49 = vpop.f32.mrf.mxu0  ;;  %1621 = vmatpush.msrb.mxu3 %v1568_v44 }
 0x106   : > { %1622 = vmatpush.msrb.mxu3 %v1567_v46 }
 0x108   : > { %1623 = vmatpush.msrb.mxu3 %v1566_v47 }
 0x109   : > { %v1252_v52 = vpop.f32.mrf.mxu2  ;;  %1624 = vmatmul.f32.vlgmr.msrb.gmra.mxu3 %v1585_v48 }
 0x10a   : > { %v1196_v53 = vpop.f32.mrf.mxu1  ;;  %v7004_v54 = vsub.f32 %v1252_v52, %v6909_v4 }
 0x10b   : > { %v1197_v55 = vadd.f32 %v1196_v53, %v1162_v49  ;;  %v7088_v49 = vld [vmem:[#allocation2 + $0x10] sm:$0xff]  ;;  %v7100_v53 = vld [vmem:[%s8049_s24] sm:$0xff] }
 0x10c   : > { %5866 = vmatmul.msk.f32.vlgmr.msra.gmra.mxu2 %vm1694_vm5, %v7004_v54  ;;  %v1260_v59 = vmul.f32 %v7004_v54, %v7004_v54  ;;  %v7057_v27 = vpop.f32.mrf.mxu0  ;;  %1779 = vmatpush.msrb.mxu0 %v7100_v53 }
 0x10d   : > { %v1218_v58 = vadd.f32 %v1216_v50, %v1197_v55  ;;  %v7091_v50 = vld [vmem:[#allocation2 + $0x8] sm:$0xff] }
 0x10e   : > { %v1263_v62 = vsel %vm1262_vm6, %v1260_v59, 0.0  ;;  %v1336_v63 = vpop.f32.mrf.mxu3 }
 0x10f   : > { %v7013_v61 = vadd.f32 %v6269_v56, %v1218_v58  ;;  %1264 = vadd.xlane.f32.xlu1 %v1263_v62  ;;  %v7018_v3 = vsub.f32 %v1336_v63, %v6909_v4 }
 0x111   : > { %5861 = vmatmul.msk.f32.vlgmr.msra.gmra.mxu0 %vm1636_vm7, %v7013_v61  ;;  %v1344_v9 = vmul.f32 %v7018_v3, %v7018_v3 }
 0x112   : > { %v1199_v7 = vpop.f32.mrf.mxu1  ;;  %v1255_v8 = vpop.f32.mrf.mxu2 }
 0x113   : > { %v1200_v10 = vadd.f32 %v1199_v7, %v1165_v43  ;;  %v7025_v11 = vsub.f32 %v1255_v8, %v6901_v2  ;;  %v1346_v13 = vsel %vm1262_vm6, %v1344_v9, 0.0  ;;  %v7108_v7 = vld [vmem:[%s6765_s6] ss:$0 sm:$0xff] }
 0x114   : > { %1347 = vadd.xlane.f32.xlu2 %v1346_v13 }
 0x115   : > { %v1219_v14 = vadd.f32 %v1217_v6, %v1200_v10  ;;  %5867 = vmatmul.msk.f32.gmra.mxu2 %vm1694_vm5, %v7025_v11  ;;  %v1261_v16 = vmul.f32 %v7025_v11, %v7025_v11 }
 0x116   : > { %v1339_v20 = vpop.f32.mrf.mxu3 }
 0x117   : > { %v7032_v18 = vadd.f32 %v6269_v56, %v1219_v14  ;;  %v1266_v19 = vsel %vm1262_vm6, %v1261_v16, 0.0  ;;  %v7036_v22 = vsub.f32 %v1339_v20, %v6901_v2 }
 0x118   : > { %1267 = vadd.xlane.f32.xlu1 %v1266_v19 }
 0x119   : > { %5862 = vmatmul.msk.f32.gmra.mxu0 %vm1636_vm7, %v7032_v18  ;;  %1680 = vmatpush.msrb.mxu1 %v7032_v18  ;;  %v1345_v23 = vmul.f32 %v7036_v22, %v7036_v22 }
 0x11a   : > { %1842 = vmatpush.msrb.mxu2 %v7032_v18  ;;  %v1496_v28 = vpop.f32.mrf.mxu1 }
 0x11b   : > { %1681 = vmatpush.msrb.mxu1 %v7013_v61  ;;  %v1349_v24 = vsel %vm1262_vm6, %v1345_v23, 0.0 }
 0x11c   : > { %1843 = vmatpush.msrb.mxu2 %v7013_v61  ;;  %5863 = vmatmul.msk.f32.vlgmr.msrb.gmra.mxu1 %vm1228_vm2, %v6912_v5  ;;  %v1419_v5 = vpop.f32.mrf.mxu0 }
 0x11d   : > { %5874 = vmatmul.msk.f32.vlgmr.msrb.gmra.mxu2 %vm1228_vm2, %v6929_v12  ;;  %1350 = vadd.xlane.f32.xlu2 %v1349_v24  ;;  %v7060_v29 = vsub.f32 %v1419_v5, %v6901_v2  ;;  %v7063_v12 = vsub.f32 %v1496_v28, %v6909_v4 }
 0x122   : > { %v1499_v38 = vpop.f32.mrf.mxu1 }
 0x123   : > { %v7075_v41 = vsub.f32 %v1499_v38, %v6901_v2  ;;  %v7085_v2 = vld [vmem:[#allocation2 + $0x18] sm:$0xff] }
 0x124   : > { %5864 = vmatmul.msk.f32.gmra.mxu1 %vm1228_vm2, %v6937_v15  ;;  %v1425_v15 = vmul.f32 %v7060_v29, %v7060_v29  ;;  %1746 = vmatpush.msra.mxu3 %v7085_v2 }
 0x125   : > { %5875 = vmatmul.msk.f32.gmra.mxu2 %vm1228_vm2, %v6953_v21  ;;  %v1504_v21 = vmul.f32 %v7063_v12, %v7063_v12  ;;  %v1505_v43 = vmul.f32 %v7075_v41, %v7075_v41  ;;  %1898 = vmatpush.msra.mxu0 %v7085_v2 }
 0x126   : > { %v1429_v33 = vsel %vm1262_vm6, %v1425_v15, 0.0  ;;  %1747 = vmatpush.msra.mxu3 %v7088_v49 }
 0x127   : > { %v1506_v35 = vsel %vm1262_vm6, %v1504_v21, 0.0  ;;  %1430 = vadd.xlane.f32.xlu1 %v1429_v33  ;;  %v1509_v45 = vsel %vm1262_vm6, %v1505_v43, 0.0  ;;  %1899 = vmatpush.msra.mxu0 %v7088_v49 }
 0x128   : > { %1507 = vadd.xlane.f32.xlu2 %v1506_v35  ;;  %1748 = vmatpush.msra.mxu3 %v7091_v50 }
 0x129   : > { %1900 = vmatpush.msra.mxu0 %v7091_v50 }
 0x12a   : > { %1749 = vmatpush.msra.mxu3 %v7094_v51  ;;  %v7112_v23 = vpop.f32.mrf.mxu2 }
 0x12b   : > { %1901 = vmatpush.msra.mxu0 %v7094_v51 }
 0x12c   : > { %5876 = vmatpush.msk.msrb.mxu3 %vm1701_vm4, %v6992_v39 }
 0x12f   : > { %1510 = vadd.xlane.f32.xlu1 %v1509_v45 }
 0x182   : > { %v1265_v34 = vpop.xlane.xlu1 %1264 }
 0x183   : > { %v1269_v52 = vadd.f32 1e-08, %v1265_v34 }
 0x185   : > { %6296 = vrsqrt.f32 %v1269_v52  ;;  %vm1278_vm8 = vcmp.eq.f32.partialorder %v1269_v52, inf  ;;  %v1281_v10 = vand.u32 2147483648, %v1269_v52  ;;  %vm1280_vm9 = vcmp.eq.f32.partialorder %v1269_v52, 0.0 }
 0x18b   : > { %v1268_v55 = vpop.xlane.xlu1 %1267  ;;  %v6297_v56 = vpop.eup %6296 }
 0x18c   : > { %v1270_v57 = vadd.f32 1e-08, %v1268_v55  ;;  %v1272_v58 = vmul.f32 %v6297_v56, %v1269_v52  ;;  %v7146_v55 = vsub.f32 %v7057_v27, %v6909_v4  ;;  %v1348_v4 = vpop.xlane.xlu2 %1347 }
 0x18e   : > { %6298 = vrsqrt.f32 %v1270_v57  ;;  %v1273_v59 = vmul.f32 %v6297_v56, %v1272_v58  ;;  %vm1290_vm10 = vcmp.eq.f32.partialorder %v1270_v57, inf  ;;  %v1293_v15 = vand.u32 2147483648, %v1270_v57 }
 0x18f   : > { %vm1292_vm11 = vcmp.eq.f32.partialorder %v1270_v57, 0.0  ;;  %v7118_v42 = vpop.f32.mrf.mxu2 }
 0x190   : > { %v1274_v60 = vmul.f32 0.5, %v1273_v59 }
 0x192   : > { %v1275_v62 = vsub.f32 1.5, %v1274_v60 }
 0x194   : > { %v6299_v63 = vpop.eup %6298  ;;  %v1276_v1 = vmul.f32 %v6297_v56, %v1275_v62  ;;  %v1351_v27 = vpop.xlane.xlu2 %1350 }
 0x195   : > { %v1284_v6 = vmul.f32 %v6299_v63, %v1270_v57 }
 0x196   : > { %v1277_v8 = vmul.f32 %v1276_v1, %v1269_v52  ;;  %v7164_v1 = vld [vmem:[%s6770_s4] sm:$0xff] }
 0x197   : > { %v1285_v9 = vmul.f32 %v6299_v63, %v1284_v6 }
 0x198   : > { %v1279_v13 = vsel %vm1278_vm8, %v1269_v52, %v1277_v8  ;;  %v7128_v47 = vpop.f32.mrf.mxu2 }
 0x199   : > { %v1286_v14 = vmul.f32 0.5, %v1285_v9  ;;  %v1683_v16 = vpop.f32.mrf.mxu1  ;;  %v1282_v19 = vsel %vm1280_vm9, %v1281_v10, %v1279_v13  ;;  %v1660_v9 = vpop.f32.mrf.mxu0 }
 0x19a   : > { %5868 = vmatmul.msk.f32.vlgmr.msra.gmra.mxu3 %vm1636_vm7, %v1683_v16  ;;  %v1298_v20 = vsub.f32 %v1282_v19, %v7108_v7 }
 0x19b   : > { %v1287_v24 = vsub.f32 1.5, %v1286_v14  ;;  %1989 = vmatpush.msra.mxu3 %v7032_v18  ;;  %v7176_v14 = vpop.f32.mrf.mxu3 }
 0x19c   : > { %v1300_v25 = vmul.f32 %v1298_v20, %v1298_v20 }
 0x19d   : > { %v1288_v26 = vmul.f32 %v6299_v63, %v1287_v24  ;;  %1990 = vmatpush.msra.mxu3 %v7013_v61  ;;  %v7160_v63 = vld [vmem:[%s6770_s4 + $0x8] sm:$0xff] }
 0x19e   : > { %v1302_v5 = vsub.f32 0.0, %v1300_v25  ;;  %1817 = vmatpush.msra.mxu1 %v7160_v63  ;;  %1964 = vmatpush.msra.mxu2 %v7160_v63 }
 0x19f   : > { %v1289_v28 = vmul.f32 %v1288_v26, %v1270_v57 }
 0x1a0   : > { %v1304_v21 = vmul.f32 0.08, %v1302_v5  ;;  %v1845_v34 = vpop.f32.mrf.mxu2  ;;  %1818 = vmatpush.msra.mxu1 %v7164_v1  ;;  %1965 = vmatpush.msra.mxu2 %v7164_v1 }
 0x1a1   : > { %v1291_v30 = vsel %vm1290_vm10, %v1270_v57, %v1289_v28  ;;  %v1686_v33 = vpop.f32.mrf.mxu1  ;;  %v1353_v57 = vadd.f32 1e-08, %v1351_v27  ;;  %v1663_v26 = vpop.f32.mrf.mxu0 }
 0x1a2   : > { %v1294_v35 = vsel %vm1292_vm11, %v1293_v15, %v1291_v30  ;;  %5869 = vmatmul.msk.f32.gmra.mxu3 %vm1636_vm7, %v1686_v33  ;;  %v1306_v36 = vmul.f32 1.442695, %v1304_v21  ;;  %1930 = vmatpush.msrb.mxu1 %v7100_v53 }
 0x1a3   : > { %v1299_v38 = vsub.f32 %v1294_v35, %v7108_v7  ;;  %2077 = vmatpush.msrb.mxu2 %v7100_v53  ;;  %vm1373_vm14 = vcmp.eq.f32.partialorder %v1353_v57, inf  ;;  %v1376_v21 = vand.u32 2147483648, %v1353_v57  ;;  %vm1375_vm15 = vcmp.eq.f32.partialorder %v1353_v57, 0.0  ;;  %v7181_v35 = vld [vmem:[%s8050_s30] ss:$0 sm:$0xff] }
 0x1a4   : > { %6300 = vpow2.f32 %v1306_v36 }
 0x1a5   : > { %v1301_v40 = vmul.f32 %v1299_v38, %v1299_v38 }
 0x1a7   : > { %v1303_v43 = vsub.f32 0.0, %v1301_v40  ;;  %v6271_v40 = vld [vmem:[%s8051_s7] ss:$0 sm:$0xff] }
 0x1a8   : > { %v1848_v52 = vpop.f32.mrf.mxu2 }
 0x1a9   : > { %v1305_v44 = vmul.f32 0.08, %v1303_v43 }
 0x1aa   : > { %5877 = vmatmul.msk.f32.vlgmr.msrb.gmra.mxu3 %vm1694_vm5, %v7018_v3  ;;  %v7122_v45 = vpop.eup %6300 }
 0x1ab   : > { %v1308_v46 = vmul.f32 1.442695, %v1305_v44  ;;  %5870 = vmatmul.msk.f32.vlgmr.msrb.gmra.mxu0 %vm1138_vm0, %v7122_v45  ;;  %2111 = vmatpush.msrb.mxu3 %v7160_v63 }
 0x1ac   : > { %5887 = vmatpush.msk.msrb.mxu0 %vm1701_vm4, %v6992_v39 }
 0x1ad   : > { %6302 = vpow2.f32 %v1308_v46  ;;  %2112 = vmatpush.msrb.mxu3 %v7164_v1  ;;  %v7184_v46 = vadd.f32 %v6271_v40, %v1660_v9 }
 0x1b2   : > { %5878 = vmatmul.msk.f32.gmra.mxu3 %vm1694_vm5, %v7036_v22 }
 0x1b3   : > { %v7132_v48 = vpop.eup %6302 }
 0x1b4   : > { %5871 = vmatmul.msk.f32.gmra.mxu0 %vm1138_vm0, %v7132_v48 }
 0x1ba   : > { %5885 = vmatmul.msk.f32.vlgmr.msra.gmra.mxu3 %vm1228_vm2, %v6943_v17  ;;  %v1424_v17 = vmul.f32 %v7146_v55, %v7146_v55 }
 0x1bb   : > { %2224 = vmatpush.msra.mxu3 %v7100_v53 }
 0x1bc   : > { %5879 = vmatmul.msk.f32.vlgmr.msra.gmra.mxu0 %vm1636_vm7, %v1845_v34  ;;  %v1426_v56 = vsel %vm1262_vm6, %v1424_v17, 0.0 }
 0x1bd   : > { %2136 = vmatpush.msra.mxu0 %v7032_v18  ;;  %1427 = vadd.xlane.f32.xlu0 %v1426_v56 }
 0x1bf   : > { %2137 = vmatpush.msra.mxu0 %v7013_v61 }
 0x1c2   : > { %5886 = vmatmul.msk.f32.gmra.mxu3 %vm1228_vm2, %v6971_v31  ;;  %v1352_v31 = vadd.f32 1e-08, %v1348_v4 }
 0x1c4   : > { %5880 = vmatmul.msk.f32.gmra.mxu0 %vm1636_vm7, %v1848_v52  ;;  %6304 = vrsqrt.f32 %v1352_v31  ;;  %vm1361_vm12 = vcmp.eq.f32.partialorder %v1352_v31, inf  ;;  %v1364_v20 = vand.u32 2147483648, %v1352_v31  ;;  %vm1363_vm13 = vcmp.eq.f32.partialorder %v1352_v31, 0.0 }
 0x1c5   : > { %6306 = vrsqrt.f32 %v1353_v57 }
 0x1ca   : > { %v6305_v58 = vpop.eup %6304 }
 0x1cb   : > { %v1355_v59 = vmul.f32 %v6305_v58, %v1352_v31  ;;  %v6307_v62 = vpop.eup %6306 }
 0x1cc   : > { %5888 = vmatmul.msk.f32.vlgmr.msrb.gmra.mxu0 %vm1694_vm5, %v7146_v55 }
 0x1cd   : > { %v1356_v60 = vmul.f32 %v6305_v58, %v1355_v59  ;;  %2258 = vmatpush.msrb.mxu0 %v7160_v63  ;;  %v7194_v59 = vadd.f32 %v6271_v40, %v1663_v26 }
 0x1cf   : > { %2259 = vmatpush.msrb.mxu0 %v7164_v1 }
 0x1d4   : > { %5889 = vmatmul.msk.f32.gmra.mxu0 %vm1694_vm5, %v7060_v29 }
 0x1dc   : > { %5896 = vmatmul.msk.f32.vlgmr.msra.gmra.mxu0 %vm1228_vm2, %v6974_v32  ;;  %v1357_v32 = vmul.f32 0.5, %v1356_v60 }
 0x1de   : > { %v1358_v6 = vsub.f32 1.5, %v1357_v32 }
 0x1e0   : > { %v1359_v10 = vmul.f32 %v6305_v58, %v1358_v6 }
 0x1e2   : > { %v1360_v16 = vmul.f32 %v1359_v10, %v1352_v31 }
 0x1e4   : > { %5897 = vmatmul.msk.f32.gmra.mxu0 %vm1228_vm2, %v6986_v37  ;;  %v1367_v37 = vmul.f32 %v6307_v62, %v1353_v57  ;;  %v1362_v24 = vsel %vm1361_vm12, %v1352_v31, %v1360_v16 }
 0x1e5   : > { %v1365_v5 = vsel %vm1363_vm13, %v1364_v20, %v1362_v24  ;;  %v1431_v24 = vpop.xlane.xlu1 %1430  ;;  %vm2316_vm13 = vcmask 1041408  }
 0x1e6   : > { %v1368_v8 = vmul.f32 %v6307_v62, %v1367_v37  ;;  %v1378_v53 = vsub.f32 %v1365_v5, %v7108_v7 }
 0x1e8   : > { %v1369_v13 = vmul.f32 0.5, %v1368_v8  ;;  %v1380_v36 = vmul.f32 %v1378_v53, %v1378_v53 }
 0x1ea   : > { %v1370_v19 = vsub.f32 1.5, %v1369_v13  ;;  %v1382_v52 = vsub.f32 0.0, %v1380_v36 }
 0x1ec   : > { %v1371_v25 = vmul.f32 %v6307_v62, %v1370_v19  ;;  %v1384_v31 = vmul.f32 0.08, %v1382_v52 }
 0x1ee   : > { %v1372_v28 = vmul.f32 %v1371_v25, %v1353_v57  ;;  %v1386_v62 = vmul.f32 1.442695, %v1384_v31  ;;  %v1433_v25 = vadd.f32 1e-08, %v1431_v24 }
 0x1f0   : > { %v1374_v30 = vsel %vm1373_vm14, %v1353_v57, %v1372_v28  ;;  %6308 = vpow2.f32 %v1386_v62  ;;  %vm1453_vm6 = vcmp.eq.f32.partialorder %v1433_v25, inf  ;;  %vm1455_vm8 = vcmp.eq.f32.partialorder %v1433_v25, 0.0 }
 0x1f1   : > { %v1377_v43 = vsel %vm1375_vm15, %v1376_v21, %v1374_v30  ;;  %vm2309_vm14 = vcmask 15360  }
 0x1f2   : > { %v1379_v17 = vsub.f32 %v1377_v43, %v7108_v7 }
 0x1f4   : > { %v1381_v27 = vmul.f32 %v1379_v17, %v1379_v17 }
 0x1f6   : > { %v1383_v32 = vsub.f32 0.0, %v1381_v27  ;;  %v7204_v9 = vpop.eup %6308 }
 0x1f8   : > { %v1385_v6 = vmul.f32 0.08, %v1383_v32 }
 0x1fa   : > { %v1388_v8 = vmul.f32 1.442695, %v1385_v6 }
 0x1fc   : > { %6310 = vpow2.f32 %v1388_v8 }
 0x202   : > { %v7210_v13 = vpop.eup %6310 }
 0x21d   : > { %v1751_v15 = vpop.f32.mrf.mxu3 }
 0x21e   : > { %v1752_v33 = vadd.f32 %v1751_v15, %v7118_v42 }
 0x225   : > { %v1754_v56 = vpop.f32.mrf.mxu3 }
 0x226   : > { %v1755_v42 = vadd.f32 %v1754_v56, %v7128_v47 }
 0x228   : > { %v1781_v38 = vpop.f32.mrf.mxu0 }
 0x229   : > { %v1787_v44 = vadd.f32 %v1781_v38, %v1752_v33 }
 0x22b   : > { %v1793_v34 = vadd.f32 %v7181_v35, %v1787_v44 }
 0x22d   : > { %v1795_v4 = vmul.f32 %v1793_v34, %v7184_v46  ;;  %2345 = vrot.lane.b32.xlu2 %v1793_v34, %s6613_s15  ;;  %v1874_v37 = vpop.f32.mrf.mxu3 }
 0x22f   : > { %5872 = vmatmul.msk.f32.vlgmr.msra.gmra.mxu1 %vm1228_vm2, %v1795_v4 }
 0x230   : > { %2045 = vmatpush.msra.mxu1 %v7085_v2  ;;  %v1428_v20 = vpop.xlane.xlu0 %1427 }
 0x231   : > { %v1784_v57 = vpop.f32.mrf.mxu0 }
 0x232   : > { %v1788_v58 = vadd.f32 %v1784_v57, %v1755_v42  ;;  %2046 = vmatpush.msra.mxu1 %v7088_v49  ;;  %v1456_v57 = vand.u32 2147483648, %v1433_v25 }
 0x234   : > { %v7197_v60 = vadd.f32 %v7181_v35, %v1788_v58  ;;  %2047 = vmatpush.msra.mxu1 %v7091_v50 }
 0x235   : > { %v1877_v10 = vpop.f32.mrf.mxu3 }
 0x236   : > { %v1796_v47 = vmul.f32 %v7197_v60, %v7194_v59  ;;  %2048 = vmatpush.msra.mxu1 %v7094_v51 }
 0x238   : > { %5873 = vmatmul.msk.f32.gmra.mxu1 %vm1228_vm2, %v1796_v47 }
 0x239   : > { %v1903_v31 = vpop.f32.mrf.mxu0 }
 0x23a   : > { %v1904_v62 = vadd.f32 %v1903_v31, %v1874_v37 }
 0x23d   : > { %v1992_v16 = vpop.f32.mrf.mxu3 }
 0x240   : > { %5881 = vmatmul.msk.f32.vlgmr.msrb.gmra.mxu1 %vm1138_vm0, %v7204_v9 }
 0x241   : > { %5898 = vmatpush.msk.msrb.mxu1 %vm1701_vm4, %v6992_v39  ;;  %v1432_v39 = vadd.f32 1e-08, %v1428_v20  ;;  %v1906_v20 = vpop.f32.mrf.mxu0 }
 0x243   : > { %6312 = vrsqrt.f32 %v1432_v39  ;;  %vm1441_vm1 = vcmp.eq.f32.partialorder %v1432_v39, inf  ;;  %v1444_v34 = vand.u32 2147483648, %v1432_v39  ;;  %vm1443_vm3 = vcmp.eq.f32.partialorder %v1432_v39, 0.0 }
 0x244   : > { %6314 = vrsqrt.f32 %v1433_v25 }
 0x245   : > { %v1995_v19 = vpop.f32.mrf.mxu3 }
 0x248   : > { %5882 = vmatmul.msk.f32.gmra.mxu1 %vm1138_vm0, %v7210_v13 }
 0x249   : > { %v6313_v26 = vpop.eup %6312 }
 0x24a   : > { %v1435_v5 = vmul.f32 %v6313_v26, %v1432_v39  ;;  %v6315_v15 = vpop.eup %6314 }
 0x24b   : > { %v1447_v53 = vmul.f32 %v6315_v15, %v1433_v25 }
 0x24c   : > { %v1436_v28 = vmul.f32 %v6313_v26, %v1435_v5 }
 0x24d   : > { %v1448_v30 = vmul.f32 %v6315_v15, %v1447_v53 }
 0x24e   : > { %v1437_v21 = vmul.f32 0.5, %v1436_v28 }
 0x24f   : > { %v1449_v36 = vmul.f32 0.5, %v1448_v30 }
 0x250   : > { %5890 = vmatmul.msk.f32.vlgmr.msra.gmra.mxu1 %vm1636_vm7, %v1992_v16  ;;  %v1438_v33 = vsub.f32 1.5, %v1437_v21 }
 0x251   : > { %v1450_v43 = vsub.f32 1.5, %v1449_v36 }
 0x252   : > { %v1439_v38 = vmul.f32 %v6313_v26, %v1438_v33  ;;  %v1907_v26 = vadd.f32 %v1906_v20, %v1877_v10 }
 0x253   : > { %v1451_v52 = vmul.f32 %v6315_v15, %v1450_v43 }
 0x254   : > { %v1440_v44 = vmul.f32 %v1439_v38, %v1432_v39  ;;  %v1508_v38 = vpop.xlane.xlu2 %1507 }
 0x255   : > { %v1452_v42 = vmul.f32 %v1451_v52, %v1433_v25  ;;  %v1512_v43 = vadd.f32 1e-08, %v1508_v38 }
 0x256   : > { %v1442_v17 = vsel %vm1441_vm1, %v1432_v39, %v1440_v44  ;;  %v1511_v44 = vpop.xlane.xlu1 %1510 }
 0x257   : > { %v1445_v4 = vsel %vm1443_vm3, %v1444_v34, %v1442_v17  ;;  %v1454_v58 = vsel %vm1453_vm6, %v1433_v25, %v1452_v42  ;;  %v1513_v34 = vadd.f32 1e-08, %v1511_v44  ;;  %vm1521_vm9 = vcmp.eq.f32.partialorder %v1512_v43, inf }
 0x258   : > { %5891 = vmatmul.msk.f32.gmra.mxu1 %vm1636_vm7, %v1995_v19  ;;  %v1458_v27 = vsub.f32 %v1445_v4, %v7108_v7  ;;  %v1457_v6 = vsel %vm1455_vm8, %v1456_v57, %v1454_v58  ;;  %vm1523_vm10 = vcmp.eq.f32.partialorder %v1512_v43, 0.0 }
 0x259   : > { %v1459_v19 = vsub.f32 %v1457_v6, %v7108_v7  ;;  %vm1533_vm11 = vcmp.eq.f32.partialorder %v1513_v34, inf  ;;  %vm1535_vm12 = vcmp.eq.f32.partialorder %v1513_v34, 0.0 }
 0x25a   : > { %v1460_v32 = vmul.f32 %v1458_v27, %v1458_v27 }
 0x25b   : > { %v1461_v5 = vmul.f32 %v1459_v19, %v1459_v19 }
 0x25c   : > { %v1462_v39 = vsub.f32 0.0, %v1460_v32 }
 0x25d   : > { %v1463_v21 = vsub.f32 0.0, %v1461_v5 }
 0x25e   : > { %v1464_v25 = vmul.f32 0.08, %v1462_v39 }
 0x260   : > { %5899 = vmatmul.msk.f32.vlgmr.msrb.gmra.mxu1 %vm1694_vm5, %v7063_v12  ;;  %v1466_v53 = vmul.f32 1.442695, %v1464_v25 }
 0x262   : > { %6316 = vpow2.f32 %v1466_v53 }
 0x268   : > { %5900 = vmatmul.msk.f32.gmra.mxu1 %vm1694_vm5, %v7075_v41  ;;  %v7240_v33 = vpop.eup %6316 }
 0x2ac   : > { %v7220_v40 = vpop.f32.mrf.mxu1 }
 0x2b5   : > { %v7222_v56 = vpop.f32.mrf.mxu1 }
 0x2bd   : > { %v1932_v47 = vpop.f32.mrf.mxu1 }
 0x2be   : > { %v1938_v8 = vadd.f32 %v1932_v47, %v1904_v62 }
 0x2c0   : > { %v1940_v16 = vadd.f32 %v7181_v35, %v1938_v8 }
 0x2c2   : > { %v1942_v24 = vmul.f32 %v1940_v16, %v7184_v46  ;;  %2388 = vrot.lane.b32.xlu1 %v1940_v16, %s6613_s15  ;;  %v1524_v16 = vand.u32 2147483648, %v1512_v43 }
 0x2c4   : > { %5883 = vmatmul.msk.f32.vlgmr.msra.gmra.mxu2 %vm1228_vm2, %v1942_v24 }
 0x2c5   : > { %v1935_v37 = vpop.f32.mrf.mxu1  ;;  %2192 = vmatpush.msra.mxu2 %v7085_v2  ;;  %v2021_v2 = vpop.f32.mrf.mxu0 }
 0x2c6   : > { %v1939_v28 = vadd.f32 %v1935_v37, %v1907_v26  ;;  %v1536_v37 = vand.u32 2147483648, %v1513_v34 }
 0x2c7   : > { %2193 = vmatpush.msra.mxu2 %v7088_v49  ;;  %v1465_v49 = vmul.f32 0.08, %v1463_v21 }
 0x2c8   : > { %v1941_v15 = vadd.f32 %v7181_v35, %v1939_v28 }
 0x2c9   : > { %2194 = vmatpush.msra.mxu2 %v7091_v50  ;;  %v1468_v30 = vmul.f32 1.442695, %v1465_v49 }
 0x2ca   : > { %2347 = vrot.lane.b32.xlu1 %v7197_v60, %s6613_s15  ;;  %2390 = vrot.lane.b32.xlu0 %v1941_v15, %s6613_s15  ;;  %v1943_v10 = vmul.f32 %v1941_v15, %v7194_v59 }
 0x2cb   : > { %2195 = vmatpush.msra.mxu2 %v7094_v51  ;;  %6318 = vpow2.f32 %v1468_v30 }
 0x2cc   : > { %5884 = vmatmul.msk.f32.gmra.mxu2 %vm1228_vm2, %v1943_v10  ;;  %6320 = vrsqrt.f32 %v1512_v43 }
 0x2cd   : > { %v2024_v50 = vpop.f32.mrf.mxu0  ;;  %6322 = vrsqrt.f32 %v1513_v34  ;;  %v2050_v5 = vpop.f32.mrf.mxu1 }
 0x2ce   : > { %v2051_v15 = vadd.f32 %v2050_v5, %v2021_v2 }
 0x2d1   : > { %v7244_v60 = vpop.eup %6318 }
 0x2d2   : > { %v6321_v52 = vpop.eup %6320 }
 0x2d3   : > { %v1515_v17 = vmul.f32 %v6321_v52, %v1512_v43  ;;  %v6323_v42 = vpop.eup %6322 }
 0x2d4   : > { %5892 = vmatmul.msk.f32.vlgmr.msrb.gmra.mxu2 %vm1138_vm0, %v7240_v33  ;;  %v1527_v27 = vmul.f32 %v6323_v42, %v1513_v34 }
 0x2d5   : > { %v2139_v36 = vpop.f32.mrf.mxu0  ;;  %v1516_v4 = vmul.f32 %v6321_v52, %v1515_v17  ;;  %v2053_v38 = vpop.f32.mrf.mxu1 }
 0x2d6   : > { %v1528_v58 = vmul.f32 %v6323_v42, %v1527_v27  ;;  %v2054_v44 = vadd.f32 %v2053_v38, %v2024_v50  ;;  %v1827_v38 = vmul.f32 0.35355338, %v7222_v56 }
 0x2d7   : > { %v1517_v31 = vmul.f32 0.5, %v1516_v4 }
 0x2d8   : > { %v1529_v32 = vmul.f32 0.5, %v1528_v58 }
 0x2d9   : > { %v1518_v57 = vsub.f32 1.5, %v1517_v31 }
 0x2da   : > { %v1530_v8 = vsub.f32 1.5, %v1529_v32 }
 0x2db   : > { %v1519_v62 = vmul.f32 %v6321_v52, %v1518_v57 }
 0x2dc   : > { %5893 = vmatmul.msk.f32.gmra.mxu2 %vm1138_vm0, %v7244_v60  ;;  %v1531_v20 = vmul.f32 %v6323_v42, %v1530_v8 }
 0x2dd   : > { %v2142_v51 = vpop.f32.mrf.mxu0  ;;  %v1520_v6 = vmul.f32 %v1519_v62, %v1512_v43  ;;  %v2168_v8 = vpop.f32.mrf.mxu1 }
 0x2de   : > { %v1532_v26 = vmul.f32 %v1531_v20, %v1513_v34 }
 0x2df   : > { %v1522_v19 = vsel %vm1521_vm9, %v1512_v43, %v1520_v6 }
 0x2e0   : > { %v1525_v24 = vsel %vm1523_vm10, %v1524_v16, %v1522_v19  ;;  %v1534_v28 = vsel %vm1533_vm11, %v1513_v34, %v1532_v26 }
 0x2e1   : > { %v1538_v25 = vsub.f32 %v1525_v24, %v7108_v7  ;;  %v1537_v10 = vsel %vm1535_vm12, %v1536_v37, %v1534_v28 }
 0x2e3   : > { %v1540_v53 = vmul.f32 %v1538_v25, %v1538_v25 }
 0x2e4   : > { %5901 = vmatmul.msk.f32.vlgmr.msra.gmra.mxu2 %vm1636_vm7, %v2139_v36 }
 0x2e5   : > { %v1542_v36 = vsub.f32 0.0, %v1540_v53  ;;  %v2171_v25 = vpop.f32.mrf.mxu1 }
 0x2e7   : > { %v1544_v52 = vmul.f32 0.08, %v1542_v36 }
 0x2e9   : > { %v1546_v42 = vmul.f32 1.442695, %v1544_v52 }
 0x2eb   : > { %6324 = vpow2.f32 %v1546_v42 }
 0x2ec   : > { %5902 = vmatmul.msk.f32.gmra.mxu2 %vm1636_vm7, %v2142_v51  ;;  %v1539_v51 = vsub.f32 %v1537_v10, %v7108_v7  ;;  %v1826_v10 = vmul.f32 0.35355338, %v7220_v40 }
 0x2ee   : > { %v1541_v34 = vmul.f32 %v1539_v51, %v1539_v51 }
 0x2f0   : > { %v1543_v31 = vsub.f32 0.0, %v1541_v34 }
 0x2f1   : > { %v7263_v58 = vpop.eup %6324 }
 0x2f2   : > { %v1545_v7 = vmul.f32 0.08, %v1543_v31 }
 0x2f4   : > { %v1548_v57 = vmul.f32 1.442695, %v1545_v7 }
 0x2f6   : > { %6326 = vpow2.f32 %v1548_v57 }
 0x2fc   : > { %v7267_v50 = vpop.eup %6326 }
 0x347   : > { %v7250_v47 = vpop.f32.mrf.mxu2 }
 0x34f   : > { %v7252_v39 = vpop.f32.mrf.mxu2 }
 0x357   : > { %v2079_v21 = vpop.f32.mrf.mxu2 }
 0x358   : > { %v2085_v49 = vadd.f32 %v2079_v21, %v2051_v15 }
 0x35a   : > { %v2087_v30 = vadd.f32 %v7181_v35, %v2085_v49 }
 0x35c   : > { %v2089_v43 = vmul.f32 %v2087_v30, %v7184_v46  ;;  %2431 = vrot.lane.b32.xlu2 %v2087_v30, %s6613_s15  ;;  %v7283_v30 = vld [vmem:[%s6775_s8] sm:$0x3] }
 0x35d   : > { %5910 = vmatpush.msk.msrb.mxu2 %vm2316_vm13, %v7283_v30  ;;  %5907 = vmatpush.msk.msra.mxu1 %vm2316_vm13, %v7283_v30 }
 0x35e   : > { %5894 = vmatmul.msk.f32.vlgmr.msrb.gmra.mxu3 %vm1228_vm2, %v2089_v43  ;;  %5916 = vmatpush.msk.msra.mxu0 %vm2316_vm13, %v7283_v30 }
 0x35f   : > { %v2082_v2 = vpop.f32.mrf.mxu2  ;;  %5913 = vmatpush.msk.msrb.mxu3 %vm2316_vm13, %v7283_v30 }
 0x360   : > { %v2086_v17 = vadd.f32 %v2082_v2, %v2054_v44 }
 0x362   : > { %v2088_v4 = vadd.f32 %v7181_v35, %v2086_v17 }
 0x364   : > { %v2090_v27 = vmul.f32 %v2088_v4, %v7194_v59 }
 0x366   : > { %5895 = vmatmul.msk.f32.gmra.mxu3 %vm1228_vm2, %v2090_v27 }
 0x367   : > { %v2197_v6 = vpop.f32.mrf.mxu2 }
 0x368   : > { %v2198_v16 = vadd.f32 %v2197_v6, %v2168_v8 }
 0x36e   : > { %5903 = vmatmul.msk.f32.vlgmr.msra.gmra.mxu3 %vm1138_vm0, %v7263_v58 }
 0x36f   : > { %v2200_v26 = vpop.f32.mrf.mxu2 }
 0x370   : > { %v2201_v37 = vadd.f32 %v2200_v26, %v2171_v25 }
 0x376   : > { %5904 = vmatmul.msk.f32.gmra.mxu3 %vm1138_vm0, %v7267_v50 }
 0x3e1   : > { %v2114_v62 = vpop.f32.mrf.mxu3 }
 0x3e2   : > { %v2120_v49 = vmul.f32 0.35355338, %v2114_v62 }
 0x3e9   : > { %v2117_v32 = vpop.f32.mrf.mxu3 }
 0x3ea   : > { %v2121_v43 = vmul.f32 0.35355338, %v2117_v32 }
 0x3f1   : > { %v2226_v19 = vpop.f32.mrf.mxu3 }
 0x3f2   : > { %v2232_v20 = vadd.f32 %v2226_v19, %v2198_v16 }
 0x3f4   : > { %v2234_v24 = vadd.f32 %v7181_v35, %v2232_v20 }
 0x3f6   : > { %v2236_v5 = vmul.f32 %v2234_v24, %v7184_v46  ;;  %2474 = vrot.lane.b32.xlu2 %v2234_v24, %s6613_s15  ;;  %v1973_v46 = vmul.f32 0.35355338, %v7250_v47  ;;  %v1974_v47 = vmul.f32 0.35355338, %v7252_v39 }
 0x3f8   : > { %5905 = vmatmul.msk.f32.vlgmr.msrb.gmra.mxu0 %vm1228_vm2, %v2236_v5  ;;  %v2269_v36 = vmax.f32 %v1826_v10, %v1973_v46  ;;  %v2270_v17 = vmax.f32 %v1827_v38, %v1974_v47 }
 0x3f9   : > { %v2229_v28 = vpop.f32.mrf.mxu3 }
 0x3fa   : > { %v2233_v15 = vadd.f32 %v2229_v28, %v2201_v37  ;;  %v2272_v7 = vmax.f32 %v2270_v17, %v2121_v43 }
 0x3fc   : > { %v2235_v53 = vadd.f32 %v7181_v35, %v2233_v15 }
 0x3fe   : > { %2433 = vrot.lane.b32.xlu2 %v2088_v4, %s6613_s15  ;;  %2476 = vrot.lane.b32.xlu1 %v2235_v53, %s6613_s15  ;;  %v2237_v21 = vmul.f32 %v2235_v53, %v7194_v59  ;;  %v2271_v59 = vmax.f32 %v2269_v36, %v2120_v49 }
 0x400   : > { %5906 = vmatmul.msk.f32.gmra.mxu0 %vm1228_vm2, %v2237_v21 }
 0x475   : > { %v2261_v35 = vpop.f32.mrf.mxu0 }
 0x476   : > { %v2267_v40 = vmul.f32 0.35355338, %v2261_v35 }
 0x478   : > { %v2273_v51 = vmax.f32 %v2271_v59, %v2267_v40 }
 0x47a   : > { %v2275_v44 = vsub.f32 %v1826_v10, %v2273_v51  ;;  %v2281_v52 = vsub.f32 %v1973_v46, %v2273_v51  ;;  %v2287_v34 = vsub.f32 %v2120_v49, %v2273_v51  ;;  %v2293_v2 = vsub.f32 %v2267_v40, %v2273_v51 }
 0x47c   : > { %v2277_v4 = vmul.f32 1.442695, %v2275_v44  ;;  %v2283_v42 = vmul.f32 1.442695, %v2281_v52  ;;  %v2289_v31 = vmul.f32 1.442695, %v2287_v34 }
 0x47d   : > { %v2264_v27 = vpop.f32.mrf.mxu0  ;;  %v2295_v62 = vmul.f32 1.442695, %v2293_v2 }
 0x47e   : > { %6328 = vpow2.f32 %v2277_v4  ;;  %v2268_v57 = vmul.f32 0.35355338, %v2264_v27  ;;  %v2485_v4 = vld [vmem:[%s8052_s18 + $0x8] sm:$0xff]  ;;  %v2526_v27 = vld [vmem:[#allocation4 + $0x18] sm:$0xff] }
 0x47f   : > { %6330 = vpow2.f32 %v2283_v42  ;;  %2506 = vmatpush.msrb.mxu1 %v2485_v4  ;;  %v2484_v42 = vld [vmem:[%s8052_s18] sm:$0xff]  ;;  %2549 = vmatpush.msra.mxu2 %v2526_v27 }
 0x480   : > { %v2274_v6 = vmax.f32 %v2272_v7, %v2268_v57  ;;  %6332 = vpow2.f32 %v2289_v31  ;;  %v2346_v31 = vpop.permute.xlu2 %2345 }
 0x481   : > { %6334 = vpow2.f32 %v2295_v62  ;;  %2507 = vmatpush.msrb.mxu1 %v2484_v42 }
 0x482   : > { %v2276_v39 = vsub.f32 %v1827_v38, %v2274_v6  ;;  %v2282_v8 = vsub.f32 %v1974_v47, %v2274_v6  ;;  %v2288_v56 = vsub.f32 %v2121_v43, %v2274_v6  ;;  %v2294_v20 = vsub.f32 %v2268_v57, %v2274_v6  ;;  %v2389_v57 = vpop.permute.xlu1 %2388 }
 0x484   : > { %v6329_v32 = vpop.eup %6328  ;;  %v2285_v16 = vmul.f32 1.442695, %v2282_v8  ;;  %v2279_v24 = vmul.f32 1.442695, %v2276_v39  ;;  %v2291_v25 = vmul.f32 1.442695, %v2288_v56 }
 0x485   : > { %v6331_v19 = vpop.eup %6330  ;;  %v2297_v15 = vmul.f32 1.442695, %v2294_v20 }
 0x486   : > { %v2299_v26 = vadd.f32 %v6331_v19, %v6329_v32  ;;  %v6333_v5 = vpop.eup %6332  ;;  %6336 = vpow2.f32 %v2285_v16 }
 0x487   : > { %v6335_v28 = vpop.eup %6334  ;;  %6338 = vpow2.f32 %v2279_v24 }
 0x488   : > { %v2301_v37 = vadd.f32 %v6333_v5, %v2299_v26  ;;  %6340 = vpow2.f32 %v2291_v25  ;;  %v2432_v7 = vpop.permute.xlu2 %2431 }
 0x48a   : > { %v2303_v53 = vadd.f32 %v6335_v28, %v2301_v37 }
 0x48c   : > { %6342 = vrcp.f32 %v2303_v53  ;;  %v6337_v21 = vpop.eup %6336 }
 0x48d   : > { %6344 = vpow2.f32 %v2297_v15  ;;  %v6339_v46 = vpop.eup %6338 }
 0x48e   : > { %v2300_v10 = vadd.f32 %v6339_v46, %v6337_v21  ;;  %v6341_v49 = vpop.eup %6340 }
 0x490   : > { %v2302_v35 = vadd.f32 %v6341_v49, %v2300_v10 }
 0x492   : > { %v6343_v36 = vpop.eup %6342 }
 0x493   : > { %v6345_v59 = vpop.eup %6344  ;;  %v2441_v40 = vmul.f32 %v6343_v36, %v6335_v28  ;;  %v2307_v47 = vmul.f32 %v6343_v36, %v6329_v32  ;;  %v2355_v51 = vmul.f32 %v6343_v36, %v6331_v19  ;;  %v2398_v38 = vmul.f32 %v6343_v36, %v6333_v5  ;;  %v2475_v32 = vpop.permute.xlu2 %2474 }
 0x494   : > { %v2304_v43 = vadd.f32 %v6345_v59, %v2302_v35  ;;  %v2348_v5 = vpop.permute.xlu1 %2347  ;;  %v2391_v28 = vpop.permute.xlu0 %2390 }
 0x495   : > { %5908 = vmatmul.msk.f32.vlgmr.msra.gmra.mxu1 %vm2309_vm14, %v2307_v47  ;;  %5911 = vmatmul.msk.f32.vlgmr.msrb.gmra.mxu2 %vm2309_vm14, %v2355_v51 }
 0x496   : > { %5914 = vmatmul.msk.f32.vlgmr.msrb.gmra.mxu3 %vm2309_vm14, %v2398_v38  ;;  %5917 = vmatmul.msk.f32.vlgmr.msra.gmra.mxu0 %vm2309_vm14, %v2441_v40  ;;  %6346 = vrcp.f32 %v2304_v43  ;;  %v2525_v38 = vld [vmem:[#allocation4 + $0x10] sm:$0xff]  ;;  %v2524_v43 = vld [vmem:[#allocation4 + $0x8] sm:$0xff] }
 0x497   : > { %2550 = vmatpush.msra.mxu2 %v2525_v38 }
 0x499   : > { %2551 = vmatpush.msra.mxu2 %v2524_v43 }
 0x49b   : > { %v2434_v10 = vpop.permute.xlu2 %2433 }
 0x49c   : > { %v6347_v44 = vpop.eup %6346 }
 0x49d   : > { %v2308_v52 = vmul.f32 %v6347_v44, %v6339_v46  ;;  %v2356_v34 = vmul.f32 %v6347_v44, %v6337_v21  ;;  %v2399_v2 = vmul.f32 %v6347_v44, %v6341_v49  ;;  %v2442_v17 = vmul.f32 %v6347_v44, %v6345_v59  ;;  %v2477_v59 = vpop.permute.xlu1 %2476  ;;  %v2523_v44 = vld [vmem:[#allocation4] sm:$0xff] }
 0x49e   : > { %2552 = vmatpush.msra.mxu2 %v2523_v44 }
 0x49f   : > { %5909 = vmatmul.msk.f32.gmra.mxu1 %vm2309_vm14, %v2308_v52  ;;  %5912 = vmatmul.msk.f32.gmra.mxu2 %vm2309_vm14, %v2356_v34  ;;  %v2565_v52 = vld [vmem:[#allocation6 + $0x18] sm:$0xff]  ;;  %v6273_v34 = vld [vmem:[%s8053_s0] ss:$0 sm:$0xff] }
 0x4a0   : > { %5915 = vmatmul.msk.f32.gmra.mxu3 %vm2309_vm14, %v2399_v2  ;;  %5918 = vmatmul.msk.f32.gmra.mxu0 %vm2309_vm14, %v2442_v17 }
 0x4a1   : > { %2588 = vmatpush.msra.mxu3 %v2565_v52  ;;  %v7349_v52 = vld [vmem:[%s6898_s1] sm:$0xff] }
 0x512   : > { %v2337_v62 = vpop.f32.mrf.mxu1 }
 0x513   : > { %v2351_v39 = vmul.f32 %v2346_v31, %v2337_v62  ;;  %v2466_v16 = vpop.f32.mrf.mxu0  ;;  %v2562_v62 = vld [vmem:[#allocation6] sm:$0xff] }
 0x514   : > { %v2480_v24 = vmul.f32 %v2475_v32, %v2466_v16 }
 0x518   : > { %v2380_v6 = vpop.f32.mrf.mxu2 }
 0x519   : > { %v2394_v8 = vmul.f32 %v2389_v57, %v2380_v6  ;;  %v2423_v56 = vpop.f32.mrf.mxu3  ;;  %v2563_v57 = vld [vmem:[#allocation6 + $0x8] sm:$0xff]  ;;  %v7313_v6 = vld [vmem:[%s8046_s28 + $0x4] sm:$0xf] }
 0x51a   : > { %v2437_v20 = vmul.f32 %v2432_v7, %v2423_v56  ;;  %v2564_v7 = vld [vmem:[#allocation6 + $0x10] sm:$0xff] }
 0x51b   : > { %v2396_v19 = vadd.f32 %v2394_v8, %v2351_v39  ;;  %2589 = vmatpush.msra.mxu3 %v2564_v7  ;;  %v2604_v39 = vld [vmem:[#allocation7 + $0x18] sm:$0xff] }
 0x51c   : > { %v2340_v37 = vpop.f32.mrf.mxu1  ;;  %2627 = vmatpush.msrb.mxu0 %v2604_v39 }
 0x51d   : > { %v2439_v26 = vadd.f32 %v2437_v20, %v2396_v19  ;;  %v2352_v53 = vmul.f32 %v2348_v5, %v2340_v37  ;;  %v2469_v49 = vpop.f32.mrf.mxu0  ;;  %2590 = vmatpush.msra.mxu3 %v2563_v57  ;;  %v2603_v20 = vld [vmem:[#allocation7 + $0x10] sm:$0xff]  ;;  %v5930_v5 = vld [vmem:[%s6675_s19 + $0x38] sm:$0xff] }
 0x51e   : > { %v2481_v40 = vmul.f32 %v2477_v59, %v2469_v49  ;;  %2628 = vmatpush.msrb.mxu0 %v2603_v20  ;;  %2668 = vmatpush.msra.mxu1 %v5930_v5  ;;  %v5928_v49 = vld [vmem:[%s6675_s19 + $0x28] sm:$0xff]  ;;  %v6276_v59 = vld [vmem:[%s8056_s11] ss:$0 sm:$0xff]  ;;  %v7443_v5 = vld [vmem:[%s8050_s30 + $0x1] ss:$0 sm:$0xff] }
 0x51f   : > { %v2482_v25 = vadd.f32 %v2480_v24, %v2439_v26  ;;  %2591 = vmatpush.msra.mxu3 %v2562_v62  ;;  %v2602_v24 = vld [vmem:[#allocation7 + $0x8] sm:$0xff]  ;;  %v2601_v26 = vld [vmem:[#allocation7] sm:$0xff] }
 0x520   : > { %2629 = vmatpush.msrb.mxu0 %v2602_v24  ;;  %v6277_v24 = vld [vmem:[%s8051_s7 + $0x1] ss:$0 sm:$0xff] }
 0x521   : > { %5919 = vmatmul.msk.f32.vlgmr.msrb.gmra.mxu1 %vm1228_vm2, %v2482_v25  ;;  %5937 = vmatpush.msk.msrb.mxu3 %vm1701_vm4, %v7313_v6  ;;  %v6275_v25 = vld [vmem:[%s8055_s23] ss:$0 sm:$0xff] }
 0x522   : > { %v2383_v15 = vpop.f32.mrf.mxu2  ;;  %2630 = vmatpush.msrb.mxu0 %v2601_v26 }
 0x523   : > { %v2395_v21 = vmul.f32 %v2391_v28, %v2383_v15  ;;  %v2426_v46 = vpop.f32.mrf.mxu3 }
 0x524   : > { %v2438_v35 = vmul.f32 %v2434_v10, %v2426_v46  ;;  %v5929_v10 = vld [vmem:[%s6675_s19 + $0x30] sm:$0xff] }
 0x525   : > { %v2397_v36 = vadd.f32 %v2395_v21, %v2352_v53  ;;  %2669 = vmatpush.msra.mxu1 %v5929_v10 }
 0x527   : > { %v2440_v47 = vadd.f32 %v2438_v35, %v2397_v36  ;;  %v5927_v36 = vld [vmem:[%s6675_s19 + $0x20] sm:$0xff]  ;;  %2670 = vmatpush.msra.mxu1 %v5928_v49  ;;  %v7332_v35 = vld [vmem:[%s8049_s24 + $0x8] sm:$0xff] }
 0x529   : > { %v2483_v51 = vadd.f32 %v2481_v40, %v2440_v47  ;;  %2671 = vmatpush.msra.mxu1 %v5927_v36 }
 0x52b   : > { %5920 = vmatmul.msk.f32.gmra.mxu1 %vm1228_vm2, %v2483_v51 }
 0x52c   : > { %2781 = vmatpush.msrb.mxu1 %v7332_v35 }
 0x59e   : > { %v2509_v2 = vpop.f32.mrf.mxu1 }
 0x59f   : > { %v2515_v17 = vadd.f32 %v2509_v2, %v7013_v61  ;;  %v6274_v61 = vld [vmem:[%s8054_s2] ss:$0 sm:$0xff]  ;;  %v7367_v2 = vld [vmem:[%s6898_s1 + $0x8] sm:$0xff] }
 0x5a1   : > { %v2521_v4 = vadd.f32 %v6273_v34, %v2515_v17  ;;  %v7372_v17 = vld [vmem:[%s6898_s1 + $0x18] sm:$0xff] }
 0x5a3   : > { %5921 = vmatmul.msk.f32.vlgmr.msra.gmra.mxu2 %vm1636_vm7, %v2521_v4 }
 0x5a8   : > { %v2512_v42 = vpop.f32.mrf.mxu1 }
 0x5a9   : > { %v2516_v31 = vadd.f32 %v2512_v42, %v7032_v18  ;;  %v7380_v42 = vld [vmem:[#allocation2 + $0x30] sm:$0xff] }
 0x5ab   : > { %v2522_v27 = vadd.f32 %v6273_v34, %v2516_v31  ;;  %v7354_v34 = vld [vmem:[%s6898_s1 + $0x10] sm:$0xff]  ;;  %v7384_v31 = vld [vmem:[#allocation2 + $0x28] sm:$0xff] }
 0x5ad   : > { %5922 = vmatmul.msk.f32.gmra.mxu2 %vm1636_vm7, %v2522_v27 }
 0x626   : > { %v2554_v8 = vpop.f32.mrf.mxu2 }
 0x627   : > { %v2555_v18 = vadd.f32 %v6274_v61, %v2554_v8 }
 0x629   : > { %v2560_v56 = vmax.f32 %v2555_v18, 0.0  ;;  %v7419_v18 = vld [vmem:[%s6898_s1 + $0x20] sm:$0xff] }
 0x62b   : > { %5923 = vmatmul.msk.f32.vlgmr.msra.gmra.mxu3 %vm1636_vm7, %v2560_v56  ;;  %v7424_v56 = vld [vmem:[%s6898_s1 + $0x30] sm:$0xff] }
 0x630   : > { %v2557_v32 = vpop.f32.mrf.mxu2 }
 0x631   : > { %v2558_v16 = vadd.f32 %v6274_v61, %v2557_v32 }
 0x633   : > { %v2561_v19 = vmax.f32 %v2558_v16, 0.0 }
 0x635   : > { %5924 = vmatmul.msk.f32.gmra.mxu3 %vm1636_vm7, %v2561_v19 }
 0x63d   : > { %5938 = vmatmul.msk.f32.vlgmr.msrb.gmra.mxu3 %vm1694_vm5, %v7004_v54 }
 0x645   : > { %5939 = vmatmul.msk.f32.gmra.mxu3 %vm1694_vm5, %v7025_v11 }
 0x6ae   : > { %v2593_v37 = vpop.f32.mrf.mxu3 }
 0x6af   : > { %v2594_v28 = vadd.f32 %v6275_v25, %v2593_v37 }
 0x6b1   : > { %v2599_v15 = vmax.f32 %v2594_v28, 0.0 }
 0x6b3   : > { %5925 = vmatmul.msk.f32.vlgmr.msrb.gmra.mxu0 %vm1636_vm7, %v2599_v15 }
 0x6b8   : > { %v2596_v53 = vpop.f32.mrf.mxu3 }
 0x6b9   : > { %v2597_v21 = vadd.f32 %v6275_v25, %v2596_v53 }
 0x6bb   : > { %v2600_v46 = vmax.f32 %v2597_v21, 0.0 }
 0x6bd   : > { %5926 = vmatmul.msk.f32.gmra.mxu0 %vm1636_vm7, %v2600_v46 }
 0x6c0   : > { %v2729_v7 = vpop.f32.mrf.mxu3 }
 0x6c8   : > { %v2732_v57 = vpop.f32.mrf.mxu3 }
 0x730   : > { %v2632_v40 = vpop.f32.mrf.mxu0 }
 0x731   : > { %v2633_v47 = vadd.f32 %v6276_v59, %v2632_v40 }
 0x733   : > { %v7336_v51 = vadd.f32 %v2633_v47, %v2521_v4  ;;  %v7378_v4 = vld [vmem:[#allocation2 + $0x38] sm:$0xff] }
 0x734   : > { %2753 = vmatpush.msra.mxu0 %v7378_v4 }
 0x735   : > { %5932 = vmatmul.msk.f32.vlgmr.msra.gmra.mxu1 %vm1636_vm7, %v7336_v51 }
 0x736   : > { %2895 = vmatpush.msra.mxu1 %v7378_v4  ;;  %2754 = vmatpush.msra.mxu0 %v7380_v42 }
 0x738   : > { %2896 = vmatpush.msra.mxu1 %v7380_v42  ;;  %2755 = vmatpush.msra.mxu0 %v7384_v31 }
 0x73a   : > { %v2635_v38 = vpop.f32.mrf.mxu0  ;;  %2897 = vmatpush.msra.mxu1 %v7384_v31 }
 0x73b   : > { %v2636_v43 = vadd.f32 %v6276_v59, %v2635_v38 }
 0x73d   : > { %v7340_v44 = vadd.f32 %v2636_v43, %v2522_v27  ;;  %v7388_v27 = vld [vmem:[#allocation2 + $0x20] sm:$0xff] }
 0x73e   : > { %2756 = vmatpush.msra.mxu0 %v7388_v27  ;;  %2898 = vmatpush.msra.mxu1 %v7388_v27 }
 0x73f   : > { %5933 = vmatmul.msk.f32.gmra.mxu1 %vm1636_vm7, %v7340_v44  ;;  %2693 = vmatpush.msrb.mxu2 %v7340_v44 }
 0x740   : > { %2845 = vmatpush.msra.mxu3 %v7340_v44  ;;  %5950 = vmatpush.msk.msrb.mxu0 %vm1701_vm4, %v7313_v6 }
 0x741   : > { %2694 = vmatpush.msrb.mxu2 %v7336_v51 }
 0x742   : > { %2846 = vmatpush.msra.mxu3 %v7336_v51  ;;  %5934 = vmatmul.msk.f32.vlgmr.msrb.gmra.mxu2 %vm1228_vm2, %v7349_v52 }
 0x743   : > { %5948 = vmatmul.msk.f32.vlgmr.msra.gmra.mxu3 %vm1228_vm2, %v7354_v34  ;;  %2820 = vmatpush.msra.mxu2 %v7160_v63 }
 0x744   : > { %2955 = vmatpush.msrb.mxu3 %v7160_v63 }
 0x745   : > { %2821 = vmatpush.msra.mxu2 %v7164_v1 }
 0x746   : > { %2956 = vmatpush.msrb.mxu3 %v7164_v1 }
 0x747   : > { %2921 = vmatpush.msrb.mxu2 %v7332_v35  ;;  %5943 = vmatmul.msk.f32.vlgmr.msrb.gmra.mxu1 %vm1138_vm0, %v7122_v45 }
 0x748   : > { %3056 = vmatpush.msra.mxu3 %v7332_v35  ;;  %5961 = vmatpush.msk.msrb.mxu1 %vm1701_vm4, %v7313_v6 }
 0x74a   : > { %5935 = vmatmul.msk.f32.gmra.mxu2 %vm1228_vm2, %v7367_v2 }
 0x74b   : > { %5949 = vmatmul.msk.f32.gmra.mxu3 %vm1228_vm2, %v7372_v17 }
 0x74f   : > { %5944 = vmatmul.msk.f32.gmra.mxu1 %vm1138_vm0, %v7132_v48 }
 0x7b2   : > { %v2673_v32 = vpop.f32.mrf.mxu1 }
 0x7b3   : > { %v7445_v37 = vadd.f32 %v6277_v24, %v2673_v32 }
 0x7bc   : > { %v2676_v16 = vpop.f32.mrf.mxu1 }
 0x7bd   : > { %v7453_v49 = vadd.f32 %v6277_v24, %v2676_v16 }
 0x7c4   : > { %v2783_v19 = vpop.f32.mrf.mxu1 }
 0x7c5   : > { %v2696_v62 = vpop.f32.mrf.mxu2 }
 0x7c6   : > { %v2848_v61 = vpop.f32.mrf.mxu3  ;;  %5940 = vmatmul.msk.f32.vlgmr.msra.gmra.mxu0 %vm1636_vm7, %v2696_v62 }
 0x7c7   : > { %5953 = vmatmul.msk.f32.vlgmr.msra.gmra.mxu1 %vm1636_vm7, %v2848_v61  ;;  %2980 = vmatpush.msra.mxu0 %v7340_v44 }
 0x7c8   : > { %3115 = vmatpush.msra.mxu1 %v7340_v44 }
 0x7c9   : > { %2981 = vmatpush.msra.mxu0 %v7336_v51 }
 0x7ca   : > { %3116 = vmatpush.msra.mxu1 %v7336_v51 }
 0x7cc   : > { %v2786_v46 = vpop.f32.mrf.mxu1 }
 0x7cd   : > { %v2699_v39 = vpop.f32.mrf.mxu2 }
 0x7ce   : > { %v2851_v8 = vpop.f32.mrf.mxu3  ;;  %5941 = vmatmul.msk.f32.gmra.mxu0 %vm1636_vm7, %v2699_v39 }
 0x7cf   : > { %5954 = vmatmul.msk.f32.gmra.mxu1 %vm1636_vm7, %v2851_v8 }
 0x7d6   : > { %5951 = vmatmul.msk.f32.vlgmr.msrb.gmra.mxu0 %vm1694_vm5, %v7018_v3 }
 0x7d7   : > { %5962 = vmatmul.msk.f32.vlgmr.msrb.gmra.mxu1 %vm1694_vm5, %v7146_v55  ;;  %3090 = vmatpush.msrb.mxu0 %v7160_v63 }
 0x7d8   : > { %3225 = vmatpush.msrb.mxu1 %v7160_v63  ;;  %v7432_v63 = vld [vmem:[%s6898_s1 + $0x28] sm:$0xff] }
 0x7d9   : > { %3091 = vmatpush.msrb.mxu0 %v7164_v1 }
 0x7da   : > { %3226 = vmatpush.msrb.mxu1 %v7164_v1  ;;  %v7437_v1 = vld [vmem:[%s6898_s1 + $0x38] sm:$0xff] }
 0x7de   : > { %5952 = vmatmul.msk.f32.gmra.mxu0 %vm1694_vm5, %v7036_v22 }
 0x7df   : > { %5963 = vmatmul.msk.f32.gmra.mxu1 %vm1694_vm5, %v7060_v29 }
 0x7e6   : > { %5959 = vmatmul.msk.f32.vlgmr.msra.gmra.mxu0 %vm1228_vm2, %v7419_v18 }
 0x7e7   : > { %5970 = vmatmul.msk.f32.vlgmr.msra.gmra.mxu1 %vm1228_vm2, %v7424_v56  ;;  %3191 = vmatpush.msra.mxu0 %v7332_v35 }
 0x7e8   : > { %5990 = vmatpush.msk.msra.mxu1 %vm2316_vm13, %v7283_v30 }
 0x7ee   : > { %5960 = vmatmul.msk.f32.gmra.mxu0 %vm1228_vm2, %v7432_v63 }
 0x7ef   : > { %5971 = vmatmul.msk.f32.gmra.mxu1 %vm1228_vm2, %v7437_v1 }
 0x843   : > { %v2758_v20 = vpop.f32.mrf.mxu0 }
 0x844   : > { %v2759_v26 = vadd.f32 %v2758_v20, %v2729_v7  ;;  %v2900_v7 = vpop.f32.mrf.mxu1 }
 0x846   : > { %v2789_v25 = vadd.f32 %v2783_v19, %v2759_v26 }
 0x848   : > { %v2796_v28 = vadd.f32 %v7443_v5, %v2789_v25 }
 0x84a   : > { %3307 = vrot.lane.b32.xlu2 %v2796_v28, %s6613_s15  ;;  %v2798_v15 = vmul.f32 %v2796_v28, %v7445_v37 }
 0x84b   : > { %v2761_v53 = vpop.f32.mrf.mxu0 }
 0x84c   : > { %v2762_v21 = vadd.f32 %v2761_v53, %v2732_v57  ;;  %5946 = vmatmul.msk.f32.vlgmr.msra.gmra.mxu2 %vm1228_vm2, %v2798_v15  ;;  %v2903_v32 = vpop.f32.mrf.mxu1 }
 0x84d   : > { %3030 = vmatpush.msra.mxu2 %v7378_v4 }
 0x84e   : > { %v2790_v10 = vadd.f32 %v2786_v46, %v2762_v21 }
 0x84f   : > { %3031 = vmatpush.msra.mxu2 %v7380_v42 }
 0x850   : > { %v2797_v36 = vadd.f32 %v7443_v5, %v2790_v10 }
 0x851   : > { %3032 = vmatpush.msra.mxu2 %v7384_v31 }
 0x852   : > { %v2799_v35 = vmul.f32 %v2797_v36, %v7453_v49 }
 0x853   : > { %3033 = vmatpush.msra.mxu2 %v7388_v27  ;;  %v2871_v59 = vpop.f32.mrf.mxu0 }
 0x854   : > { %5947 = vmatmul.msk.f32.gmra.mxu2 %vm1228_vm2, %v2799_v35  ;;  %v2901_v57 = vadd.f32 %v2900_v7, %v2871_v59  ;;  %v3006_v25 = vpop.f32.mrf.mxu1 }
 0x85b   : > { %v2874_v40 = vpop.f32.mrf.mxu0 }
 0x85c   : > { %5955 = vmatmul.msk.f32.vlgmr.msrb.gmra.mxu2 %vm1138_vm0, %v7204_v9  ;;  %v2904_v16 = vadd.f32 %v2903_v32, %v2874_v40 }
 0x85d   : > { %5972 = vmatpush.msk.msrb.mxu2 %vm1701_vm4, %v7313_v6 }
 0x863   : > { %v2983_v47 = vpop.f32.mrf.mxu0 }
 0x864   : > { %5956 = vmatmul.msk.f32.gmra.mxu2 %vm1138_vm0, %v7210_v13 }
 0x86b   : > { %v2986_v38 = vpop.f32.mrf.mxu0 }
 0x86c   : > { %5964 = vmatmul.msk.f32.vlgmr.msra.gmra.mxu2 %vm1636_vm7, %v2983_v47 }
 0x86d   : > { %5981 = vmatpush.msk.msra.mxu2 %vm2316_vm13, %v7283_v30 }
 0x874   : > { %5965 = vmatmul.msk.f32.gmra.mxu2 %vm1636_vm7, %v2986_v38 }
 0x87c   : > { %5973 = vmatmul.msk.f32.vlgmr.msrb.gmra.mxu2 %vm1694_vm5, %v7063_v12 }
 0x884   : > { %5974 = vmatmul.msk.f32.gmra.mxu2 %vm1694_vm5, %v7075_v41 }
 0x8cf   : > { %v7474_v6 = vpop.f32.mrf.mxu2 }
 0x8d7   : > { %v7476_v43 = vpop.f32.mrf.mxu2 }
 0x8df   : > { %v2923_v62 = vpop.f32.mrf.mxu2 }
 0x8e0   : > { %v2929_v61 = vadd.f32 %v2923_v62, %v2901_v57 }
 0x8e2   : > { %v2931_v39 = vadd.f32 %v7443_v5, %v2929_v61 }
 0x8e4   : > { %v2933_v8 = vmul.f32 %v2931_v39, %v7445_v37  ;;  %3350 = vrot.lane.b32.xlu1 %v2931_v39, %s6613_s15 }
 0x8e6   : > { %5957 = vmatmul.msk.f32.vlgmr.msrb.gmra.mxu3 %vm1228_vm2, %v2933_v8 }
 0x8e7   : > { %v2926_v19 = vpop.f32.mrf.mxu2  ;;  %3165 = vmatpush.msrb.mxu3 %v7378_v4  ;;  %v3009_v4 = vpop.f32.mrf.mxu1 }
 0x8e8   : > { %v2930_v20 = vadd.f32 %v2926_v19, %v2904_v16 }
 0x8e9   : > { %3166 = vmatpush.msrb.mxu3 %v7380_v42 }
 0x8ea   : > { %v2932_v24 = vadd.f32 %v7443_v5, %v2930_v20 }
 0x8eb   : > { %3167 = vmatpush.msrb.mxu3 %v7384_v31 }
 0x8ec   : > { %3309 = vrot.lane.b32.xlu1 %v2797_v36, %s6613_s15  ;;  %v2934_v26 = vmul.f32 %v2932_v24, %v7453_v49 }
 0x8ed   : > { %3168 = vmatpush.msrb.mxu3 %v7388_v27 }
 0x8ee   : > { %5958 = vmatmul.msk.f32.gmra.mxu3 %vm1228_vm2, %v2934_v26 }
 0x8ef   : > { %v3118_v42 = vpop.f32.mrf.mxu1  ;;  %v3035_v15 = vpop.f32.mrf.mxu2 }
 0x8f0   : > { %v3036_v53 = vadd.f32 %v3035_v15, %v3006_v25 }
 0x8f6   : > { %5966 = vmatmul.msk.f32.vlgmr.msra.gmra.mxu3 %vm1138_vm0, %v7240_v33 }
 0x8f7   : > { %5984 = vmatpush.msk.msra.mxu3 %vm2316_vm13, %v7283_v30  ;;  %v3121_v31 = vpop.f32.mrf.mxu1  ;;  %v3038_v36 = vpop.f32.mrf.mxu2 }
 0x8f8   : > { %v3039_v59 = vadd.f32 %v3038_v36, %v3009_v4 }
 0x8fe   : > { %5967 = vmatmul.msk.f32.gmra.mxu3 %vm1138_vm0, %v7244_v60 }
 0x8ff   : > { %v3141_v39 = vpop.f32.mrf.mxu2 }
 0x906   : > { %5975 = vmatmul.msk.f32.vlgmr.msrb.gmra.mxu3 %vm1636_vm7, %v3118_v42 }
 0x90e   : > { %5976 = vmatmul.msk.f32.gmra.mxu3 %vm1636_vm7, %v3121_v31 }
 0x969   : > { %v2958_v27 = vpop.f32.mrf.mxu3 }
 0x96a   : > { %v2964_v15 = vmul.f32 0.35355338, %v2958_v27 }
 0x971   : > { %v2961_v28 = vpop.f32.mrf.mxu3 }
 0x979   : > { %v3058_v21 = vpop.f32.mrf.mxu3 }
 0x97a   : > { %v3064_v46 = vadd.f32 %v3058_v21, %v3036_v53 }
 0x97c   : > { %v3066_v10 = vadd.f32 %v7443_v5, %v3064_v46 }
 0x97e   : > { %v3068_v35 = vmul.f32 %v3066_v10, %v7445_v37  ;;  %3393 = vrot.lane.b32.xlu0 %v3066_v10, %s6613_s15 }
 0x980   : > { %5968 = vmatmul.msk.f32.vlgmr.msrb.gmra.mxu0 %vm1228_vm2, %v3068_v35  ;;  %v2965_v35 = vmul.f32 0.35355338, %v2961_v28 }
 0x981   : > { %v3061_v40 = vpop.f32.mrf.mxu3  ;;  %5987 = vmatpush.msk.msrb.mxu0 %vm2316_vm13, %v7283_v30 }
 0x982   : > { %v3065_v47 = vadd.f32 %v3061_v40, %v3039_v59 }
 0x984   : > { %v3067_v38 = vadd.f32 %v7443_v5, %v3065_v47 }
 0x986   : > { %v3069_v7 = vmul.f32 %v3067_v38, %v7453_v49  ;;  %3352 = vrot.lane.b32.xlu0 %v2932_v24, %s6613_s15  ;;  %v3144_v24 = vpop.f32.mrf.mxu2 }
 0x988   : > { %5969 = vmatmul.msk.f32.gmra.mxu0 %vm1228_vm2, %v3069_v7 }
 0x989   : > { %v3170_v61 = vpop.f32.mrf.mxu3 }
 0x98a   : > { %v3171_v30 = vadd.f32 %v3170_v61, %v3141_v39 }
 0x990   : > { %5977 = vmatmul.msk.f32.vlgmr.msra.gmra.mxu0 %vm1138_vm0, %v7263_v58 }
 0x991   : > { %v3173_v19 = vpop.f32.mrf.mxu3 }
 0x992   : > { %v3174_v26 = vadd.f32 %v3173_v19, %v3144_v24 }
 0x998   : > { %5978 = vmatmul.msk.f32.gmra.mxu0 %vm1138_vm0, %v7267_v50 }
 0x9fd   : > { %v3093_v57 = vpop.f32.mrf.mxu0 }
 0x9fe   : > { %v3099_v53 = vmul.f32 0.35355338, %v3093_v57 }
 0xa05   : > { %v3096_v62 = vpop.f32.mrf.mxu0 }
 0xa06   : > { %v3100_v40 = vmul.f32 0.35355338, %v3096_v62 }
 0xa0d   : > { %v3193_v8 = vpop.f32.mrf.mxu0 }
 0xa0e   : > { %v3199_v32 = vadd.f32 %v3193_v8, %v3171_v30 }
 0xa10   : > { %v3201_v16 = vadd.f32 %v7443_v5, %v3199_v32 }
 0xa12   : > { %v3203_v20 = vmul.f32 %v3201_v16, %v7445_v37  ;;  %3436 = vrot.lane.b32.xlu2 %v3201_v16, %s6613_s15  ;;  %v2829_v37 = vmul.f32 0.35355338, %v7474_v6 }
 0xa14   : > { %5979 = vmatmul.msk.f32.vlgmr.msrb.gmra.mxu1 %vm1228_vm2, %v3203_v20  ;;  %v3236_v21 = vmax.f32 %v2829_v37, %v2964_v15 }
 0xa15   : > { %v3196_v25 = vpop.f32.mrf.mxu0 }
 0xa16   : > { %v3200_v4 = vadd.f32 %v3196_v25, %v3174_v26  ;;  %v3238_v10 = vmax.f32 %v3236_v21, %v3099_v53 }
 0xa18   : > { %v3202_v42 = vadd.f32 %v7443_v5, %v3200_v4  ;;  %v2830_v5 = vmul.f32 0.35355338, %v7476_v43 }
 0xa1a   : > { %v3204_v31 = vmul.f32 %v3202_v42, %v7453_v49  ;;  %3395 = vrot.lane.b32.xlu2 %v3067_v38, %s6613_s15  ;;  %3438 = vrot.lane.b32.xlu1 %v3202_v42, %s6613_s15  ;;  %v3237_v61 = vmax.f32 %v2830_v5, %v2965_v35 }
 0xa1c   : > { %5980 = vmatmul.msk.f32.gmra.mxu1 %vm1228_vm2, %v3204_v31  ;;  %v3239_v6 = vmax.f32 %v3237_v61, %v3100_v40 }
 0xa91   : > { %v3228_v46 = vpop.f32.mrf.mxu1 }
 0xa92   : > { %v3234_v36 = vmul.f32 0.35355338, %v3228_v46 }
 0xa94   : > { %v3240_v59 = vmax.f32 %v3238_v10, %v3234_v36 }
 0xa96   : > { %v3242_v49 = vsub.f32 %v2829_v37, %v3240_v59  ;;  %v3248_v47 = vsub.f32 %v2964_v15, %v3240_v59  ;;  %v3254_v38 = vsub.f32 %v3099_v53, %v3240_v59  ;;  %v3260_v7 = vsub.f32 %v3234_v36, %v3240_v59 }
 0xa98   : > { %v3244_v39 = vmul.f32 1.442695, %v3242_v49  ;;  %v3250_v30 = vmul.f32 1.442695, %v3248_v47  ;;  %v3256_v27 = vmul.f32 1.442695, %v3254_v38 }
 0xa99   : > { %v3231_v8 = vpop.f32.mrf.mxu1  ;;  %v3262_v32 = vmul.f32 1.442695, %v3260_v7 }
 0xa9a   : > { %6348 = vpow2.f32 %v3244_v39  ;;  %v3235_v57 = vmul.f32 0.35355338, %v3231_v8 }
 0xa9b   : > { %6350 = vpow2.f32 %v3250_v30 }
 0xa9c   : > { %v3241_v16 = vmax.f32 %v3239_v6, %v3235_v57  ;;  %6352 = vpow2.f32 %v3256_v27 }
 0xa9d   : > { %6354 = vpow2.f32 %v3262_v32  ;;  %v5993_v32 = vld [vmem:[%s8052_s18 + $0x10] sm:$0xff] }
 0xa9e   : > { %v3243_v28 = vsub.f32 %v2830_v5, %v3241_v16  ;;  %v3249_v19 = vsub.f32 %v2965_v35, %v3241_v16  ;;  %v3255_v43 = vsub.f32 %v3100_v40, %v3241_v16  ;;  %v3261_v62 = vsub.f32 %v3235_v57, %v3241_v16  ;;  %v5994_v57 = vld [vmem:[%s8052_s18 + $0x18] sm:$0xff] }
 0xa9f   : > { %3469 = vmatpush.msrb.mxu2 %v5994_v57  ;;  %v3491_v16 = vld [vmem:[#allocation4 + $0x38] sm:$0xff]  ;;  %v3488_v57 = vld [vmem:[#allocation4 + $0x20] sm:$0xff] }
 0xaa0   : > { %v6349_v20 = vpop.eup %6348  ;;  %v3246_v24 = vmul.f32 1.442695, %v3243_v28  ;;  %v3252_v26 = vmul.f32 1.442695, %v3249_v19  ;;  %v3258_v4 = vmul.f32 1.442695, %v3255_v43  ;;  %3515 = vmatpush.msrb.mxu3 %v3491_v16  ;;  %v3308_v28 = vpop.permute.xlu2 %3307 }
 0xaa1   : > { %v6351_v25 = vpop.eup %6350  ;;  %v3264_v15 = vmul.f32 1.442695, %v3261_v62  ;;  %3470 = vmatpush.msrb.mxu2 %v5993_v32  ;;  %v3351_v19 = vpop.permute.xlu1 %3350  ;;  %v3532_v32 = vld [vmem:[#allocation6 + $0x38] sm:$0xff]  ;;  %v6279_v16 = vld [vmem:[%s8053_s0 + $0x1] ss:$0 sm:$0xff] }
 0xaa2   : > { %v3266_v42 = vadd.f32 %v6351_v25, %v6349_v20  ;;  %6356 = vpow2.f32 %v3246_v24  ;;  %v6353_v31 = vpop.eup %6352  ;;  %v3394_v43 = vpop.permute.xlu0 %3393  ;;  %3556 = vmatpush.msra.mxu0 %v3532_v32 }
 0xaa3   : > { %6358 = vpow2.f32 %v3252_v26  ;;  %v6355_v53 = vpop.eup %6354 }
 0xaa4   : > { %v3268_v37 = vadd.f32 %v6353_v31, %v3266_v42  ;;  %6360 = vpow2.f32 %v3258_v4 }
 0xaa5   : > { %6362 = vpow2.f32 %v3264_v15 }
 0xaa6   : > { %v3270_v21 = vadd.f32 %v6355_v53, %v3268_v37 }
 0xaa8   : > { %v6357_v46 = vpop.eup %6356  ;;  %6364 = vrcp.f32 %v3270_v21 }
 0xaa9   : > { %v6359_v10 = vpop.eup %6358  ;;  %v3310_v37 = vpop.permute.xlu1 %3309 }
 0xaaa   : > { %v3267_v36 = vadd.f32 %v6359_v10, %v6357_v46  ;;  %v6361_v35 = vpop.eup %6360 }
 0xaab   : > { %v6363_v5 = vpop.eup %6362 }
 0xaac   : > { %v3269_v59 = vadd.f32 %v6361_v35, %v3267_v36 }
 0xaae   : > { %v6365_v40 = vpop.eup %6364  ;;  %v3271_v49 = vadd.f32 %v6363_v5, %v3269_v59 }
 0xaaf   : > { %v3403_v47 = vmul.f32 %v6365_v40, %v6355_v53  ;;  %v3274_v38 = vmul.f32 %v6365_v40, %v6349_v20  ;;  %v3317_v7 = vmul.f32 %v6365_v40, %v6351_v25  ;;  %v3360_v61 = vmul.f32 %v6365_v40, %v6353_v31  ;;  %v3437_v20 = vpop.permute.xlu2 %3436 }
 0xab0   : > { %6366 = vrcp.f32 %v3271_v49 }
 0xab1   : > { %5982 = vmatmul.msk.f32.vlgmr.msra.gmra.mxu2 %vm2309_vm14, %v3274_v38  ;;  %5985 = vmatmul.msk.f32.vlgmr.msra.gmra.mxu3 %vm2309_vm14, %v3317_v7 }
 0xab2   : > { %5988 = vmatmul.msk.f32.vlgmr.msrb.gmra.mxu0 %vm2309_vm14, %v3360_v61  ;;  %5991 = vmatmul.msk.f32.vlgmr.msra.gmra.mxu1 %vm2309_vm14, %v3403_v47  ;;  %v3439_v61 = vpop.permute.xlu1 %3438 }
 0xab6   : > { %v6367_v39 = vpop.eup %6366 }
 0xab7   : > { %v3275_v30 = vmul.f32 %v6367_v39, %v6357_v46  ;;  %v3318_v27 = vmul.f32 %v6367_v39, %v6359_v10  ;;  %v3361_v8 = vmul.f32 %v6367_v39, %v6361_v35  ;;  %v3404_v6 = vmul.f32 %v6367_v39, %v6363_v5  ;;  %v3353_v46 = vpop.permute.xlu0 %3352  ;;  %v3396_v49 = vpop.permute.xlu2 %3395 }
 0xab9   : > { %5983 = vmatmul.msk.f32.gmra.mxu2 %vm2309_vm14, %v3275_v30  ;;  %5986 = vmatmul.msk.f32.gmra.mxu3 %vm2309_vm14, %v3318_v27 }
 0xaba   : > { %5989 = vmatmul.msk.f32.gmra.mxu0 %vm2309_vm14, %v3361_v8  ;;  %5992 = vmatmul.msk.f32.gmra.mxu1 %vm2309_vm14, %v3404_v6  ;;  %v3490_v8 = vld [vmem:[#allocation4 + $0x30] sm:$0xff]  ;;  %v3489_v6 = vld [vmem:[#allocation4 + $0x28] sm:$0xff] }
 0xabb   : > { %3516 = vmatpush.msrb.mxu3 %v3490_v8  ;;  %v7560_v8 = vld [vmem:[%s8049_s24 + $0x10] sm:$0xff] }
 0xabd   : > { %3517 = vmatpush.msrb.mxu3 %v3489_v6  ;;  %v6282_v6 = vld [vmem:[%s8056_s11 + $0x1] ss:$0 sm:$0xff] }
 0xabf   : > { %3518 = vmatpush.msrb.mxu3 %v3488_v57  ;;  %v7564_v57 = vld [vmem:[#allocation2 + $0x58] sm:$0xff] }
 0xb2f   : > { %v3385_v62 = vpop.f32.mrf.mxu0  ;;  %v3428_v24 = vpop.f32.mrf.mxu1 }
 0xb30   : > { %v3399_v31 = vmul.f32 %v3394_v43, %v3385_v62  ;;  %v3442_v53 = vmul.f32 %v3437_v20, %v3428_v24 }
 0xb34   : > { %v3299_v26 = vpop.f32.mrf.mxu2  ;;  %v3342_v25 = vpop.f32.mrf.mxu3 }
 0xb35   : > { %v3313_v4 = vmul.f32 %v3308_v28, %v3299_v26  ;;  %v3356_v42 = vmul.f32 %v3351_v19, %v3342_v25  ;;  %v3531_v26 = vld [vmem:[#allocation6 + $0x30] sm:$0xff]  ;;  %v3530_v25 = vld [vmem:[#allocation6 + $0x28] sm:$0xff] }
 0xb36   : > { %3557 = vmatpush.msra.mxu0 %v3531_v26  ;;  %v7610_v26 = vld [vmem:[#allocation2 + $0x40] sm:$0xff] }
 0xb37   : > { %v3358_v15 = vadd.f32 %v3356_v42, %v3313_v4  ;;  %v3388_v36 = vpop.f32.mrf.mxu0  ;;  %v3431_v47 = vpop.f32.mrf.mxu1  ;;  %v3529_v4 = vld [vmem:[#allocation6 + $0x20] sm:$0xff]  ;;  %v7541_v42 = vld [vmem:[%s8046_s28 + $0x8] sm:$0xf] }
 0xb38   : > { %v3400_v38 = vmul.f32 %v3396_v49, %v3388_v36  ;;  %v3443_v39 = vmul.f32 %v3439_v61, %v3431_v47  ;;  %3558 = vmatpush.msra.mxu0 %v3530_v25  ;;  %v3571_v36 = vld [vmem:[#allocation7 + $0x28] sm:$0xff] }
 0xb39   : > { %v3401_v21 = vadd.f32 %v3399_v31, %v3358_v15  ;;  %v3573_v31 = vld [vmem:[#allocation7 + $0x38] sm:$0xff] }
 0xb3a   : > { %3559 = vmatpush.msra.mxu0 %v3529_v4  ;;  %3597 = vmatpush.msrb.mxu1 %v3573_v31 }
 0xb3b   : > { %v3444_v10 = vadd.f32 %v3442_v53, %v3401_v21 }
 0xb3c   : > { %v3302_v35 = vpop.f32.mrf.mxu2  ;;  %v3345_v59 = vpop.f32.mrf.mxu3  ;;  %6017 = vmatpush.msk.msrb.mxu0 %vm1701_vm4, %v7541_v42 }
 0xb3d   : > { %v3314_v5 = vmul.f32 %v3310_v37, %v3302_v35  ;;  %v3357_v40 = vmul.f32 %v3353_v46, %v3345_v59  ;;  %5995 = vmatmul.msk.f32.vlgmr.msrb.gmra.mxu2 %vm1228_vm2, %v3444_v10  ;;  %v3572_v10 = vld [vmem:[#allocation7 + $0x30] sm:$0xff]  ;;  %v3570_v35 = vld [vmem:[#allocation7 + $0x20] sm:$0xff]  ;;  %v6010_v59 = vld [vmem:[%s6675_s19 + $0x58] sm:$0xff] }
 0xb3e   : > { %3598 = vmatpush.msrb.mxu1 %v3572_v10  ;;  %3638 = vmatpush.msra.mxu2 %v6010_v59  ;;  %v7656_v10 = vld [vmem:[%s8050_s30 + $0x2] ss:$0 sm:$0xff] }
 0xb3f   : > { %v3359_v7 = vadd.f32 %v3357_v40, %v3314_v5  ;;  %v6281_v5 = vld [vmem:[%s8055_s23 + $0x1] ss:$0 sm:$0xff] }
 0xb40   : > { %3599 = vmatpush.msrb.mxu1 %v3571_v36 }
 0xb41   : > { %v3402_v30 = vadd.f32 %v3400_v38, %v3359_v7 }
 0xb42   : > { %3600 = vmatpush.msrb.mxu1 %v3570_v35 }
 0xb43   : > { %v3445_v27 = vadd.f32 %v3443_v39, %v3402_v30  ;;  %v6009_v39 = vld [vmem:[%s6675_s19 + $0x50] sm:$0xff]  ;;  %v6008_v30 = vld [vmem:[%s6675_s19 + $0x48] sm:$0xff] }
 0xb44   : > { %3639 = vmatpush.msra.mxu2 %v6009_v39  ;;  %3723 = vmatpush.msra.mxu1 %v7564_v57 }
 0xb45   : > { %5996 = vmatmul.msk.f32.gmra.mxu2 %vm1228_vm2, %v3445_v27  ;;  %v6007_v27 = vld [vmem:[%s6675_s19 + $0x40] sm:$0xff] }
 0xb46   : > { %3640 = vmatpush.msra.mxu2 %v6008_v30 }
 0xb48   : > { %3641 = vmatpush.msra.mxu2 %v6007_v27 }
 0xb4a   : > { %3751 = vmatpush.msrb.mxu2 %v7560_v8 }
 0xbc0   : > { %v3472_v28 = vpop.f32.mrf.mxu2 }
 0xbc1   : > { %v3478_v19 = vadd.f32 %v3472_v28, %v7336_v51  ;;  %v6280_v51 = vld [vmem:[%s8054_s2 + $0x1] ss:$0 sm:$0xff] }
 0xbc3   : > { %v3485_v43 = vadd.f32 %v6279_v16, %v3478_v19 }
 0xbc5   : > { %5999 = vmatmul.msk.f32.vlgmr.msrb.gmra.mxu3 %vm1636_vm7, %v3485_v43 }
 0xbc8   : > { %v3475_v62 = vpop.f32.mrf.mxu2 }
 0xbc9   : > { %v3479_v20 = vadd.f32 %v3475_v62, %v7340_v44 }
 0xbcb   : > { %v3486_v24 = vadd.f32 %v6279_v16, %v3479_v20 }
 0xbcd   : > { %6000 = vmatmul.msk.f32.gmra.mxu3 %vm1636_vm7, %v3486_v24 }
 0xc48   : > { %v3520_v15 = vpop.f32.mrf.mxu3 }
 0xc49   : > { %v3521_v44 = vadd.f32 %v6280_v51, %v3520_v15  ;;  %v7643_v15 = vld [vmem:[%s6775_s8] sm:$0x3] }
 0xc4b   : > { %v3526_v37 = vmax.f32 %v3521_v44, 0.0 }
 0xc4d   : > { %6002 = vmatmul.msk.f32.vlgmr.msra.gmra.mxu0 %vm1636_vm7, %v3526_v37 }
 0xc50   : > { %v3523_v53 = vpop.f32.mrf.mxu3 }
 0xc51   : > { %v3524_v21 = vadd.f32 %v6280_v51, %v3523_v53 }
 0xc53   : > { %v3527_v46 = vmax.f32 %v3524_v21, 0.0  ;;  %v6283_v21 = vld [vmem:[%s8051_s7 + $0x2] ss:$0 sm:$0xff] }
 0xc55   : > { %6003 = vmatmul.msk.f32.gmra.mxu0 %vm1636_vm7, %v3527_v46 }
 0xc5d   : > { %6018 = vmatmul.msk.f32.vlgmr.msrb.gmra.mxu0 %vm1694_vm5, %v7004_v54 }
 0xc65   : > { %6019 = vmatmul.msk.f32.gmra.mxu0 %vm1694_vm5, %v7025_v11 }
 0xcca   : > { %v3561_v40 = vpop.f32.mrf.mxu0 }
 0xccb   : > { %v3562_v49 = vadd.f32 %v6281_v5, %v3561_v40 }
 0xccd   : > { %v3567_v47 = vmax.f32 %v3562_v49, 0.0 }
 0xccf   : > { %6005 = vmatmul.msk.f32.vlgmr.msrb.gmra.mxu1 %vm1636_vm7, %v3567_v47 }
 0xcd2   : > { %v3564_v38 = vpop.f32.mrf.mxu0 }
 0xcd3   : > { %v3565_v7 = vadd.f32 %v6281_v5, %v3564_v38 }
 0xcd5   : > { %v3568_v61 = vmax.f32 %v3565_v7, 0.0 }
 0xcd7   : > { %6006 = vmatmul.msk.f32.gmra.mxu1 %vm1636_vm7, %v3568_v61 }
 0xd4c   : > { %v3602_v32 = vpop.f32.mrf.mxu1 }
 0xd4d   : > { %v3603_v16 = vadd.f32 %v6282_v6, %v3602_v32 }
 0xd4f   : > { %v7567_v28 = vadd.f32 %v3603_v16, %v3485_v43  ;;  %v7585_v43 = vld [vmem:[%s6770_s4 + $0x8] sm:$0xff] }
 0xd51   : > { %6012 = vmatmul.msk.f32.vlgmr.msra.gmra.mxu2 %vm1636_vm7, %v7567_v28 }
 0xd52   : > { %3865 = vmatpush.msra.mxu2 %v7564_v57 }
 0xd54   : > { %v3605_v19 = vpop.f32.mrf.mxu1 }
 0xd55   : > { %v3606_v62 = vadd.f32 %v6282_v6, %v3605_v19 }
 0xd57   : > { %v7572_v20 = vadd.f32 %v3606_v62, %v3486_v24  ;;  %v7590_v24 = vld [vmem:[%s6770_s4] sm:$0xff] }
 0xd59   : > { %6013 = vmatmul.msk.f32.gmra.mxu2 %vm1636_vm7, %v7572_v20  ;;  %3663 = vmatpush.msra.mxu3 %v7572_v20 }
 0xd5a   : > { %3815 = vmatpush.msra.mxu0 %v7572_v20 }
 0xd5b   : > { %3664 = vmatpush.msra.mxu3 %v7567_v28 }
 0xd5c   : > { %3816 = vmatpush.msra.mxu0 %v7567_v28  ;;  %6014 = vmatmul.msk.f32.vlgmr.msra.gmra.mxu3 %vm1228_vm2, %v7349_v52  ;;  %v7604_v52 = vld [vmem:[#allocation2 + $0x50] sm:$0xff] }
 0xd5d   : > { %6028 = vmatmul.msk.f32.vlgmr.msra.gmra.mxu0 %vm1228_vm2, %v7354_v34  ;;  %3790 = vmatpush.msrb.mxu3 %v7585_v43  ;;  %v7606_v34 = vld [vmem:[#allocation2 + $0x48] sm:$0xff] }
 0xd5e   : > { %3925 = vmatpush.msrb.mxu0 %v7585_v43  ;;  %3866 = vmatpush.msra.mxu2 %v7604_v52 }
 0xd5f   : > { %3791 = vmatpush.msrb.mxu3 %v7590_v24  ;;  %3724 = vmatpush.msra.mxu1 %v7604_v52 }
 0xd60   : > { %3926 = vmatpush.msrb.mxu0 %v7590_v24  ;;  %3867 = vmatpush.msra.mxu2 %v7606_v34 }
 0xd61   : > { %3891 = vmatpush.msra.mxu3 %v7560_v8  ;;  %6023 = vmatmul.msk.f32.vlgmr.msrb.gmra.mxu2 %vm1138_vm0, %v7122_v45 }
 0xd62   : > { %4026 = vmatpush.msra.mxu0 %v7560_v8  ;;  %3725 = vmatpush.msra.mxu1 %v7606_v34 }
 0xd63   : > { %3868 = vmatpush.msra.mxu2 %v7610_v26 }
 0xd64   : > { %6015 = vmatmul.msk.f32.gmra.mxu3 %vm1228_vm2, %v7367_v2  ;;  %3726 = vmatpush.msra.mxu1 %v7610_v26  ;;  %v3699_v2 = vpop.f32.mrf.mxu0 }
 0xd65   : > { %6029 = vmatmul.msk.f32.gmra.mxu0 %vm1228_vm2, %v7372_v17  ;;  %6041 = vmatpush.msk.msrb.mxu2 %vm1701_vm4, %v7541_v42 }
 0xd66   : > { %6030 = vmatpush.msk.msrb.mxu1 %vm1701_vm4, %v7541_v42 }
 0xd69   : > { %6024 = vmatmul.msk.f32.gmra.mxu2 %vm1138_vm0, %v7132_v48 }
 0xd6c   : > { %v3702_v17 = vpop.f32.mrf.mxu0 }
 0xdd4   : > { %v3643_v44 = vpop.f32.mrf.mxu2 }
 0xdd5   : > { %v7658_v35 = vadd.f32 %v6283_v21, %v3643_v44 }
 0xdda   : > { %v3818_v25 = vpop.f32.mrf.mxu0 }
 0xddb   : > { %6033 = vmatmul.msk.f32.vlgmr.msra.gmra.mxu2 %vm1636_vm7, %v3818_v25 }
 0xddc   : > { %4085 = vmatpush.msra.mxu2 %v7572_v20  ;;  %v3646_v37 = vpop.f32.mrf.mxu2 }
 0xddd   : > { %v7666_v49 = vadd.f32 %v6283_v21, %v3646_v37 }
 0xdde   : > { %4086 = vmatpush.msra.mxu2 %v7567_v28 }
 0xddf   : > { %v3666_v4 = vpop.f32.mrf.mxu3 }
 0xde0   : > { %6020 = vmatmul.msk.f32.vlgmr.msra.gmra.mxu1 %vm1636_vm7, %v3666_v4 }
 0xde1   : > { %3950 = vmatpush.msra.mxu1 %v7572_v20 }
 0xde2   : > { %v3821_v51 = vpop.f32.mrf.mxu0 }
 0xde3   : > { %6034 = vmatmul.msk.f32.gmra.mxu2 %vm1636_vm7, %v3821_v51  ;;  %3951 = vmatpush.msra.mxu1 %v7567_v28 }
 0xde4   : > { %v3753_v53 = vpop.f32.mrf.mxu2 }
 0xde7   : > { %v3669_v31 = vpop.f32.mrf.mxu3 }
 0xde8   : > { %6021 = vmatmul.msk.f32.gmra.mxu1 %vm1636_vm7, %v3669_v31 }
 0xdeb   : > { %6042 = vmatmul.msk.f32.vlgmr.msrb.gmra.mxu2 %vm1694_vm5, %v7146_v55 }
 0xdec   : > { %4195 = vmatpush.msrb.mxu2 %v7585_v43 }
 0xdee   : > { %4196 = vmatpush.msrb.mxu2 %v7590_v24 }
 0xdf0   : > { %6031 = vmatmul.msk.f32.vlgmr.msrb.gmra.mxu1 %vm1694_vm5, %v7018_v3 }
 0xdf1   : > { %4060 = vmatpush.msrb.mxu1 %v7585_v43 }
 0xdf3   : > { %6043 = vmatmul.msk.f32.gmra.mxu2 %vm1694_vm5, %v7060_v29  ;;  %4061 = vmatpush.msrb.mxu1 %v7590_v24 }
 0xdf8   : > { %6032 = vmatmul.msk.f32.gmra.mxu1 %vm1694_vm5, %v7036_v22 }
 0xdfb   : > { %6050 = vmatmul.msk.f32.vlgmr.msra.gmra.mxu2 %vm1228_vm2, %v7424_v56 }
 0xdfc   : > { %6070 = vmatpush.msk.msra.mxu2 %vm2316_vm13, %v7643_v15 }
 0xe00   : > { %6039 = vmatmul.msk.f32.vlgmr.msra.gmra.mxu1 %vm1228_vm2, %v7419_v18 }
 0xe01   : > { %4161 = vmatpush.msra.mxu1 %v7560_v8 }
 0xe03   : > { %6051 = vmatmul.msk.f32.gmra.mxu2 %vm1228_vm2, %v7437_v1 }
 0xe08   : > { %6040 = vmatmul.msk.f32.gmra.mxu1 %vm1228_vm2, %v7432_v63  ;;  %v3756_v63 = vpop.f32.mrf.mxu2 }
 0xe5d   : > { %v3728_v56 = vpop.f32.mrf.mxu1 }
 0xe5e   : > { %v3729_v46 = vadd.f32 %v3728_v56, %v3699_v2  ;;  %v3870_v8 = vpop.f32.mrf.mxu2 }
 0xe60   : > { %v3759_v36 = vadd.f32 %v3753_v53, %v3729_v46 }
 0xe62   : > { %v3766_v18 = vadd.f32 %v7656_v10, %v3759_v36 }
 0xe64   : > { %4277 = vrot.lane.b32.xlu0 %v3766_v18, %s6613_s15  ;;  %v3768_v1 = vmul.f32 %v3766_v18, %v7658_v35 }
 0xe65   : > { %v3731_v59 = vpop.f32.mrf.mxu1 }
 0xe66   : > { %v3732_v5 = vadd.f32 %v3731_v59, %v3702_v17  ;;  %6026 = vmatmul.msk.f32.vlgmr.msrb.gmra.mxu3 %vm1228_vm2, %v3768_v1  ;;  %v3873_v2 = vpop.f32.mrf.mxu2 }
 0xe67   : > { %4000 = vmatpush.msrb.mxu3 %v7564_v57 }
 0xe68   : > { %v3760_v40 = vadd.f32 %v3756_v63, %v3732_v5  ;;  %v1582_v5 = vld [vmem:[%s8057_s3] sm:$0x1]  ;;  %s6614_s3 = smov 96  }
 0xe69   : > { %4001 = vmatpush.msrb.mxu3 %v7604_v52 }
 0xe6a   : > { %v3767_v47 = vadd.f32 %v7656_v10, %v3760_v40 }
 0xe6b   : > { %4002 = vmatpush.msrb.mxu3 %v7606_v34 }
 0xe6c   : > { %v3769_v38 = vmul.f32 %v3767_v47, %v7666_v49 }
 0xe6d   : > { %4003 = vmatpush.msrb.mxu3 %v7610_v26  ;;  %v3841_v7 = vpop.f32.mrf.mxu1 }
 0xe6e   : > { %6027 = vmatmul.msk.f32.gmra.mxu3 %vm1228_vm2, %v3769_v38  ;;  %v3871_v6 = vadd.f32 %v3870_v8, %v3841_v7  ;;  %v3976_v44 = vpop.f32.mrf.mxu2 }
 0xe75   : > { %v3844_v61 = vpop.f32.mrf.mxu1 }
 0xe76   : > { %6035 = vmatmul.msk.f32.vlgmr.msra.gmra.mxu3 %vm1138_vm0, %v7204_v9  ;;  %v3874_v17 = vadd.f32 %v3873_v2, %v3844_v61 }
 0xe77   : > { %6052 = vmatpush.msk.msra.mxu3 %vm1701_vm4, %v7541_v42 }
 0xe7d   : > { %v3953_v39 = vpop.f32.mrf.mxu1 }
 0xe7e   : > { %6036 = vmatmul.msk.f32.gmra.mxu3 %vm1138_vm0, %v7210_v13 }
 0xe85   : > { %v3956_v30 = vpop.f32.mrf.mxu1 }
 0xe86   : > { %6044 = vmatmul.msk.f32.vlgmr.msrb.gmra.mxu3 %vm1636_vm7, %v3953_v39 }
 0xe87   : > { %6061 = vmatpush.msk.msrb.mxu3 %vm2316_vm13, %v7643_v15 }
 0xe8e   : > { %6045 = vmatmul.msk.f32.gmra.mxu3 %vm1636_vm7, %v3956_v30 }
 0xe96   : > { %6053 = vmatmul.msk.f32.vlgmr.msra.gmra.mxu3 %vm1694_vm5, %v7063_v12 }
 0xe9e   : > { %6054 = vmatmul.msk.f32.gmra.mxu3 %vm1694_vm5, %v7075_v41 }
 0xee9   : > { %v7687_v42 = vpop.f32.mrf.mxu3 }
 0xef1   : > { %v7689_v27 = vpop.f32.mrf.mxu3 }
 0xef9   : > { %v3893_v32 = vpop.f32.mrf.mxu3 }
 0xefa   : > { %v3899_v16 = vadd.f32 %v3893_v32, %v3871_v6 }
 0xefc   : > { %v3901_v19 = vadd.f32 %v7656_v10, %v3899_v16 }
 0xefe   : > { %v3903_v62 = vmul.f32 %v3901_v19, %v7658_v35  ;;  %4320 = vrot.lane.b32.xlu2 %v3901_v19, %s6613_s15 }
 0xf00   : > { %6037 = vmatmul.msk.f32.vlgmr.msrb.gmra.mxu0 %vm1228_vm2, %v3903_v62 }
 0xf01   : > { %v3896_v25 = vpop.f32.mrf.mxu3  ;;  %4135 = vmatpush.msrb.mxu0 %v7564_v57  ;;  %v3979_v57 = vpop.f32.mrf.mxu2 }
 0xf02   : > { %v3900_v4 = vadd.f32 %v3896_v25, %v3874_v17 }
 0xf03   : > { %4136 = vmatpush.msrb.mxu0 %v7604_v52 }
 0xf04   : > { %v3902_v51 = vadd.f32 %v7656_v10, %v3900_v4 }
 0xf05   : > { %4137 = vmatpush.msrb.mxu0 %v7606_v34 }
 0xf06   : > { %v3904_v31 = vmul.f32 %v3902_v51, %v7666_v49  ;;  %4279 = vrot.lane.b32.xlu2 %v3767_v47, %s6613_s15  ;;  %v1606_v47 = vadd.f32 %v7112_v23, %v1582_v5 }
 0xf07   : > { %4138 = vmatpush.msrb.mxu0 %v7610_v26 }
 0xf08   : > { %6038 = vmatmul.msk.f32.gmra.mxu0 %vm1228_vm2, %v3904_v31  ;;  %v7723_v61 = vadd.f32 %v7176_v14, %v1606_v47 }
 0xf09   : > { %v4088_v52 = vpop.f32.mrf.mxu2  ;;  %v4005_v53 = vpop.f32.mrf.mxu3 }
 0xf0a   : > { %v4006_v56 = vadd.f32 %v4005_v53, %v3976_v44  ;;  %v4584_v39 = vperm.slane %v7723_v61, 0 }
 0xf10   : > { %6046 = vmatmul.msk.f32.vlgmr.msra.gmra.mxu0 %vm1138_vm0, %v7240_v33 }
 0xf11   : > { %6064 = vmatpush.msk.msra.mxu0 %vm2316_vm13, %v7643_v15  ;;  %v4091_v34 = vpop.f32.mrf.mxu2  ;;  %v4008_v18 = vpop.f32.mrf.mxu3 }
 0xf12   : > { %v4009_v59 = vadd.f32 %v4008_v18, %v3979_v57 }
 0xf18   : > { %6047 = vmatmul.msk.f32.gmra.mxu0 %vm1138_vm0, %v7244_v60 }
 0xf19   : > { %v4111_v6 = vpop.f32.mrf.mxu3 }
 0xf20   : > { %6055 = vmatmul.msk.f32.vlgmr.msrb.gmra.mxu0 %vm1636_vm7, %v4088_v52 }
 0xf21   : > { %v4114_v17 = vpop.f32.mrf.mxu3 }
 0xf28   : > { %6056 = vmatmul.msk.f32.gmra.mxu0 %vm1636_vm7, %v4091_v34 }
 0xf7d   : > { %v3928_v26 = vpop.f32.mrf.mxu0 }
 0xf7e   : > { %v3934_v57 = vmul.f32 0.35355338, %v3928_v26 }
 0xf85   : > { %v3931_v37 = vpop.f32.mrf.mxu0 }
 0xf8d   : > { %v4028_v21 = vpop.f32.mrf.mxu0 }
 0xf8e   : > { %v4034_v46 = vadd.f32 %v4028_v21, %v4006_v56 }
 0xf90   : > { %v4036_v36 = vadd.f32 %v7656_v10, %v4034_v46  ;;  %v3935_v46 = vmul.f32 0.35355338, %v3931_v37 }
 0xf92   : > { %v4038_v1 = vmul.f32 %v4036_v36, %v7658_v35  ;;  %4363 = vrot.lane.b32.xlu1 %v4036_v36, %s6613_s15 }
 0xf94   : > { %6048 = vmatmul.msk.f32.vlgmr.msrb.gmra.mxu1 %vm1228_vm2, %v4038_v1 }
 0xf95   : > { %v4031_v63 = vpop.f32.mrf.mxu0  ;;  %6067 = vmatpush.msk.msrb.mxu1 %vm2316_vm13, %v7643_v15 }
 0xf96   : > { %v4035_v40 = vadd.f32 %v4031_v63, %v4009_v59 }
 0xf98   : > { %v4037_v38 = vadd.f32 %v7656_v10, %v4035_v40 }
 0xf9a   : > { %v4039_v7 = vmul.f32 %v4037_v38, %v7666_v49  ;;  %4322 = vrot.lane.b32.xlu1 %v3902_v51, %s6613_s15 }
 0xf9c   : > { %6049 = vmatmul.msk.f32.gmra.mxu1 %vm1228_vm2, %v4039_v7 }
 0xf9d   : > { %v4140_v8 = vpop.f32.mrf.mxu0 }
 0xf9e   : > { %v4141_v14 = vadd.f32 %v4140_v8, %v4111_v6 }
 0xfa2   : > { %4586 = vrot.lane.b32.xlu1 %v4584_v39, %s6614_s3  ;;  %s6616_s3 = smov 32  }
 0xfa4   : > { %6057 = vmatmul.msk.f32.vlgmr.msra.gmra.mxu1 %vm1138_vm0, %v7263_v58 }
 0xfa5   : > { %v4143_v62 = vpop.f32.mrf.mxu0 }
 0xfa6   : > { %v4144_v25 = vadd.f32 %v4143_v62, %v4114_v17 }
 0xfac   : > { %6058 = vmatmul.msk.f32.gmra.mxu1 %vm1138_vm0, %v7267_v50 }
0x1011   : > { %v4063_v23 = vpop.f32.mrf.mxu1 }
0x1012   : > { %v4069_v52 = vmul.f32 0.35355338, %v4063_v23 }
0x1019   : > { %v4066_v30 = vpop.f32.mrf.mxu1 }
0x101a   : > { %v4070_v18 = vmul.f32 0.35355338, %v4066_v30 }
0x1021   : > { %v4163_v32 = vpop.f32.mrf.mxu1 }
0x1022   : > { %v4169_v16 = vadd.f32 %v4163_v32, %v4141_v14 }
0x1024   : > { %v4171_v19 = vadd.f32 %v7656_v10, %v4169_v16 }
0x1026   : > { %v4173_v2 = vmul.f32 %v4171_v19, %v7658_v35  ;;  %4406 = vrot.lane.b32.xlu0 %v4171_v19, %s6613_s15  ;;  %v3799_v35 = vmul.f32 0.35355338, %v7687_v42 }
0x1028   : > { %6059 = vmatmul.msk.f32.vlgmr.msrb.gmra.mxu2 %vm1228_vm2, %v4173_v2  ;;  %v4206_v34 = vmax.f32 %v3799_v35, %v3934_v57 }
0x1029   : > { %v4166_v4 = vpop.f32.mrf.mxu1 }
0x102a   : > { %v4170_v51 = vadd.f32 %v4166_v4, %v4144_v25  ;;  %v4208_v56 = vmax.f32 %v4206_v34, %v4069_v52 }
0x102c   : > { %v4172_v31 = vadd.f32 %v7656_v10, %v4170_v51  ;;  %v3800_v10 = vmul.f32 0.35355338, %v7689_v27 }
0x102e   : > { %v4174_v44 = vmul.f32 %v4172_v31, %v7666_v49  ;;  %4365 = vrot.lane.b32.xlu0 %v4037_v38, %s6613_s15  ;;  %4408 = vrot.lane.b32.xlu2 %v4172_v31, %s6613_s15  ;;  %v4207_v63 = vmax.f32 %v3800_v10, %v3935_v46 }
0x1030   : > { %6060 = vmatmul.msk.f32.gmra.mxu2 %vm1228_vm2, %v4174_v44  ;;  %v4209_v42 = vmax.f32 %v4207_v63, %v4070_v18 }
0x10ab   : > { %v4198_v53 = vpop.f32.mrf.mxu2 }
0x10ac   : > { %v4204_v21 = vmul.f32 0.35355338, %v4198_v53 }
0x10ae   : > { %v4210_v36 = vmax.f32 %v4208_v56, %v4204_v21 }
0x10b0   : > { %v4212_v49 = vsub.f32 %v3799_v35, %v4210_v36  ;;  %v4218_v1 = vsub.f32 %v3934_v57, %v4210_v36  ;;  %v4224_v59 = vsub.f32 %v4069_v52, %v4210_v36  ;;  %v4230_v5 = vsub.f32 %v4204_v21, %v4210_v36 }
0x10b2   : > { %v4214_v40 = vmul.f32 1.442695, %v4212_v49  ;;  %v4220_v47 = vmul.f32 1.442695, %v4218_v1  ;;  %v4226_v26 = vmul.f32 1.442695, %v4224_v59 }
0x10b3   : > { %v4201_v38 = vpop.f32.mrf.mxu2  ;;  %v4232_v23 = vmul.f32 1.442695, %v4230_v5 }
0x10b4   : > { %6368 = vpow2.f32 %v4214_v40  ;;  %v4205_v7 = vmul.f32 0.35355338, %v4201_v38  ;;  %v6074_v40 = vld [vmem:[%s8052_s18 + $0x28] sm:$0xff]  ;;  %v4278_v38 = vpop.permute.xlu0 %4277 }
0x10b5   : > { %6370 = vpow2.f32 %v4220_v47  ;;  %4439 = vmatpush.msra.mxu3 %v6074_v40  ;;  %v6073_v47 = vld [vmem:[%s8052_s18 + $0x20] sm:$0xff] }
0x10b6   : > { %v4211_v8 = vmax.f32 %v4209_v42, %v4205_v7  ;;  %6372 = vpow2.f32 %v4226_v26  ;;  %v4461_v26 = vld [vmem:[#allocation4 + $0x58] sm:$0xff]  ;;  %v4321_v42 = vpop.permute.xlu2 %4320 }
0x10b7   : > { %6374 = vpow2.f32 %v4232_v23  ;;  %4440 = vmatpush.msra.mxu3 %v6073_v47  ;;  %4485 = vmatpush.msrb.mxu0 %v4461_v26  ;;  %v4364_v23 = vpop.permute.xlu1 %4363 }
0x10b8   : > { %v4213_v37 = vsub.f32 %v3800_v10, %v4211_v8  ;;  %v4219_v6 = vsub.f32 %v3935_v46, %v4211_v8  ;;  %v4225_v27 = vsub.f32 %v4070_v18, %v4211_v8  ;;  %v4231_v30 = vsub.f32 %v4205_v7, %v4211_v8 }
0x10ba   : > { %v6369_v14 = vpop.eup %6368  ;;  %v4216_v32 = vmul.f32 1.442695, %v4213_v37  ;;  %v4222_v16 = vmul.f32 1.442695, %v4219_v6  ;;  %v4228_v62 = vmul.f32 1.442695, %v4225_v27 }
0x10bb   : > { %v6371_v19 = vpop.eup %6370  ;;  %v4234_v25 = vmul.f32 1.442695, %v4231_v30 }
0x10bc   : > { %v4236_v2 = vadd.f32 %v6371_v19, %v6369_v14  ;;  %6376 = vpow2.f32 %v4216_v32  ;;  %v6373_v17 = vpop.eup %6372  ;;  %v4407_v37 = vpop.permute.xlu0 %4406 }
0x10bd   : > { %6378 = vpow2.f32 %v4222_v16  ;;  %v6375_v51 = vpop.eup %6374 }
0x10be   : > { %v4238_v4 = vadd.f32 %v6373_v17, %v4236_v2  ;;  %6380 = vpow2.f32 %v4228_v62 }
0x10bf   : > { %6382 = vpow2.f32 %v4234_v25  ;;  %v4323_v25 = vpop.permute.xlu1 %4322 }
0x10c0   : > { %v4240_v31 = vadd.f32 %v6375_v51, %v4238_v4 }
0x10c2   : > { %v6377_v44 = vpop.eup %6376  ;;  %6384 = vrcp.f32 %v4240_v31 }
0x10c3   : > { %v6379_v57 = vpop.eup %6378 }
0x10c4   : > { %v4237_v35 = vadd.f32 %v6379_v57, %v6377_v44  ;;  %v6381_v52 = vpop.eup %6380 }
0x10c5   : > { %v6383_v53 = vpop.eup %6382 }
0x10c6   : > { %v4239_v34 = vadd.f32 %v6381_v52, %v4237_v35  ;;  %v4366_v35 = vpop.permute.xlu0 %4365 }
0x10c8   : > { %v6385_v56 = vpop.eup %6384  ;;  %v4241_v21 = vadd.f32 %v6383_v53, %v4239_v34 }
0x10c9   : > { %v4373_v46 = vmul.f32 %v6385_v56, %v6375_v51  ;;  %v4244_v36 = vmul.f32 %v6385_v56, %v6369_v14  ;;  %v4287_v10 = vmul.f32 %v6385_v56, %v6371_v19  ;;  %v4330_v18 = vmul.f32 %v6385_v56, %v6373_v17  ;;  %v4280_v19 = vpop.permute.xlu2 %4279 }
0x10ca   : > { %6386 = vrcp.f32 %v4241_v21 }
0x10cb   : > { %6062 = vmatmul.msk.f32.vlgmr.msrb.gmra.mxu3 %vm2309_vm14, %v4244_v36  ;;  %6065 = vmatmul.msk.f32.vlgmr.msra.gmra.mxu0 %vm2309_vm14, %v4287_v10  ;;  %v4460_v10 = vld [vmem:[#allocation4 + $0x50] sm:$0xff] }
0x10cc   : > { %6068 = vmatmul.msk.f32.vlgmr.msrb.gmra.mxu1 %vm2309_vm14, %v4330_v18  ;;  %6071 = vmatmul.msk.f32.vlgmr.msra.gmra.mxu2 %vm2309_vm14, %v4373_v46  ;;  %v4459_v18 = vld [vmem:[#allocation4 + $0x48] sm:$0xff] }
0x10cd   : > { %4486 = vmatpush.msrb.mxu0 %v4460_v10 }
0x10cf   : > { %4487 = vmatpush.msrb.mxu0 %v4459_v18 }
0x10d0   : > { %v6387_v49 = vpop.eup %6386 }
0x10d1   : > { %v4245_v1 = vmul.f32 %v6387_v49, %v6377_v44  ;;  %v4288_v59 = vmul.f32 %v6387_v49, %v6379_v57  ;;  %v4331_v5 = vmul.f32 %v6387_v49, %v6381_v52  ;;  %v4374_v63 = vmul.f32 %v6387_v49, %v6383_v53  ;;  %v4409_v56 = vpop.permute.xlu2 %4408  ;;  %v4458_v49 = vld [vmem:[#allocation4 + $0x40] sm:$0xff] }
0x10d2   : > { %4488 = vmatpush.msrb.mxu0 %v4458_v49  ;;  %v4587_v49 = vpop.permute.xlu1 %4586 }
0x10d3   : > { %6063 = vmatmul.msk.f32.gmra.mxu3 %vm2309_vm14, %v4245_v1  ;;  %6066 = vmatmul.msk.f32.gmra.mxu0 %vm2309_vm14, %v4288_v59  ;;  %v4502_v1 = vld [vmem:[#allocation6 + $0x58] sm:$0xff]  ;;  %v6285_v59 = vld [vmem:[%s8053_s0 + $0x2] ss:$0 sm:$0xff] }
0x10d4   : > { %6069 = vmatmul.msk.f32.gmra.mxu1 %vm2309_vm14, %v4331_v5  ;;  %6072 = vmatmul.msk.f32.gmra.mxu2 %vm2309_vm14, %v4374_v63 }
0x10d5   : > { %4526 = vmatpush.msra.mxu1 %v4502_v1 }
0x1148   : > { %v4312_v7 = vpop.f32.mrf.mxu0 }
0x1149   : > { %v4355_v8 = vpop.f32.mrf.mxu1  ;;  %v4326_v27 = vmul.f32 %v4321_v42, %v4312_v7  ;;  %v4501_v42 = vld [vmem:[#allocation6 + $0x50] sm:$0xff]  ;;  %v4500_v7 = vld [vmem:[#allocation6 + $0x48] sm:$0xff] }
0x114a   : > { %v4369_v32 = vmul.f32 %v4364_v23, %v4355_v8  ;;  %4527 = vmatpush.msra.mxu1 %v4501_v42  ;;  %v4499_v23 = vld [vmem:[#allocation6 + $0x40] sm:$0xff]  ;;  %v7765_v8 = vld [vmem:[%s8046_s28 + $0xc] sm:$0xf] }
0x114b   : > { %v6425_v42 = vld [vmem:[%s6898_s1 + $0x8] sm:$0xff] }
0x114c   : > { %4528 = vmatpush.msra.mxu1 %v4500_v7  ;;  %v6426_v7 = vld [vmem:[%s6898_s1 + $0x18] sm:$0xff] }
0x114e   : > { %v4269_v6 = vpop.f32.mrf.mxu3  ;;  %4529 = vmatpush.msra.mxu1 %v4499_v23  ;;  %v7828_v23 = vld [vmem:[#allocation2 + $0x70] sm:$0xff] }
0x114f   : > { %v4283_v30 = vmul.f32 %v4278_v38, %v4269_v6  ;;  %v4398_v14 = vpop.f32.mrf.mxu2 }
0x1150   : > { %v4412_v2 = vmul.f32 %v4407_v37, %v4398_v14  ;;  %v4315_v17 = vpop.f32.mrf.mxu0  ;;  %6097 = vmatpush.msk.msrb.mxu1 %vm1701_vm4, %v7765_v8  ;;  %v4543_v37 = vld [vmem:[#allocation7 + $0x58] sm:$0xff] }
0x1151   : > { %v4328_v16 = vadd.f32 %v4326_v27, %v4283_v30  ;;  %v4358_v51 = vpop.f32.mrf.mxu1  ;;  %v4327_v44 = vmul.f32 %v4323_v25, %v4315_v17  ;;  %4567 = vmatpush.msrb.mxu2 %v4543_v37 }
0x1152   : > { %v4370_v34 = vmul.f32 %v4366_v35, %v4358_v51  ;;  %v6087_v35 = vld [vmem:[%s6675_s19 + $0x60] sm:$0xff] }
0x1153   : > { %v4371_v62 = vadd.f32 %v4369_v32, %v4328_v16  ;;  %v4542_v16 = vld [vmem:[#allocation7 + $0x50] sm:$0xff] }
0x1154   : > { %4568 = vmatpush.msrb.mxu2 %v4542_v16  ;;  %v6289_v16 = vld [vmem:[%s8051_s7 + $0x3] ss:$0 sm:$0xff] }
0x1155   : > { %v4414_v4 = vadd.f32 %v4412_v2, %v4371_v62  ;;  %v4540_v62 = vld [vmem:[#allocation7 + $0x40] sm:$0xff] }
0x1156   : > { %v4272_v31 = vpop.f32.mrf.mxu3  ;;  %v6287_v2 = vld [vmem:[%s8055_s23 + $0x2] ss:$0 sm:$0xff] }
0x1157   : > { %v4284_v57 = vmul.f32 %v4280_v19, %v4272_v31  ;;  %6075 = vmatmul.msk.f32.vlgmr.msra.gmra.mxu3 %vm1228_vm2, %v4414_v4  ;;  %v4401_v52 = vpop.f32.mrf.mxu2  ;;  %v4541_v19 = vld [vmem:[#allocation7 + $0x48] sm:$0xff]  ;;  %v6090_v31 = vld [vmem:[%s6675_s19 + $0x78] sm:$0xff] }
0x1158   : > { %v4413_v46 = vmul.f32 %v4409_v56, %v4401_v52  ;;  %4569 = vmatpush.msrb.mxu2 %v4541_v19  ;;  %4619 = vmatpush.msrb.mxu3 %v6090_v31  ;;  %v7784_v52 = vld [vmem:[%s8049_s24 + $0x18] sm:$0xff] }
0x1159   : > { %v4329_v53 = vadd.f32 %v4327_v44, %v4284_v57  ;;  %v6089_v44 = vld [vmem:[%s6675_s19 + $0x70] sm:$0xff]  ;;  %v6088_v57 = vld [vmem:[%s6675_s19 + $0x68] sm:$0xff] }
0x115a   : > { %4570 = vmatpush.msrb.mxu2 %v4540_v62  ;;  %4620 = vmatpush.msrb.mxu3 %v6089_v44  ;;  %v7877_v62 = vld [vmem:[%s8050_s30 + $0x3] ss:$0 sm:$0xff] }
0x115b   : > { %v4372_v21 = vadd.f32 %v4370_v34, %v4329_v53  ;;  %v6288_v34 = vld [vmem:[%s8056_s11 + $0x2] ss:$0 sm:$0xff]  ;;  %v4580_v53 = vadd.f32 1.0, %v7723_v61 }
0x115c   : > { %4621 = vmatpush.msrb.mxu3 %v6088_v57 }
0x115d   : > { %v4415_v36 = vadd.f32 %v4413_v46, %v4372_v21  ;;  %v7789_v46 = vld [vmem:[#allocation2 + $0x78] sm:$0xff] }
0x115e   : > { %4622 = vmatpush.msrb.mxu3 %v6087_v35  ;;  %4704 = vmatpush.msra.mxu2 %v7789_v46 }
0x115f   : > { %6076 = vmatmul.msk.f32.gmra.mxu3 %vm1228_vm2, %v4415_v36  ;;  %v7792_v36 = vperm.slane %v4580_v53, 0 }
0x1160   : > { %4732 = vmatpush.msra.mxu3 %v7784_v52  ;;  %4705 = vmatpush.msra.mxu2 %v7828_v23 }
0x11da   : > { %v4442_v5 = vpop.f32.mrf.mxu3 }
0x11db   : > { %v4448_v63 = vadd.f32 %v4442_v5, %v7567_v28  ;;  %v6286_v28 = vld [vmem:[%s8054_s2 + $0x2] ss:$0 sm:$0xff] }
0x11dd   : > { %v4455_v40 = vadd.f32 %v6285_v59, %v4448_v63 }
0x11df   : > { %6079 = vmatmul.msk.f32.vlgmr.msrb.gmra.mxu0 %vm1636_vm7, %v4455_v40 }
0x11e2   : > { %v4445_v47 = vpop.f32.mrf.mxu3 }
0x11e3   : > { %v4449_v26 = vadd.f32 %v4445_v47, %v7572_v20 }
0x11e5   : > { %v7760_v38 = vadd.f32 %v6285_v59, %v4449_v26 }
0x11e7   : > { %6080 = vmatmul.msk.f32.gmra.mxu0 %vm1636_vm7, %v7760_v38 }
0x125c   : > { %v4490_v20 = vpop.f32.mrf.mxu0 }
0x125d   : > { %v4491_v6 = vadd.f32 %v6286_v28, %v4490_v20 }
0x125f   : > { %v4496_v27 = vmax.f32 %v4491_v6, 0.0 }
0x1261   : > { %6082 = vmatmul.msk.f32.vlgmr.msra.gmra.mxu1 %vm1636_vm7, %v4496_v27 }
0x1264   : > { %v4493_v30 = vpop.f32.mrf.mxu0 }
0x1265   : > { %v4494_v14 = vadd.f32 %v6286_v28, %v4493_v30  ;;  %v7830_v28 = vld [vmem:[#allocation2 + $0x68] sm:$0xff] }
0x1266   : > { %4706 = vmatpush.msra.mxu2 %v7830_v28 }
0x1267   : > { %v4497_v32 = vmax.f32 %v4494_v14, 0.0 }
0x1269   : > { %6083 = vmatmul.msk.f32.gmra.mxu1 %vm1636_vm7, %v4497_v32 }
0x1271   : > { %6098 = vmatmul.msk.f32.vlgmr.msrb.gmra.mxu1 %vm1694_vm5, %v7004_v54 }
0x1279   : > { %6099 = vmatmul.msk.f32.gmra.mxu1 %vm1694_vm5, %v7025_v11 }
0x12de   : > { %v4531_v17 = vpop.f32.mrf.mxu1 }
0x12df   : > { %v4532_v25 = vadd.f32 %v6287_v2, %v4531_v17 }
0x12e1   : > { %v4537_v4 = vmax.f32 %v4532_v25, 0.0 }
0x12e3   : > { %6085 = vmatmul.msk.f32.vlgmr.msrb.gmra.mxu2 %vm1636_vm7, %v4537_v4 }
0x12e6   : > { %v4534_v54 = vpop.f32.mrf.mxu1 }
0x12e7   : > { %v4535_v11 = vadd.f32 %v6287_v2, %v4534_v54 }
0x12e9   : > { %v4538_v51 = vmax.f32 %v4535_v11, 0.0 }
0x12eb   : > { %6086 = vmatmul.msk.f32.gmra.mxu2 %vm1636_vm7, %v4538_v51 }
0x1366   : > { %v4572_v56 = vpop.f32.mrf.mxu2 }
0x1367   : > { %v4573_v21 = vadd.f32 %v6288_v34, %v4572_v56 }
0x1369   : > { %v4578_v10 = vadd.f32 %v4573_v21, %v4455_v40  ;;  %v6423_v40 = vld [vmem:[%s6898_s1] sm:$0xff] }
0x136b   : > { %v4582_v18 = vmul.f32 %v7792_v36, %v4578_v10 }
0x136d   : > { %v7795_v1 = vadd.f32 %v4587_v49, %v4582_v18 }
0x136e   : > { %v4575_v59 = vpop.f32.mrf.mxu2 }
0x136f   : > { %v4576_v5 = vadd.f32 %v6288_v34, %v4575_v59  ;;  %6092 = vmatmul.msk.f32.vlgmr.msrb.gmra.mxu3 %vm1636_vm7, %v7795_v1 }
0x1370   : > { %4846 = vmatpush.msrb.mxu3 %v7789_v46 }
0x1371   : > { %v4579_v63 = vadd.f32 %v4576_v5, %v7760_v38  ;;  %v6424_v38 = vld [vmem:[%s6898_s1 + $0x10] sm:$0xff] }
0x1372   : > { %4847 = vmatpush.msrb.mxu3 %v7828_v23 }
0x1373   : > { %v4583_v47 = vmul.f32 %v7792_v36, %v4579_v63 }
0x1374   : > { %4848 = vmatpush.msrb.mxu3 %v7830_v28 }
0x1375   : > { %v7802_v26 = vadd.f32 %v4587_v49, %v4583_v47 }
0x1377   : > { %6093 = vmatmul.msk.f32.gmra.mxu3 %vm1636_vm7, %v7802_v26  ;;  %4644 = vmatpush.msra.mxu0 %v7802_v26 }
0x1378   : > { %4796 = vmatpush.msra.mxu1 %v7802_v26 }
0x1379   : > { %4645 = vmatpush.msra.mxu0 %v7795_v1 }
0x137a   : > { %4797 = vmatpush.msra.mxu1 %v7795_v1  ;;  %6094 = vmatmul.msk.f32.vlgmr.msra.gmra.mxu0 %vm1228_vm2, %v6423_v40 }
0x137b   : > { %6108 = vmatmul.msk.f32.vlgmr.msra.gmra.mxu1 %vm1228_vm2, %v6424_v38  ;;  %4771 = vmatpush.msrb.mxu0 %v7585_v43 }
0x137c   : > { %4906 = vmatpush.msrb.mxu1 %v7585_v43 }
0x137d   : > { %4772 = vmatpush.msrb.mxu0 %v7590_v24 }
0x137e   : > { %4907 = vmatpush.msrb.mxu1 %v7590_v24 }
0x137f   : > { %4872 = vmatpush.msra.mxu0 %v7784_v52  ;;  %6103 = vmatmul.msk.f32.vlgmr.msra.gmra.mxu3 %vm1138_vm0, %v7122_v45  ;;  %v7834_v45 = vld [vmem:[#allocation2 + $0x60] sm:$0xff] }
0x1380   : > { %5007 = vmatpush.msra.mxu1 %v7784_v52  ;;  %4707 = vmatpush.msra.mxu2 %v7834_v45 }
0x1381   : > { %4849 = vmatpush.msrb.mxu3 %v7834_v45 }
0x1382   : > { %6095 = vmatmul.msk.f32.gmra.mxu0 %vm1228_vm2, %v6425_v42  ;;  %6110 = vmatpush.msk.msrb.mxu2 %vm1701_vm4, %v7765_v8 }
0x1383   : > { %6109 = vmatmul.msk.f32.gmra.mxu1 %vm1228_vm2, %v6426_v7  ;;  %6121 = vmatpush.msk.msra.mxu3 %vm1701_vm4, %v7765_v8 }
0x1387   : > { %6104 = vmatmul.msk.f32.gmra.mxu3 %vm1138_vm0, %v7132_v48  ;;  %v4680_v48 = vpop.f32.mrf.mxu1 }
0x138f   : > { %v4683_v37 = vpop.f32.mrf.mxu1 }
0x13f7   : > { %v4647_v20 = vpop.f32.mrf.mxu0 }
0x13f8   : > { %v4799_v6 = vpop.f32.mrf.mxu1  ;;  %6100 = vmatmul.msk.f32.vlgmr.msra.gmra.mxu2 %vm1636_vm7, %v4647_v20 }
0x13f9   : > { %6113 = vmatmul.msk.f32.vlgmr.msrb.gmra.mxu3 %vm1636_vm7, %v4799_v6  ;;  %4931 = vmatpush.msra.mxu2 %v7802_v26 }
0x13fa   : > { %5066 = vmatpush.msrb.mxu3 %v7802_v26 }
0x13fb   : > { %4932 = vmatpush.msra.mxu2 %v7795_v1 }
0x13fc   : > { %5067 = vmatpush.msrb.mxu3 %v7795_v1 }
0x13ff   : > { %v4650_v27 = vpop.f32.mrf.mxu0 }
0x1400   : > { %v4802_v30 = vpop.f32.mrf.mxu1  ;;  %6101 = vmatmul.msk.f32.gmra.mxu2 %vm1636_vm7, %v4650_v27 }
0x1401   : > { %6114 = vmatmul.msk.f32.gmra.mxu3 %vm1636_vm7, %v4802_v30 }
0x1408   : > { %6111 = vmatmul.msk.f32.vlgmr.msrb.gmra.mxu2 %vm1694_vm5, %v7018_v3  ;;  %v6427_v3 = vld [vmem:[%s6898_s1 + $0x20] sm:$0xff] }
0x1409   : > { %6122 = vmatmul.msk.f32.vlgmr.msra.gmra.mxu3 %vm1694_vm5, %v7146_v55  ;;  %5041 = vmatpush.msrb.mxu2 %v7585_v43  ;;  %v6428_v55 = vld [vmem:[%s6898_s1 + $0x30] sm:$0xff] }
0x140a   : > { %5176 = vmatpush.msra.mxu3 %v7585_v43  ;;  %v6429_v43 = vld [vmem:[%s6898_s1 + $0x28] sm:$0xff] }
0x140b   : > { %5042 = vmatpush.msrb.mxu2 %v7590_v24 }
0x140c   : > { %5177 = vmatpush.msra.mxu3 %v7590_v24  ;;  %v4624_v24 = vpop.f32.mrf.mxu3 }
0x140d   : > { %v7879_v17 = vadd.f32 %v6289_v16, %v4624_v24 }
0x1410   : > { %6112 = vmatmul.msk.f32.gmra.mxu2 %vm1694_vm5, %v7036_v22  ;;  %v6430_v22 = vld [vmem:[%s6898_s1 + $0x38] sm:$0xff]  ;;  %s6615_s1 = smov 64  }
0x1411   : > { %6123 = vmatmul.msk.f32.gmra.mxu3 %vm1694_vm5, %v7060_v29 }
0x1414   : > { %v4627_v29 = vpop.f32.mrf.mxu3 }
0x1415   : > { %v7887_v44 = vadd.f32 %v6289_v16, %v4627_v29 }
0x1418   : > { %6119 = vmatmul.msk.f32.vlgmr.msra.gmra.mxu2 %vm1228_vm2, %v6427_v3 }
0x1419   : > { %6130 = vmatmul.msk.f32.vlgmr.msrb.gmra.mxu3 %vm1228_vm2, %v6428_v55  ;;  %5142 = vmatpush.msra.mxu2 %v7784_v52 }
0x141a   : > { %6150 = vmatpush.msk.msrb.mxu3 %vm2316_vm13, %v7643_v15 }
0x141c   : > { %v4734_v14 = vpop.f32.mrf.mxu3 }
0x1420   : > { %6120 = vmatmul.msk.f32.gmra.mxu2 %vm1228_vm2, %v6429_v43 }
0x1421   : > { %6131 = vmatmul.msk.f32.gmra.mxu3 %vm1228_vm2, %v6430_v22 }
0x1424   : > { %v4737_v51 = vpop.f32.mrf.mxu3 }
0x147b   : > { %v4709_v32 = vpop.f32.mrf.mxu2 }
0x147c   : > { %v4710_v19 = vadd.f32 %v4709_v32, %v4680_v48  ;;  %v4851_v21 = vpop.f32.mrf.mxu3 }
0x147e   : > { %v4740_v2 = vadd.f32 %v4734_v14, %v4710_v19 }
0x1480   : > { %v4747_v25 = vadd.f32 %v7877_v62, %v4740_v2 }
0x1482   : > { %5258 = vrot.lane.b32.xlu0 %v4747_v25, %s6613_s15  ;;  %v4749_v4 = vmul.f32 %v4747_v25, %v7879_v17 }
0x1483   : > { %v4712_v54 = vpop.f32.mrf.mxu2 }
0x1484   : > { %v4713_v11 = vadd.f32 %v4712_v54, %v4683_v37  ;;  %6106 = vmatmul.msk.f32.vlgmr.msrb.gmra.mxu0 %vm1228_vm2, %v4749_v4  ;;  %v4854_v5 = vpop.f32.mrf.mxu3 }
0x1485   : > { %4981 = vmatpush.msrb.mxu0 %v7789_v46 }
0x1486   : > { %v4741_v31 = vadd.f32 %v4737_v51, %v4713_v11 }
0x1487   : > { %4982 = vmatpush.msrb.mxu0 %v7828_v23 }
0x1488   : > { %v4748_v57 = vadd.f32 %v7877_v62, %v4741_v31 }
0x1489   : > { %4983 = vmatpush.msrb.mxu0 %v7830_v28 }
0x148a   : > { %v4750_v35 = vmul.f32 %v4748_v57, %v7887_v44 }
0x148b   : > { %4984 = vmatpush.msrb.mxu0 %v7834_v45  ;;  %v4822_v52 = vpop.f32.mrf.mxu2 }
0x148c   : > { %6107 = vmatmul.msk.f32.gmra.mxu0 %vm1228_vm2, %v4750_v35  ;;  %v4852_v10 = vadd.f32 %v4851_v21, %v4822_v52  ;;  %v4957_v38 = vpop.f32.mrf.mxu3 }
0x1493   : > { %v4825_v34 = vpop.f32.mrf.mxu2 }
0x1494   : > { %6115 = vmatmul.msk.f32.vlgmr.msra.gmra.mxu0 %vm1138_vm0, %v7204_v9  ;;  %v4855_v63 = vadd.f32 %v4854_v5, %v4825_v34 }
0x1495   : > { %6132 = vmatpush.msk.msra.mxu0 %vm1701_vm4, %v7765_v8 }
0x149b   : > { %v4934_v53 = vpop.f32.mrf.mxu2 }
0x149c   : > { %6116 = vmatmul.msk.f32.gmra.mxu0 %vm1138_vm0, %v7210_v13 }
0x14a3   : > { %v4937_v56 = vpop.f32.mrf.mxu2 }
0x14a4   : > { %6124 = vmatmul.msk.f32.vlgmr.msrb.gmra.mxu0 %vm1636_vm7, %v4934_v53 }
0x14a5   : > { %6141 = vmatpush.msk.msrb.mxu0 %vm2316_vm13, %v7643_v15 }
0x14ac   : > { %6125 = vmatmul.msk.f32.gmra.mxu0 %vm1636_vm7, %v4937_v56 }
0x14b4   : > { %6133 = vmatmul.msk.f32.vlgmr.msra.gmra.mxu0 %vm1694_vm5, %v7063_v12 }
0x14bc   : > { %6134 = vmatmul.msk.f32.gmra.mxu0 %vm1694_vm5, %v7075_v41 }
0x1501   : > { %v4774_v9 = vpop.f32.mrf.mxu0 }
0x1509   : > { %v4777_v8 = vpop.f32.mrf.mxu0 }
0x150a   : > { %v7928_v20 = vmul.f32 0.35355338, %v4777_v8 }
0x1511   : > { %v4874_v13 = vpop.f32.mrf.mxu0 }
0x1512   : > { %v4880_v18 = vadd.f32 %v4874_v13, %v4852_v10 }
0x1514   : > { %v4882_v49 = vadd.f32 %v7877_v62, %v4880_v18 }
0x1516   : > { %v4884_v59 = vmul.f32 %v4882_v49, %v7879_v17  ;;  %5301 = vrot.lane.b32.xlu2 %v4882_v49, %s6613_s15 }
0x1518   : > { %6117 = vmatmul.msk.f32.vlgmr.msrb.gmra.mxu1 %vm1228_vm2, %v4884_v59 }
0x1519   : > { %v4877_v12 = vpop.f32.mrf.mxu0  ;;  %5116 = vmatpush.msrb.mxu1 %v7789_v46  ;;  %v4960_v46 = vpop.f32.mrf.mxu3 }
0x151a   : > { %v4881_v41 = vadd.f32 %v4877_v12, %v4855_v63 }
0x151b   : > { %5117 = vmatpush.msrb.mxu1 %v7828_v23 }
0x151c   : > { %v4883_v47 = vadd.f32 %v7877_v62, %v4881_v41 }
0x151d   : > { %5118 = vmatpush.msrb.mxu1 %v7830_v28  ;;  %v4780_v28 = vmul.f32 0.35355338, %v4774_v9 }
0x151e   : > { %v4885_v40 = vmul.f32 %v4883_v47, %v7887_v44  ;;  %5260 = vrot.lane.b32.xlu2 %v4748_v57, %s6613_s15 }
0x151f   : > { %5119 = vmatpush.msrb.mxu1 %v7834_v45 }
0x1520   : > { %6118 = vmatmul.msk.f32.gmra.mxu1 %vm1228_vm2, %v4885_v40 }
0x1521   : > { %v5069_v42 = vpop.f32.mrf.mxu3  ;;  %v4986_v6 = vpop.f32.mrf.mxu0 }
0x1528   : > { %6126 = vmatmul.msk.f32.vlgmr.msra.gmra.mxu1 %vm1138_vm0, %v7240_v33 }
0x1529   : > { %6144 = vmatpush.msk.msra.mxu1 %vm2316_vm13, %v7643_v15  ;;  %v5072_v7 = vpop.f32.mrf.mxu3  ;;  %v4989_v43 = vpop.f32.mrf.mxu0 }
0x152a   : > { %v4990_v24 = vadd.f32 %v4989_v43, %v4960_v46 }
0x1530   : > { %6127 = vmatmul.msk.f32.gmra.mxu1 %vm1138_vm0, %v7244_v60  ;;  %v4987_v60 = vadd.f32 %v4986_v6, %v4957_v38 }
0x1531   : > { %v5092_v51 = vpop.f32.mrf.mxu0 }
0x1538   : > { %6135 = vmatmul.msk.f32.vlgmr.msrb.gmra.mxu1 %vm1636_vm7, %v5069_v42 }
0x1540   : > { %6136 = vmatmul.msk.f32.gmra.mxu1 %vm1636_vm7, %v5072_v7 }
0x1595   : > { %v4909_v23 = vpop.f32.mrf.mxu1 }
0x1596   : > { %v4915_v45 = vmul.f32 0.35355338, %v4909_v23 }
0x1598   : > { %v5187_v48 = vmax.f32 %v4780_v28, %v4915_v45 }
0x159d   : > { %v4912_v37 = vpop.f32.mrf.mxu1 }
0x159e   : > { %v7930_v33 = vmul.f32 0.35355338, %v4912_v37 }
0x15a0   : > { %v5188_v27 = vmax.f32 %v7928_v20, %v7930_v33 }
0x15a5   : > { %v5009_v30 = vpop.f32.mrf.mxu1 }
0x15a6   : > { %v5015_v3 = vadd.f32 %v5009_v30, %v4987_v60 }
0x15a8   : > { %v5017_v55 = vadd.f32 %v7877_v62, %v5015_v3 }
0x15aa   : > { %v5019_v22 = vmul.f32 %v5017_v55, %v7879_v17  ;;  %5344 = vrot.lane.b32.xlu1 %v5017_v55, %s6613_s15 }
0x15ac   : > { %6128 = vmatmul.msk.f32.vlgmr.msrb.gmra.mxu2 %vm1228_vm2, %v5019_v22 }
0x15ad   : > { %v5012_v29 = vpop.f32.mrf.mxu1  ;;  %6147 = vmatpush.msk.msrb.mxu2 %vm2316_vm13, %v7643_v15 }
0x15ae   : > { %v5016_v14 = vadd.f32 %v5012_v29, %v4990_v24 }
0x15b0   : > { %v5018_v32 = vadd.f32 %v7877_v62, %v5016_v14 }
0x15b2   : > { %v5020_v16 = vmul.f32 %v5018_v32, %v7887_v44  ;;  %5303 = vrot.lane.b32.xlu1 %v4883_v47, %s6613_s15 }
0x15b4   : > { %6129 = vmatmul.msk.f32.gmra.mxu2 %vm1228_vm2, %v5020_v16 }
0x15b5   : > { %v5121_v54 = vpop.f32.mrf.mxu1 }
0x15b6   : > { %v5122_v31 = vadd.f32 %v5121_v54, %v5092_v51  ;;  %v6154_v54 = vld [vmem:[%s8052_s18 + $0x38] sm:$0xff] }
0x15b7   : > { %5420 = vmatpush.msra.mxu0 %v6154_v54  ;;  %v5442_v51 = vld [vmem:[#allocation4 + $0x78] sm:$0xff] }
0x15b8   : > { %5466 = vmatpush.msrb.mxu1 %v5442_v51 }
0x15ba   : > { %5562 = vrot.lane.b32.xlu1 %v7792_v36, %s6615_s1  ;;  %s8059_s1 = sld [smem:[#allocation28_spill]] }
0x15bc   : > { %6137 = vmatmul.msk.f32.vlgmr.msra.gmra.mxu2 %vm1138_vm0, %v7263_v58  ;;  %v5095_v58 = vpop.f32.mrf.mxu0 }
0x15bd   : > { %v5124_v36 = vpop.f32.mrf.mxu1 }
0x15c4   : > { %6138 = vmatmul.msk.f32.gmra.mxu2 %vm1138_vm0, %v7267_v50  ;;  %v5125_v50 = vadd.f32 %v5124_v36, %v5095_v58 }
0x161c   : > { %v5345_v36 = vpop.permute.xlu1 %5344 }
0x162f   : > { %v5044_v19 = vpop.f32.mrf.mxu2 }
0x1630   : > { %v5050_v15 = vmul.f32 0.35355338, %v5044_v19 }
0x1632   : > { %v5189_v2 = vmax.f32 %v5187_v48, %v5050_v15 }
0x1637   : > { %v5047_v25 = vpop.f32.mrf.mxu2 }
0x1638   : > { %v5051_v4 = vmul.f32 0.35355338, %v5047_v25 }
0x163a   : > { %v5190_v11 = vmax.f32 %v5188_v27, %v5051_v4 }
0x163f   : > { %v5144_v57 = vpop.f32.mrf.mxu2 }
0x1640   : > { %v5150_v35 = vadd.f32 %v5144_v57, %v5122_v31  ;;  %v5259_v31 = vpop.permute.xlu0 %5258  ;;  %v5302_v57 = vpop.permute.xlu2 %5301 }
0x1642   : > { %v5152_v52 = vadd.f32 %v7877_v62, %v5150_v35 }
0x1644   : > { %v5154_v34 = vmul.f32 %v5152_v52, %v7879_v17  ;;  %5387 = vrot.lane.b32.xlu0 %v5152_v52, %s6613_s15 }
0x1646   : > { %6139 = vmatmul.msk.f32.vlgmr.msra.gmra.mxu3 %vm1228_vm2, %v5154_v34 }
0x1647   : > { %v5147_v53 = vpop.f32.mrf.mxu2 }
0x1648   : > { %v5151_v56 = vadd.f32 %v5147_v53, %v5125_v50 }
0x164a   : > { %v5153_v9 = vadd.f32 %v7877_v62, %v5151_v56 }
0x164c   : > { %v5155_v8 = vmul.f32 %v5153_v9, %v7887_v44  ;;  %5346 = vrot.lane.b32.xlu0 %v5018_v32, %s6613_s15  ;;  %5389 = vrot.lane.b32.xlu2 %v5153_v9, %s6613_s15  ;;  %v5261_v9 = vpop.permute.xlu2 %5260  ;;  %s8058_s15 = sld [smem:[#allocation27_spill]] }
0x164e   : > { %6140 = vmatmul.msk.f32.gmra.mxu3 %vm1228_vm2, %v5155_v8 }
0x1652   : > { %v5575_v51 = vld [vmem:[%s8058_s15 + $0x18] sm:$0xff] }
0x1654   : > { %5567 = vrot.lane.b32.xlu0 %v4584_v39, %s6616_s3 }
0x16b6   : > { %v5388_v34 = vpop.permute.xlu0 %5387 }
0x16c9   : > { %v5179_v17 = vpop.f32.mrf.mxu3 }
0x16ca   : > { %v5185_v21 = vmul.f32 0.35355338, %v5179_v17 }
0x16cc   : > { %v5191_v10 = vmax.f32 %v5189_v2, %v5185_v21 }
0x16ce   : > { %v5193_v13 = vsub.f32 %v4780_v28, %v5191_v10  ;;  %v5199_v18 = vsub.f32 %v4915_v45, %v5191_v10  ;;  %v5205_v49 = vsub.f32 %v5050_v15, %v5191_v10  ;;  %v5211_v59 = vsub.f32 %v5185_v21, %v5191_v10 }
0x16d0   : > { %v5195_v62 = vmul.f32 1.442695, %v5193_v13  ;;  %v5201_v5 = vmul.f32 1.442695, %v5199_v18  ;;  %v5207_v44 = vmul.f32 1.442695, %v5205_v49  ;;  %v5304_v49 = vpop.permute.xlu1 %5303 }
0x16d1   : > { %v5182_v63 = vpop.f32.mrf.mxu3  ;;  %v5213_v41 = vmul.f32 1.442695, %v5211_v59 }
0x16d2   : > { %6388 = vpow2.f32 %v5195_v62  ;;  %v5186_v12 = vmul.f32 0.35355338, %v5182_v63 }
0x16d3   : > { %6390 = vpow2.f32 %v5201_v5 }
0x16d4   : > { %v5192_v47 = vmax.f32 %v5190_v11, %v5186_v12  ;;  %6392 = vpow2.f32 %v5207_v44  ;;  %v6153_v11 = vld [vmem:[%s8052_s18 + $0x30] sm:$0xff]  ;;  %v5347_v44 = vpop.permute.xlu0 %5346 }
0x16d5   : > { %6394 = vpow2.f32 %v5213_v41  ;;  %5421 = vmatpush.msra.mxu0 %v6153_v11 }
0x16d6   : > { %v5194_v61 = vsub.f32 %v7928_v20, %v5192_v47  ;;  %v5200_v39 = vsub.f32 %v7930_v33, %v5192_v47  ;;  %v5206_v40 = vsub.f32 %v5051_v4, %v5192_v47  ;;  %v5212_v38 = vsub.f32 %v5186_v12, %v5192_v47 }
0x16d8   : > { %v6389_v46 = vpop.eup %6388  ;;  %v5197_v42 = vmul.f32 1.442695, %v5194_v61  ;;  %v5203_v7 = vmul.f32 1.442695, %v5200_v39  ;;  %v5209_v28 = vmul.f32 1.442695, %v5206_v40  ;;  %v5390_v61 = vpop.permute.xlu2 %5389 }
0x16d9   : > { %v6391_v23 = vpop.eup %6390  ;;  %v5215_v37 = vmul.f32 1.442695, %v5212_v38 }
0x16da   : > { %v5217_v45 = vadd.f32 %v6391_v23, %v6389_v46  ;;  %6396 = vpow2.f32 %v5197_v42  ;;  %v6393_v48 = vpop.eup %6392  ;;  %v5440_v42 = vld [vmem:[#allocation4 + $0x68] sm:$0xff] }
0x16db   : > { %6398 = vpow2.f32 %v5203_v7  ;;  %v6395_v27 = vpop.eup %6394  ;;  %v5439_v7 = vld [vmem:[#allocation4 + $0x60] sm:$0xff] }
0x16dc   : > { %v5219_v6 = vadd.f32 %v6393_v48, %v5217_v45  ;;  %6400 = vpow2.f32 %v5209_v28  ;;  %v6291_v28 = vld [vmem:[%s8053_s0 + $0x3] ss:$0 sm:$0xff] }
0x16dd   : > { %6402 = vpow2.f32 %v5215_v37 }
0x16de   : > { %v5221_v60 = vadd.f32 %v6395_v27, %v5219_v6 }
0x16e0   : > { %v6397_v20 = vpop.eup %6396  ;;  %6404 = vrcp.f32 %v5221_v60 }
0x16e1   : > { %v6399_v33 = vpop.eup %6398 }
0x16e2   : > { %v5218_v30 = vadd.f32 %v6399_v33, %v6397_v20  ;;  %v6401_v3 = vpop.eup %6400 }
0x16e3   : > { %v6403_v43 = vpop.eup %6402 }
0x16e4   : > { %v5220_v55 = vadd.f32 %v6401_v3, %v5218_v30  ;;  %v5480_v30 = vld [vmem:[#allocation6 + $0x60] sm:$0xff] }
0x16e6   : > { %v6405_v22 = vpop.eup %6404  ;;  %v5222_v24 = vadd.f32 %v6403_v43, %v5220_v55  ;;  %v6292_v55 = vld [vmem:[%s8054_s2 + $0x3] ss:$0 sm:$0xff] }
0x16e7   : > { %v5354_v29 = vmul.f32 %v6405_v22, %v6395_v27  ;;  %v5225_v14 = vmul.f32 %v6405_v22, %v6389_v46  ;;  %v5268_v32 = vmul.f32 %v6405_v22, %v6391_v23  ;;  %v5311_v16 = vmul.f32 %v6405_v22, %v6393_v48  ;;  %v5441_v46 = vld [vmem:[#allocation4 + $0x70] sm:$0xff]  ;;  %v5483_v23 = vld [vmem:[#allocation6 + $0x78] sm:$0xff] }
0x16e8   : > { %6406 = vrcp.f32 %v5222_v24  ;;  %5467 = vmatpush.msrb.mxu1 %v5441_v46  ;;  %5507 = vmatpush.msra.mxu2 %v5483_v23 }
0x16e9   : > { %6142 = vmatmul.msk.f32.vlgmr.msrb.gmra.mxu0 %vm2309_vm14, %v5225_v14  ;;  %6145 = vmatmul.msk.f32.vlgmr.msra.gmra.mxu1 %vm2309_vm14, %v5268_v32  ;;  %v5523_v14 = vld [vmem:[#allocation7 + $0x70] sm:$0xff]  ;;  %v5522_v32 = vld [vmem:[#allocation7 + $0x68] sm:$0xff] }
0x16ea   : > { %6148 = vmatmul.msk.f32.vlgmr.msrb.gmra.mxu2 %vm2309_vm14, %v5311_v16  ;;  %6151 = vmatmul.msk.f32.vlgmr.msrb.gmra.mxu3 %vm2309_vm14, %v5354_v29  ;;  %v5521_v16 = vld [vmem:[#allocation7 + $0x60] sm:$0xff] }
0x16eb   : > { %5468 = vmatpush.msrb.mxu1 %v5440_v42  ;;  %5598 = vmatpush.msrb.mxu0 %v5575_v51 }
0x16ed   : > { %5469 = vmatpush.msrb.mxu1 %v5439_v7 }
0x16ee   : > { %v6407_v19 = vpop.eup %6406 }
0x16ef   : > { %v5226_v15 = vmul.f32 %v6407_v19, %v6397_v20  ;;  %v5269_v2 = vmul.f32 %v6407_v19, %v6399_v33  ;;  %v5312_v25 = vmul.f32 %v6407_v19, %v6401_v3  ;;  %v5355_v4 = vmul.f32 %v6407_v19, %v6403_v43  ;;  %v5482_v20 = vld [vmem:[#allocation6 + $0x70] sm:$0xff]  ;;  %v5481_v33 = vld [vmem:[#allocation6 + $0x68] sm:$0xff]  ;;  %v5524_v3 = vld [vmem:[#allocation7 + $0x78] sm:$0xff] }
0x16f0   : > { %5508 = vmatpush.msra.mxu2 %v5482_v20  ;;  %5548 = vmatpush.msra.mxu3 %v5524_v3  ;;  %v6293_v19 = vld [vmem:[%s8055_s23 + $0x3] ss:$0 sm:$0xff] }
0x16f1   : > { %6143 = vmatmul.msk.f32.gmra.mxu0 %vm2309_vm14, %v5226_v15  ;;  %6146 = vmatmul.msk.f32.gmra.mxu1 %vm2309_vm14, %v5269_v2 }
0x16f2   : > { %6149 = vmatmul.msk.f32.gmra.mxu2 %vm2309_vm14, %v5312_v25  ;;  %6152 = vmatmul.msk.f32.gmra.mxu3 %vm2309_vm14, %v5355_v4 }
0x16f3   : > { %5509 = vmatpush.msra.mxu2 %v5481_v33  ;;  %5549 = vmatpush.msra.mxu3 %v5523_v14 }
0x16f5   : > { %5510 = vmatpush.msra.mxu2 %v5480_v30  ;;  %5550 = vmatpush.msra.mxu3 %v5522_v32 }
0x16f7   : > { %5551 = vmatpush.msra.mxu3 %v5521_v16 }
0x1766   : > { %v5250_v35 = vpop.f32.mrf.mxu0  ;;  %v5293_v52 = vpop.f32.mrf.mxu1 }
0x1767   : > { %v5264_v58 = vmul.f32 %v5259_v31, %v5250_v35  ;;  %v5307_v50 = vmul.f32 %v5302_v57, %v5293_v52  ;;  %v5574_v31 = vld [vmem:[%s8058_s15 + $0x10] sm:$0xff]  ;;  %v5573_v57 = vld [vmem:[%s8058_s15 + $0x8] sm:$0xff]  ;;  %v5572_v35 = vld [vmem:[%s8058_s15] sm:$0xff] }
0x1768   : > { %5599 = vmatpush.msrb.mxu0 %v5574_v31  ;;  %v6431_v52 = vld [vmem:[%s6906_s16 + $0x8] sm:$0xff] }
0x1769   : > { %v5309_v8 = vadd.f32 %v5307_v50, %v5264_v58  ;;  %v6294_v50 = vld [vmem:[%s8056_s11 + $0x3] ss:$0 sm:$0xff] }
0x176a   : > { %5600 = vmatpush.msrb.mxu0 %v5573_v57 }
0x176c   : > { %5601 = vmatpush.msrb.mxu0 %v5572_v35 }
0x176d   : > { %v5336_v53 = vpop.f32.mrf.mxu2  ;;  %v5379_v56 = vpop.f32.mrf.mxu3 }
0x176e   : > { %v5350_v17 = vmul.f32 %v5345_v36, %v5336_v53  ;;  %v5253_v21 = vpop.f32.mrf.mxu0  ;;  %v5296_v10 = vpop.f32.mrf.mxu1  ;;  %v5393_v18 = vmul.f32 %v5388_v34, %v5379_v56  ;;  %v6432_v34 = vld [vmem:[%s6906_s16] sm:$0xff]  ;;  %s1122_s16 = scalar_lea.vmem %s6780_s20, %s6888_s26 }
0x176f   : > { %v5265_v62 = vmul.f32 %v5261_v9, %v5253_v21  ;;  %v5308_v5 = vmul.f32 %v5304_v49, %v5296_v10  ;;  %vm5609_vm4 = vcmp.gt.f32.partialorder %v6432_v34, 0.0  ;;  %v5568_v21 = vpop.permute.xlu0 %5567 }
0x1770   : > { %v5352_v13 = vadd.f32 %v5350_v17, %v5309_v8  ;;  %v5615_v58 = vsel %vm5609_vm4, 1, %v6612_v0  ;;  %v5563_v8 = vpop.permute.xlu1 %5562 }
0x1771   : > { %v5310_v41 = vadd.f32 %v5308_v5, %v5265_v62  ;;  %5618 = vperm.xlu2 %6266, %v5615_v58   ;;  %v6433_v62 = vld [vmem:[%s6895_s10] sm:$0xff] }
0x1772   : > { %v5395_v59 = vadd.f32 %v5393_v18, %v5352_v13  ;;  %6408 = vlog2.f32 %v6433_v62 }
0x1774   : > { %6155 = vmatmul.msk.f32.vlgmr.msra.gmra.mxu0 %vm1228_vm2, %v5395_v59 }
0x1775   : > { %v5339_v63 = vpop.f32.mrf.mxu2  ;;  %v5382_v12 = vpop.f32.mrf.mxu3 }
0x1776   : > { %v5351_v47 = vmul.f32 %v5347_v44, %v5339_v63  ;;  %v5394_v40 = vmul.f32 %v5390_v61, %v5382_v12  ;;  %v6295_v44 = vld [vmem:[%s8059_s1] ss:$0 sm:$0xff]  ;;  %v6434_v12 = vld [vmem:[%s6895_s10 + $0x8] sm:$0xff] }
0x1777   : > { %6410 = vlog2.f32 %v6434_v12 }
0x1778   : > { %v5353_v39 = vadd.f32 %v5351_v47, %v5310_v41  ;;  %v6409_v5 = vpop.eup %6408 }
0x1779   : > { %v5612_v41 = vmul.f32 0.6931472, %v6409_v5 }
0x177a   : > { %v5396_v38 = vadd.f32 %v5394_v40, %v5353_v39 }
0x177c   : > { %6156 = vmatmul.msk.f32.gmra.mxu0 %vm1228_vm2, %v5396_v38  ;;  %vm5610_vm2 = vcmp.gt.f32.partialorder %v6431_v52, 0.0 }
0x177d   : > { %v5616_v36 = vsel %vm5610_vm2, 1, %v6612_v0  ;;  %v6411_v40 = vpop.eup %6410 }
0x177e   : > { %5621 = vperm.xlu1 %6267, %v5616_v36   ;;  %v5614_v46 = vmul.f32 0.6931472, %v6411_v40 }
0x17cb   : > { %v5619_v63 = vpop.permute.xlu2 %5618 }
0x17cc   : > { %vm5623_vm5 = vcmp.eq.s32.totalorder %v5619_v63, 1 }
0x17f0   : > { %v5622_v38 = vpop.permute.xlu1 %5621 }
0x17f1   : > { %v5423_v45 = vpop.f32.mrf.mxu0 }
0x17f2   : > { %v5429_v48 = vadd.f32 %v5423_v45, %v7795_v1 }
0x17f4   : > { %v5436_v37 = vadd.f32 %v6291_v28, %v5429_v48 }
0x17f6   : > { %6159 = vmatmul.msk.f32.vlgmr.msrb.gmra.mxu1 %vm1636_vm7, %v5436_v37 }
0x17f9   : > { %v5426_v6 = vpop.f32.mrf.mxu0 }
0x17fa   : > { %v5430_v27 = vadd.f32 %v5426_v6, %v7802_v26 }
0x17fc   : > { %v5437_v60 = vadd.f32 %v6291_v28, %v5430_v27 }
0x17fe   : > { %6160 = vmatmul.msk.f32.gmra.mxu1 %vm1636_vm7, %v5437_v60 }
0x1873   : > { %v5471_v1 = vpop.f32.mrf.mxu1 }
0x1874   : > { %v5472_v43 = vadd.f32 %v6292_v55, %v5471_v1 }
0x1876   : > { %v5477_v22 = vmax.f32 %v5472_v43, 0.0 }
0x1878   : > { %6162 = vmatmul.msk.f32.vlgmr.msra.gmra.mxu2 %vm1636_vm7, %v5477_v22 }
0x187b   : > { %v5474_v24 = vpop.f32.mrf.mxu1 }
0x187c   : > { %v5475_v26 = vadd.f32 %v6292_v55, %v5474_v24 }
0x187e   : > { %v5478_v29 = vmax.f32 %v5475_v26, 0.0 }
0x1880   : > { %6163 = vmatmul.msk.f32.gmra.mxu2 %vm1636_vm7, %v5478_v29 }
0x18fb   : > { %v5512_v15 = vpop.f32.mrf.mxu2 }
0x18fc   : > { %v5513_v2 = vadd.f32 %v6293_v19, %v5512_v15 }
0x18fe   : > { %v5518_v25 = vmax.f32 %v5513_v2, 0.0 }
0x1900   : > { %6165 = vmatmul.msk.f32.vlgmr.msra.gmra.mxu3 %vm1636_vm7, %v5518_v25 }
0x1903   : > { %v5515_v4 = vpop.f32.mrf.mxu2 }
0x1904   : > { %v5516_v54 = vadd.f32 %v6293_v19, %v5515_v4 }
0x1906   : > { %v5519_v11 = vmax.f32 %v5516_v54, 0.0 }
0x1908   : > { %6166 = vmatmul.msk.f32.gmra.mxu3 %vm1636_vm7, %v5519_v11 }
0x1983   : > { %v5553_v53 = vpop.f32.mrf.mxu3 }
0x1984   : > { %v5554_v56 = vadd.f32 %v6294_v50, %v5553_v53 }
0x1986   : > { %v5559_v9 = vadd.f32 %v5554_v56, %v5436_v37 }
0x1988   : > { %v5565_v17 = vmul.f32 %v5563_v8, %v5559_v9 }
0x198a   : > { %v5570_v10 = vadd.f32 %v5568_v21, %v5565_v17 }
0x198b   : > { %v5556_v13 = vpop.f32.mrf.mxu3 }
0x198c   : > { %v5557_v18 = vadd.f32 %v6294_v50, %v5556_v13  ;;  %6167 = vmatmul.msk.f32.vlgmr.msrb.gmra.mxu0 %vm1636_vm7, %v5570_v10 }
0x198e   : > { %v5560_v49 = vadd.f32 %v5557_v18, %v5437_v60 }
0x1990   : > { %v5566_v0 = vmul.f32 %v5563_v8, %v5560_v49 }
0x1992   : > { %v5571_v59 = vadd.f32 %v5568_v21, %v5566_v0 }
0x1994   : > { %6168 = vmatmul.msk.f32.gmra.mxu0 %vm1636_vm7, %v5571_v59  ;;  %vm5624_vm7 = vcmp.eq.s32.totalorder %v5622_v38, 1 }
0x1a09   : > { %v5603_v47 = vpop.f32.mrf.mxu0 }
0x1a0a   : > { %v5604_v61 = vadd.f32 %v6295_v44, %v5603_v47 }
0x1a0c   : > { %v5625_v39 = vsel %vm5623_vm5, %v5612_v41, %v5604_v61 }
0x1a0d   : > { %5627 = vst.msk [vmem:[%s1122_s16] sm:$0xff] %vm1138_vm0, %v5625_v39 }
0x1a11   : > { %v5606_v42 = vpop.f32.mrf.mxu0 }
0x1a12   : > { %v5607_v7 = vadd.f32 %v6295_v44, %v5606_v42 }
0x1a14   : > { %v5626_v23 = vsel %vm5624_vm7, %v5614_v46, %v5607_v7 }
0x1a15   : > { %5628 = vst.msk [vmem:[%s1122_s16 + $0x8] sm:$0xff] %vm1138_vm0, %v5626_v23 }
0x1a16 PF: > { %s76_s22 = sadd.s32 1, %s6573_s22  }
0x1a17   : > { %p73_p2 = scmp.ge.s32.totalorder %s76_s22, 4  }
0x1a19   :  { %75 = sbr.rel (!%p73_p2) target bundleno = 54 (0x36), region = 282 }
0x1a1e   :  { %5650 = vsyncpa [#allocation3], 1 }
0x1a1f   :  { %5652 = vsyncpa [#allocation3 + $0x1], 1 }
0x1a20   :  { %5653 = vsyncpa [#allocation5], 1 }
0x1a21   :  { %5654 = vsyncpa [#allocation8], 1 }

</bundles_post_ra>
